<compile_context>
chip_gen: v7x
topology: tpu7x:2x2x1
jax: 0.10.0
libtpu: 0.0.40
codegen_flags: <defaults>
</compile_context>

<pallas_src>
import numpy as np

import jax
import jax.numpy as jnp
from jax.experimental import pallas as pl
from jax.experimental.pallas import tpu as pltpu


# Architecture constants implied by the module.
_CH = (3, 8, 16, 32)      # channels: input, conv1, conv2, conv3
_HS = (64, 32, 16, 8)     # spatial sizes: input, after conv1/2/3
_FC1 = 64


# ----------------------------------------------------------------------------
# Fused forward kernel: one grid step == one image.
# ----------------------------------------------------------------------------
def _imgenc_kernel(x_ref, sel1_ref, w1_ref, b1_ref,
                   sel2_ref, w2_ref, b2_ref,
                   sel3_ref, w3_ref, b3_ref,
                   wfc1_ref, bfc1_ref, wfc2_ref, bfc2_ref, o_ref):
    f32 = jnp.float32

    def conv(act, sel_ref, w_ref, b_ref, m, n):
        # act: (H_in, Ci*W_in)  ->  (H_out, Co*W_out), both lane-dense (n == 256).
        acc = jnp.zeros((m, n), f32)
        for kh in range(3):
            rows = jnp.dot(sel_ref[kh], act, preferred_element_type=f32)
            acc = acc + jnp.dot(rows, w_ref[kh], preferred_element_type=f32)
        return jnp.maximum(acc + b_ref[...], 0.0)

    # ---- conv1 (3 -> 8, 64x64 -> 32x32): input channels arrive as separate
    # (64, 64) planes of the NCHW block, so run the matmuls per input channel.
    acc1 = jnp.zeros((32, 256), f32)
    for kh in range(3):
        sel = sel1_ref[kh]                                           # (32, 64)
        for ci in range(3):
            rows = jnp.dot(sel, x_ref[0, ci], preferred_element_type=f32)       # (32, 64)
            acc1 = acc1 + jnp.dot(rows, w1_ref[kh, ci], preferred_element_type=f32)
    out1 = jnp.maximum(acc1 + b1_ref[...], 0.0)      # (32, 256) == [h, c*32 + w]

    # ---- conv2 (8 -> 16) and conv3 (16 -> 32): out1/out2 are already in the
    # (H, C*W) layout the next layer consumes, so no data movement in between.
    out2 = conv(out1, sel2_ref, w2_ref, b2_ref, 16, 256)   # (16, 256) == [h, c*16 + w]
    out3 = conv(out2, sel3_ref, w3_ref, b3_ref, 8, 256)    # (8, 256)  == [h, c*8  + w]

    # ---- fc1: the NCHW flatten is folded into the row-permuted weight (8, 256, 64).
    h1 = bfc1_ref[...].astype(f32)                                   # (1, 64)
    for ho in range(8):
        h1 = h1 + jnp.dot(out3[ho:ho + 1, :], wfc1_ref[ho], preferred_element_type=f32)
    h1 = jnp.maximum(h1, 0.0)

    # ---- fc2
    y = jnp.dot(h1, wfc2_ref[...], preferred_element_type=f32) + bfc2_ref[...]
    o_ref[0] = y.astype(o_ref.dtype)


@jax.jit
def img_enc_forward(x_nchw, kp):
    """x_nchw: (B, 3, 64, 64) float32, kp: kernel-ready params from prepare_params."""
    B = x_nchw.shape[0]
    F = kp["bfc2"].shape[-1]

    def const(rank):
        return lambda b: (0,) * rank

    out = pl.pallas_call(
        _imgenc_kernel,
        out_shape=jax.ShapeDtypeStruct((B, 1, F), jnp.float32),
        grid=(B,),
        in_specs=[
            pl.BlockSpec((1, 3, 64, 64), lambda b: (b, 0, 0, 0)),   # x (NCHW)
            pl.BlockSpec((3, 32, 64), const(3)),                    # sel1
            pl.BlockSpec((3, 3, 64, 256), const(4)),                # w1 (per kh, ci)
            pl.BlockSpec((1, 256), const(2)),                       # b1
            pl.BlockSpec((3, 16, 32), const(3)),                    # sel2
            pl.BlockSpec((3, 256, 256), const(3)),                  # w2
            pl.BlockSpec((1, 256), const(2)),                       # b2
            pl.BlockSpec((3, 8, 16), const(3)),                     # sel3
            pl.BlockSpec((3, 256, 256), const(3)),                  # w3
            pl.BlockSpec((1, 256), const(2)),                       # b3
            pl.BlockSpec((8, 256, 64), const(3)),                   # wfc1 (flatten-permuted)
            pl.BlockSpec((1, 64), const(2)),                        # bfc1
            pl.BlockSpec((64, F), const(2)),                        # wfc2
            pl.BlockSpec((1, F), const(2)),                         # bfc2
        ],
        out_specs=pl.BlockSpec((1, 1, F), lambda b: (b, 0, 0)),
        compiler_params=pltpu.CompilerParams(
            dimension_semantics=("parallel",),
            vmem_limit_bytes=32 * 1024 * 1024),
    )(x_nchw, kp["sel1"], kp["w1"], kp["b1"],
      kp["sel2"], kp["w2"], kp["b2"],
      kp["sel3"], kp["w3"], kp["b3"],
      kp["wfc1"], kp["bfc1"], kp["wfc2"], kp["bfc2"])
    return out.reshape(B, F)


# ----------------------------------------------------------------------------
# One-time parameter preparation (host numpy; runs outside the hot path).
# ----------------------------------------------------------------------------
def prepare_params(params):
    """Turn PyTorch-layout params into MXU-friendly kernel operands.

    Note: linear weights here are stored (in, out); real torch.nn.Linear weights
    are (out, in) and would need a transpose before calling this.
    """
    kp = {}
    specs = [("1", _CH[0], _CH[1], _HS[0]),
             ("2", _CH[1], _CH[2], _HS[1]),
             ("3", _CH[2], _CH[3], _HS[2])]
    for name, ci, co, hw_in in specs:
        w = np.asarray(params[f"c{name}_w"], np.float32)     # (co, ci, 3, 3) OIHW
        b = np.asarray(params[f"c{name}_b"], np.float32)
        hw_out = hw_in // 2

        # Row-selection matrices: sel[kh, r, h] = 1 where h == 2r + kh - 1
        # (missing 1s encode the zero row-padding).
        sel = np.zeros((3, hw_out, hw_in), np.float32)
        for kh in range(3):
            for r in range(hw_out):
                h = 2 * r + kh - 1
                if 0 <= h < hw_in:
                    sel[kh, r, h] = 1.0

        # Width-expanded weights: big[kh, ci*hw_in + w, co*hw_out + wo] picks up the
        # kw taps (stride 2, left pad folded in by omission).
        big = np.zeros((3, ci * hw_in, co * hw_out), np.float32)
        ci_idx = np.arange(ci)[:, None]
        co_idx = np.arange(co)[None, :]
        for kh in range(3):
            for kw in range(3):
                for wo in range(hw_out):
                    wi = 2 * wo + kw - 1
                    if 0 <= wi < hw_in:
                        big[kh, ci_idx * hw_in + wi,
                            co_idx * hw_out + wo] += w[:, :, kh, kw].T

        kp[f"sel{name}"] = jnp.asarray(sel)
        kp[f"b{name}"] = jnp.asarray(np.repeat(b, hw_out)[None, :])   # lane = co*Wo + wo
        if name == "1":
            kp["w1"] = jnp.asarray(big.reshape(3, ci, hw_in, co * hw_out))
        else:
            kp[f"w{name}"] = jnp.asarray(big)

    # fc1: fold the NCHW flatten permutation into the weight rows.
    w1 = np.asarray(params["fc1_w"], np.float32)             # (2048, 64) = (C*H*W, out)
    lane = np.arange(_CH[3] * _HS[3])                        # 256 lanes: c*8 + w
    c_l, w_l = lane // _HS[3], lane % _HS[3]
    wfc1 = np.zeros((_HS[3], _CH[3] * _HS[3], _FC1), np.float32)
    for ho in range(_HS[3]):
        wfc1[ho] = w1[c_l * (_HS[3] * _HS[3]) + ho * _HS[3] + w_l]
    kp["wfc1"] = jnp.asarray(wfc1)
    kp["bfc1"] = jnp.asarray(np.asarray(params["fc1_b"], np.float32)[None, :])
    kp["wfc2"] = jnp.asarray(np.asarray(params["fc2_w"], np.float32))
    kp["bfc2"] = jnp.asarray(np.asarray(params["fc2_b"], np.float32)[None, :])
    return kp


# ----------------------------------------------------------------------------
# Deterministic synthetic parameter init (PyTorch-default-like uniform bounds)
# ----------------------------------------------------------------------------
def init_params(key, img_feat_dim):
    def u(key, shape, fan_in):
        bound = 1.0 / jnp.sqrt(float(fan_in))
        return jax.random.uniform(key, shape, jnp.float32, -bound, bound)

    ks = jax.random.split(key, 10)
    p = {}
    p["c1_w"] = u(ks[0], (8, 3, 3, 3), 3 * 9)
    p["c1_b"] = u(ks[1], (8,), 3 * 9)
    p["c2_w"] = u(ks[2], (16, 8, 3, 3), 8 * 9)
    p["c2_b"] = u(ks[3], (16,), 8 * 9)
    p["c3_w"] = u(ks[4], (32, 16, 3, 3), 16 * 9)
    p["c3_b"] = u(ks[5], (32,), 16 * 9)
    p["fc1_w"] = u(ks[6], (32 * 8 * 8, 64), 32 * 8 * 8)   # stored (in, out)
    p["fc1_b"] = u(ks[7], (64,), 32 * 8 * 8)
    p["fc2_w"] = u(ks[8], (64, img_feat_dim), 64)
    p["fc2_b"] = u(ks[9], (img_feat_dim,), 64)
    return p


# ----------------------------------------------------------------------------
# Pure-JAX reference (PyTorch semantics) for the correctness check
# ----------------------------------------------------------------------------
def img_enc_reference(x_nchw, params):
    def conv(x, w, b):
        y = jax.lax.conv_general_dilated(
            x, w, window_strides=(2, 2), padding=((1, 1), (1, 1)),
            dimension_numbers=("NCHW", "OIHW", "NCHW"))
        return jax.nn.relu(y + b.reshape(1, -1, 1, 1))

    x = conv(x_nchw, params["c1_w"], params["c1_b"])
    x = conv(x, params["c2_w"], params["c2_b"])
    x = conv(x, params["c3_w"], params["c3_b"])
    x = x.reshape(x.shape[0], -1)                      # NCHW flatten == nn.Flatten
    x = jax.nn.relu(x @ params["fc1_w"] + params["fc1_b"])
    x = x @ params["fc2_w"] + params["fc2_b"]
    return x


if __name__ == "__main__":
    img_feat_dim = 32
    key = jax.random.PRNGKey(0)
    k_param, k_x = jax.random.split(key)
    params = init_params(k_param, img_feat_dim)
    kparams = prepare_params(params)

    # batch=2, 3 channels, 64x64 spatial (spatial size implied by Linear(32*8*8, 64))
    x = jax.random.normal(k_x, (2, 3, 64, 64), jnp.float32)

    out = jax.block_until_ready(img_enc_forward(x, kparams))
    assert out.shape == (2, img_feat_dim), out.shape

    ref = jax.block_until_ready(img_enc_reference(x, params))
    assert jnp.allclose(out, ref, rtol=1e-3, atol=1e-3), (
        float(jnp.max(jnp.abs(out - ref))))

    print("KERNEL_OK")
</pallas_src>

<mosaic_0001>
module attributes {stable_mosaic.version = 11 : i64} {
  func.func @_imgenc_kernel(%arg0: i32, %arg1: memref<1x3x64x64xf32, #tpu.memory_space<vmem>>, %arg2: memref<3x32x64xf32, #tpu.memory_space<vmem>>, %arg3: memref<3x3x64x256xf32, #tpu.memory_space<vmem>>, %arg4: memref<1x256xf32, #tpu.memory_space<vmem>>, %arg5: memref<3x16x32xf32, #tpu.memory_space<vmem>>, %arg6: memref<3x256x256xf32, #tpu.memory_space<vmem>>, %arg7: memref<1x256xf32, #tpu.memory_space<vmem>>, %arg8: memref<3x8x16xf32, #tpu.memory_space<vmem>>, %arg9: memref<3x256x256xf32, #tpu.memory_space<vmem>>, %arg10: memref<1x256xf32, #tpu.memory_space<vmem>>, %arg11: memref<8x256x64xf32, #tpu.memory_space<vmem>>, %arg12: memref<1x64xf32, #tpu.memory_space<vmem>>, %arg13: memref<64x32xf32, #tpu.memory_space<vmem>>, %arg14: memref<1x32xf32, #tpu.memory_space<vmem>>, %arg15: memref<1x1x32xf32, #tpu.memory_space<vmem>>) attributes {dimension_semantics = [#tpu.dimension_semantics<parallel>], iteration_bounds = array<i64: 2>, scalar_prefetch = 0 : i64, scratch_operands = 0 : i64, tpu.core_type = #tpu.core_type<tc>, window_params = [{transform_indices = @transform_0, window_bounds = array<i64: 1, 3, 64, 64>}, {pipeline_mode = #tpu.pipeline_mode<synchronous>, transform_indices = @transform_1, window_bounds = array<i64: 3, 32, 64>}, {pipeline_mode = #tpu.pipeline_mode<synchronous>, transform_indices = @transform_2, window_bounds = array<i64: 3, 3, 64, 256>}, {pipeline_mode = #tpu.pipeline_mode<synchronous>, transform_indices = @transform_3, window_bounds = array<i64: 1, 256>}, {pipeline_mode = #tpu.pipeline_mode<synchronous>, transform_indices = @transform_4, window_bounds = array<i64: 3, 16, 32>}, {pipeline_mode = #tpu.pipeline_mode<synchronous>, transform_indices = @transform_5, window_bounds = array<i64: 3, 256, 256>}, {pipeline_mode = #tpu.pipeline_mode<synchronous>, transform_indices = @transform_6, window_bounds = array<i64: 1, 256>}, {pipeline_mode = #tpu.pipeline_mode<synchronous>, transform_indices = @transform_7, window_bounds = array<i64: 3, 8, 16>}, {pipeline_mode = #tpu.pipeline_mode<synchronous>, transform_indices = @transform_8, window_bounds = array<i64: 3, 256, 256>}, {pipeline_mode = #tpu.pipeline_mode<synchronous>, transform_indices = @transform_9, window_bounds = array<i64: 1, 256>}, {pipeline_mode = #tpu.pipeline_mode<synchronous>, transform_indices = @transform_10, window_bounds = array<i64: 8, 256, 64>}, {pipeline_mode = #tpu.pipeline_mode<synchronous>, transform_indices = @transform_11, window_bounds = array<i64: 1, 64>}, {pipeline_mode = #tpu.pipeline_mode<synchronous>, transform_indices = @transform_12, window_bounds = array<i64: 64, 32>}, {pipeline_mode = #tpu.pipeline_mode<synchronous>, transform_indices = @transform_13, window_bounds = array<i64: 1, 32>}, {transform_indices = @transform_14, window_bounds = array<i64: 1, 1, 32>}]} {
    %cst = arith.constant 0.000000e+00 : f32
    %0 = vector.broadcast %cst : f32 to vector<32x256xf32>
    %c0 = arith.constant 0 : index
    %c0_0 = arith.constant 0 : index
    %c0_1 = arith.constant 0 : index
    %1 = vector.load %arg2[%c0, %c0_0, %c0_1] : memref<3x32x64xf32, #tpu.memory_space<vmem>>, vector<1x32x64xf32>
    %2 = vector.shape_cast %1 : vector<1x32x64xf32> to vector<32x64xf32>
    %c0_2 = arith.constant 0 : index
    %c0_3 = arith.constant 0 : index
    %c0_4 = arith.constant 0 : index
    %c0_5 = arith.constant 0 : index
    %3 = vector.load %arg1[%c0_2, %c0_3, %c0_4, %c0_5] : memref<1x3x64x64xf32, #tpu.memory_space<vmem>>, vector<1x1x64x64xf32>
    %4 = vector.shape_cast %3 : vector<1x1x64x64xf32> to vector<64x64xf32>
    %cst_6 = arith.constant dense<0.000000e+00> : vector<32x64xf32>
    %5 = tpu.matmul %2, %4, %cst_6 {dimension_numbers = #tpu.dot_dimension_numbers<[1], [0], [0], [1], [0, 0, 1, 1], [], []>} : vector<32x64xf32>, vector<64x64xf32>, vector<32x64xf32> -> vector<32x64xf32>
    %c0_7 = arith.constant 0 : index
    %c0_8 = arith.constant 0 : index
    %c0_9 = arith.constant 0 : index
    %c0_10 = arith.constant 0 : index
    %6 = vector.load %arg3[%c0_7, %c0_8, %c0_9, %c0_10] : memref<3x3x64x256xf32, #tpu.memory_space<vmem>>, vector<1x1x64x256xf32>
    %7 = vector.shape_cast %6 : vector<1x1x64x256xf32> to vector<64x256xf32>
    %cst_11 = arith.constant dense<0.000000e+00> : vector<32x256xf32>
    %8 = tpu.matmul %5, %7, %cst_11 {dimension_numbers = #tpu.dot_dimension_numbers<[1], [0], [0], [1], [0, 0, 1, 1], [], []>} : vector<32x64xf32>, vector<64x256xf32>, vector<32x256xf32> -> vector<32x256xf32>
    %9 = arith.addf %0, %8 : vector<32x256xf32>
    %c0_12 = arith.constant 0 : index
    %c1 = arith.constant 1 : index
    %c0_13 = arith.constant 0 : index
    %c0_14 = arith.constant 0 : index
    %10 = vector.load %arg1[%c0_12, %c1, %c0_13, %c0_14] : memref<1x3x64x64xf32, #tpu.memory_space<vmem>>, vector<1x1x64x64xf32>
    %11 = vector.shape_cast %10 : vector<1x1x64x64xf32> to vector<64x64xf32>
    %cst_15 = arith.constant dense<0.000000e+00> : vector<32x64xf32>
    %12 = tpu.matmul %2, %11, %cst_15 {dimension_numbers = #tpu.dot_dimension_numbers<[1], [0], [0], [1], [0, 0, 1, 1], [], []>} : vector<32x64xf32>, vector<64x64xf32>, vector<32x64xf32> -> vector<32x64xf32>
    %c0_16 = arith.constant 0 : index
    %c1_17 = arith.constant 1 : index
    %c0_18 = arith.constant 0 : index
    %c0_19 = arith.constant 0 : index
    %13 = vector.load %arg3[%c0_16, %c1_17, %c0_18, %c0_19] : memref<3x3x64x256xf32, #tpu.memory_space<vmem>>, vector<1x1x64x256xf32>
    %14 = vector.shape_cast %13 : vector<1x1x64x256xf32> to vector<64x256xf32>
    %cst_20 = arith.constant dense<0.000000e+00> : vector<32x256xf32>
    %15 = tpu.matmul %12, %14, %cst_20 {dimension_numbers = #tpu.dot_dimension_numbers<[1], [0], [0], [1], [0, 0, 1, 1], [], []>} : vector<32x64xf32>, vector<64x256xf32>, vector<32x256xf32> -> vector<32x256xf32>
    %16 = arith.addf %9, %15 : vector<32x256xf32>
    %c0_21 = arith.constant 0 : index
    %c2 = arith.constant 2 : index
    %c0_22 = arith.constant 0 : index
    %c0_23 = arith.constant 0 : index
    %17 = vector.load %arg1[%c0_21, %c2, %c0_22, %c0_23] : memref<1x3x64x64xf32, #tpu.memory_space<vmem>>, vector<1x1x64x64xf32>
    %18 = vector.shape_cast %17 : vector<1x1x64x64xf32> to vector<64x64xf32>
    %cst_24 = arith.constant dense<0.000000e+00> : vector<32x64xf32>
    %19 = tpu.matmul %2, %18, %cst_24 {dimension_numbers = #tpu.dot_dimension_numbers<[1], [0], [0], [1], [0, 0, 1, 1], [], []>} : vector<32x64xf32>, vector<64x64xf32>, vector<32x64xf32> -> vector<32x64xf32>
    %c0_25 = arith.constant 0 : index
    %c2_26 = arith.constant 2 : index
    %c0_27 = arith.constant 0 : index
    %c0_28 = arith.constant 0 : index
    %20 = vector.load %arg3[%c0_25, %c2_26, %c0_27, %c0_28] : memref<3x3x64x256xf32, #tpu.memory_space<vmem>>, vector<1x1x64x256xf32>
    %21 = vector.shape_cast %20 : vector<1x1x64x256xf32> to vector<64x256xf32>
    %cst_29 = arith.constant dense<0.000000e+00> : vector<32x256xf32>
    %22 = tpu.matmul %19, %21, %cst_29 {dimension_numbers = #tpu.dot_dimension_numbers<[1], [0], [0], [1], [0, 0, 1, 1], [], []>} : vector<32x64xf32>, vector<64x256xf32>, vector<32x256xf32> -> vector<32x256xf32>
    %23 = arith.addf %16, %22 : vector<32x256xf32>
    %c1_30 = arith.constant 1 : index
    %c0_31 = arith.constant 0 : index
    %c0_32 = arith.constant 0 : index
    %24 = vector.load %arg2[%c1_30, %c0_31, %c0_32] : memref<3x32x64xf32, #tpu.memory_space<vmem>>, vector<1x32x64xf32>
    %25 = vector.shape_cast %24 : vector<1x32x64xf32> to vector<32x64xf32>
    %c0_33 = arith.constant 0 : index
    %c0_34 = arith.constant 0 : index
    %c0_35 = arith.constant 0 : index
    %c0_36 = arith.constant 0 : index
    %26 = vector.load %arg1[%c0_33, %c0_34, %c0_35, %c0_36] : memref<1x3x64x64xf32, #tpu.memory_space<vmem>>, vector<1x1x64x64xf32>
    %27 = vector.shape_cast %26 : vector<1x1x64x64xf32> to vector<64x64xf32>
    %cst_37 = arith.constant dense<0.000000e+00> : vector<32x64xf32>
    %28 = tpu.matmul %25, %27, %cst_37 {dimension_numbers = #tpu.dot_dimension_numbers<[1], [0], [0], [1], [0, 0, 1, 1], [], []>} : vector<32x64xf32>, vector<64x64xf32>, vector<32x64xf32> -> vector<32x64xf32>
    %c1_38 = arith.constant 1 : index
    %c0_39 = arith.constant 0 : index
    %c0_40 = arith.constant 0 : index
    %c0_41 = arith.constant 0 : index
    %29 = vector.load %arg3[%c1_38, %c0_39, %c0_40, %c0_41] : memref<3x3x64x256xf32, #tpu.memory_space<vmem>>, vector<1x1x64x256xf32>
    %30 = vector.shape_cast %29 : vector<1x1x64x256xf32> to vector<64x256xf32>
    %cst_42 = arith.constant dense<0.000000e+00> : vector<32x256xf32>
    %31 = tpu.matmul %28, %30, %cst_42 {dimension_numbers = #tpu.dot_dimension_numbers<[1], [0], [0], [1], [0, 0, 1, 1], [], []>} : vector<32x64xf32>, vector<64x256xf32>, vector<32x256xf32> -> vector<32x256xf32>
    %32 = arith.addf %23, %31 : vector<32x256xf32>
    %c0_43 = arith.constant 0 : index
    %c1_44 = arith.constant 1 : index
    %c0_45 = arith.constant 0 : index
    %c0_46 = arith.constant 0 : index
    %33 = vector.load %arg1[%c0_43, %c1_44, %c0_45, %c0_46] : memref<1x3x64x64xf32, #tpu.memory_space<vmem>>, vector<1x1x64x64xf32>
    %34 = vector.shape_cast %33 : vector<1x1x64x64xf32> to vector<64x64xf32>
    %cst_47 = arith.constant dense<0.000000e+00> : vector<32x64xf32>
    %35 = tpu.matmul %25, %34, %cst_47 {dimension_numbers = #tpu.dot_dimension_numbers<[1], [0], [0], [1], [0, 0, 1, 1], [], []>} : vector<32x64xf32>, vector<64x64xf32>, vector<32x64xf32> -> vector<32x64xf32>
    %c1_48 = arith.constant 1 : index
    %c1_49 = arith.constant 1 : index
    %c0_50 = arith.constant 0 : index
    %c0_51 = arith.constant 0 : index
    %36 = vector.load %arg3[%c1_48, %c1_49, %c0_50, %c0_51] : memref<3x3x64x256xf32, #tpu.memory_space<vmem>>, vector<1x1x64x256xf32>
    %37 = vector.shape_cast %36 : vector<1x1x64x256xf32> to vector<64x256xf32>
    %cst_52 = arith.constant dense<0.000000e+00> : vector<32x256xf32>
    %38 = tpu.matmul %35, %37, %cst_52 {dimension_numbers = #tpu.dot_dimension_numbers<[1], [0], [0], [1], [0, 0, 1, 1], [], []>} : vector<32x64xf32>, vector<64x256xf32>, vector<32x256xf32> -> vector<32x256xf32>
    %39 = arith.addf %32, %38 : vector<32x256xf32>
    %c0_53 = arith.constant 0 : index
    %c2_54 = arith.constant 2 : index
    %c0_55 = arith.constant 0 : index
    %c0_56 = arith.constant 0 : index
    %40 = vector.load %arg1[%c0_53, %c2_54, %c0_55, %c0_56] : memref<1x3x64x64xf32, #tpu.memory_space<vmem>>, vector<1x1x64x64xf32>
    %41 = vector.shape_cast %40 : vector<1x1x64x64xf32> to vector<64x64xf32>
    %cst_57 = arith.constant dense<0.000000e+00> : vector<32x64xf32>
    %42 = tpu.matmul %25, %41, %cst_57 {dimension_numbers = #tpu.dot_dimension_numbers<[1], [0], [0], [1], [0, 0, 1, 1], [], []>} : vector<32x64xf32>, vector<64x64xf32>, vector<32x64xf32> -> vector<32x64xf32>
    %c1_58 = arith.constant 1 : index
    %c2_59 = arith.constant 2 : index
    %c0_60 = arith.constant 0 : index
    %c0_61 = arith.constant 0 : index
    %43 = vector.load %arg3[%c1_58, %c2_59, %c0_60, %c0_61] : memref<3x3x64x256xf32, #tpu.memory_space<vmem>>, vector<1x1x64x256xf32>
    %44 = vector.shape_cast %43 : vector<1x1x64x256xf32> to vector<64x256xf32>
    %cst_62 = arith.constant dense<0.000000e+00> : vector<32x256xf32>
    %45 = tpu.matmul %42, %44, %cst_62 {dimension_numbers = #tpu.dot_dimension_numbers<[1], [0], [0], [1], [0, 0, 1, 1], [], []>} : vector<32x64xf32>, vector<64x256xf32>, vector<32x256xf32> -> vector<32x256xf32>
    %46 = arith.addf %39, %45 : vector<32x256xf32>
    %c2_63 = arith.constant 2 : index
    %c0_64 = arith.constant 0 : index
    %c0_65 = arith.constant 0 : index
    %47 = vector.load %arg2[%c2_63, %c0_64, %c0_65] : memref<3x32x64xf32, #tpu.memory_space<vmem>>, vector<1x32x64xf32>
    %48 = vector.shape_cast %47 : vector<1x32x64xf32> to vector<32x64xf32>
    %c0_66 = arith.constant 0 : index
    %c0_67 = arith.constant 0 : index
    %c0_68 = arith.constant 0 : index
    %c0_69 = arith.constant 0 : index
    %49 = vector.load %arg1[%c0_66, %c0_67, %c0_68, %c0_69] : memref<1x3x64x64xf32, #tpu.memory_space<vmem>>, vector<1x1x64x64xf32>
    %50 = vector.shape_cast %49 : vector<1x1x64x64xf32> to vector<64x64xf32>
    %cst_70 = arith.constant dense<0.000000e+00> : vector<32x64xf32>
    %51 = tpu.matmul %48, %50, %cst_70 {dimension_numbers = #tpu.dot_dimension_numbers<[1], [0], [0], [1], [0, 0, 1, 1], [], []>} : vector<32x64xf32>, vector<64x64xf32>, vector<32x64xf32> -> vector<32x64xf32>
    %c2_71 = arith.constant 2 : index
    %c0_72 = arith.constant 0 : index
    %c0_73 = arith.constant 0 : index
    %c0_74 = arith.constant 0 : index
    %52 = vector.load %arg3[%c2_71, %c0_72, %c0_73, %c0_74] : memref<3x3x64x256xf32, #tpu.memory_space<vmem>>, vector<1x1x64x256xf32>
    %53 = vector.shape_cast %52 : vector<1x1x64x256xf32> to vector<64x256xf32>
    %cst_75 = arith.constant dense<0.000000e+00> : vector<32x256xf32>
    %54 = tpu.matmul %51, %53, %cst_75 {dimension_numbers = #tpu.dot_dimension_numbers<[1], [0], [0], [1], [0, 0, 1, 1], [], []>} : vector<32x64xf32>, vector<64x256xf32>, vector<32x256xf32> -> vector<32x256xf32>
    %55 = arith.addf %46, %54 : vector<32x256xf32>
    %c0_76 = arith.constant 0 : index
    %c1_77 = arith.constant 1 : index
    %c0_78 = arith.constant 0 : index
    %c0_79 = arith.constant 0 : index
    %56 = vector.load %arg1[%c0_76, %c1_77, %c0_78, %c0_79] : memref<1x3x64x64xf32, #tpu.memory_space<vmem>>, vector<1x1x64x64xf32>
    %57 = vector.shape_cast %56 : vector<1x1x64x64xf32> to vector<64x64xf32>
    %cst_80 = arith.constant dense<0.000000e+00> : vector<32x64xf32>
    %58 = tpu.matmul %48, %57, %cst_80 {dimension_numbers = #tpu.dot_dimension_numbers<[1], [0], [0], [1], [0, 0, 1, 1], [], []>} : vector<32x64xf32>, vector<64x64xf32>, vector<32x64xf32> -> vector<32x64xf32>
    %c2_81 = arith.constant 2 : index
    %c1_82 = arith.constant 1 : index
    %c0_83 = arith.constant 0 : index
    %c0_84 = arith.constant 0 : index
    %59 = vector.load %arg3[%c2_81, %c1_82, %c0_83, %c0_84] : memref<3x3x64x256xf32, #tpu.memory_space<vmem>>, vector<1x1x64x256xf32>
    %60 = vector.shape_cast %59 : vector<1x1x64x256xf32> to vector<64x256xf32>
    %cst_85 = arith.constant dense<0.000000e+00> : vector<32x256xf32>
    %61 = tpu.matmul %58, %60, %cst_85 {dimension_numbers = #tpu.dot_dimension_numbers<[1], [0], [0], [1], [0, 0, 1, 1], [], []>} : vector<32x64xf32>, vector<64x256xf32>, vector<32x256xf32> -> vector<32x256xf32>
    %62 = arith.addf %55, %61 : vector<32x256xf32>
    %c0_86 = arith.constant 0 : index
    %c2_87 = arith.constant 2 : index
    %c0_88 = arith.constant 0 : index
    %c0_89 = arith.constant 0 : index
    %63 = vector.load %arg1[%c0_86, %c2_87, %c0_88, %c0_89] : memref<1x3x64x64xf32, #tpu.memory_space<vmem>>, vector<1x1x64x64xf32>
    %64 = vector.shape_cast %63 : vector<1x1x64x64xf32> to vector<64x64xf32>
    %cst_90 = arith.constant dense<0.000000e+00> : vector<32x64xf32>
    %65 = tpu.matmul %48, %64, %cst_90 {dimension_numbers = #tpu.dot_dimension_numbers<[1], [0], [0], [1], [0, 0, 1, 1], [], []>} : vector<32x64xf32>, vector<64x64xf32>, vector<32x64xf32> -> vector<32x64xf32>
    %c2_91 = arith.constant 2 : index
    %c2_92 = arith.constant 2 : index
    %c0_93 = arith.constant 0 : index
    %c0_94 = arith.constant 0 : index
    %66 = vector.load %arg3[%c2_91, %c2_92, %c0_93, %c0_94] : memref<3x3x64x256xf32, #tpu.memory_space<vmem>>, vector<1x1x64x256xf32>
    %67 = vector.shape_cast %66 : vector<1x1x64x256xf32> to vector<64x256xf32>
    %cst_95 = arith.constant dense<0.000000e+00> : vector<32x256xf32>
    %68 = tpu.matmul %65, %67, %cst_95 {dimension_numbers = #tpu.dot_dimension_numbers<[1], [0], [0], [1], [0, 0, 1, 1], [], []>} : vector<32x64xf32>, vector<64x256xf32>, vector<32x256xf32> -> vector<32x256xf32>
    %69 = arith.addf %62, %68 : vector<32x256xf32>
    %c0_96 = arith.constant 0 : index
    %c0_97 = arith.constant 0 : index
    %70 = vector.load %arg4[%c0_96, %c0_97] : memref<1x256xf32, #tpu.memory_space<vmem>>, vector<1x256xf32>
    %71 = vector.broadcast %70 : vector<1x256xf32> to vector<32x256xf32>
    %72 = arith.addf %69, %71 : vector<32x256xf32>
    %cst_98 = arith.constant 0.000000e+00 : f32
    %73 = vector.broadcast %cst_98 : f32 to vector<32x256xf32>
    %74 = arith.maximumf %72, %73 : vector<32x256xf32>
    %cst_99 = arith.constant 0.000000e+00 : f32
    %75 = vector.broadcast %cst_99 : f32 to vector<16x256xf32>
    %c0_100 = arith.constant 0 : index
    %c0_101 = arith.constant 0 : index
    %c0_102 = arith.constant 0 : index
    %76 = vector.load %arg5[%c0_100, %c0_101, %c0_102] : memref<3x16x32xf32, #tpu.memory_space<vmem>>, vector<1x16x32xf32>
    %77 = vector.shape_cast %76 : vector<1x16x32xf32> to vector<16x32xf32>
    %cst_103 = arith.constant dense<0.000000e+00> : vector<16x256xf32>
    %78 = tpu.matmul %77, %74, %cst_103 {dimension_numbers = #tpu.dot_dimension_numbers<[1], [0], [0], [1], [0, 0, 1, 1], [], []>} : vector<16x32xf32>, vector<32x256xf32>, vector<16x256xf32> -> vector<16x256xf32>
    %c0_104 = arith.constant 0 : index
    %c0_105 = arith.constant 0 : index
    %c0_106 = arith.constant 0 : index
    %79 = vector.load %arg6[%c0_104, %c0_105, %c0_106] : memref<3x256x256xf32, #tpu.memory_space<vmem>>, vector<1x256x256xf32>
    %80 = vector.shape_cast %79 : vector<1x256x256xf32> to vector<256x256xf32>
    %cst_107 = arith.constant dense<0.000000e+00> : vector<16x256xf32>
    %81 = tpu.matmul %78, %80, %cst_107 {dimension_numbers = #tpu.dot_dimension_numbers<[1], [0], [0], [1], [0, 0, 1, 1], [], []>} : vector<16x256xf32>, vector<256x256xf32>, vector<16x256xf32> -> vector<16x256xf32>
    %82 = arith.addf %75, %81 : vector<16x256xf32>
    %c1_108 = arith.constant 1 : index
    %c0_109 = arith.constant 0 : index
    %c0_110 = arith.constant 0 : index
    %83 = vector.load %arg5[%c1_108, %c0_109, %c0_110] : memref<3x16x32xf32, #tpu.memory_space<vmem>>, vector<1x16x32xf32>
    %84 = vector.shape_cast %83 : vector<1x16x32xf32> to vector<16x32xf32>
    %cst_111 = arith.constant dense<0.000000e+00> : vector<16x256xf32>
    %85 = tpu.matmul %84, %74, %cst_111 {dimension_numbers = #tpu.dot_dimension_numbers<[1], [0], [0], [1], [0, 0, 1, 1], [], []>} : vector<16x32xf32>, vector<32x256xf32>, vector<16x256xf32> -> vector<16x256xf32>
    %c1_112 = arith.constant 1 : index
    %c0_113 = arith.constant 0 : index
    %c0_114 = arith.constant 0 : index
    %86 = vector.load %arg6[%c1_112, %c0_113, %c0_114] : memref<3x256x256xf32, #tpu.memory_space<vmem>>, vector<1x256x256xf32>
    %87 = vector.shape_cast %86 : vector<1x256x256xf32> to vector<256x256xf32>
    %cst_115 = arith.constant dense<0.000000e+00> : vector<16x256xf32>
    %88 = tpu.matmul %85, %87, %cst_115 {dimension_numbers = #tpu.dot_dimension_numbers<[1], [0], [0], [1], [0, 0, 1, 1], [], []>} : vector<16x256xf32>, vector<256x256xf32>, vector<16x256xf32> -> vector<16x256xf32>
    %89 = arith.addf %82, %88 : vector<16x256xf32>
    %c2_116 = arith.constant 2 : index
    %c0_117 = arith.constant 0 : index
    %c0_118 = arith.constant 0 : index
    %90 = vector.load %arg5[%c2_116, %c0_117, %c0_118] : memref<3x16x32xf32, #tpu.memory_space<vmem>>, vector<1x16x32xf32>
    %91 = vector.shape_cast %90 : vector<1x16x32xf32> to vector<16x32xf32>
    %cst_119 = arith.constant dense<0.000000e+00> : vector<16x256xf32>
    %92 = tpu.matmul %91, %74, %cst_119 {dimension_numbers = #tpu.dot_dimension_numbers<[1], [0], [0], [1], [0, 0, 1, 1], [], []>} : vector<16x32xf32>, vector<32x256xf32>, vector<16x256xf32> -> vector<16x256xf32>
    %c2_120 = arith.constant 2 : index
    %c0_121 = arith.constant 0 : index
    %c0_122 = arith.constant 0 : index
    %93 = vector.load %arg6[%c2_120, %c0_121, %c0_122] : memref<3x256x256xf32, #tpu.memory_space<vmem>>, vector<1x256x256xf32>
    %94 = vector.shape_cast %93 : vector<1x256x256xf32> to vector<256x256xf32>
    %cst_123 = arith.constant dense<0.000000e+00> : vector<16x256xf32>
    %95 = tpu.matmul %92, %94, %cst_123 {dimension_numbers = #tpu.dot_dimension_numbers<[1], [0], [0], [1], [0, 0, 1, 1], [], []>} : vector<16x256xf32>, vector<256x256xf32>, vector<16x256xf32> -> vector<16x256xf32>
    %96 = arith.addf %89, %95 : vector<16x256xf32>
    %c0_124 = arith.constant 0 : index
    %c0_125 = arith.constant 0 : index
    %97 = vector.load %arg7[%c0_124, %c0_125] : memref<1x256xf32, #tpu.memory_space<vmem>>, vector<1x256xf32>
    %98 = vector.broadcast %97 : vector<1x256xf32> to vector<16x256xf32>
    %99 = arith.addf %96, %98 : vector<16x256xf32>
    %cst_126 = arith.constant 0.000000e+00 : f32
    %100 = vector.broadcast %cst_126 : f32 to vector<16x256xf32>
    %101 = arith.maximumf %99, %100 : vector<16x256xf32>
    %cst_127 = arith.constant 0.000000e+00 : f32
    %102 = vector.broadcast %cst_127 : f32 to vector<8x256xf32>
    %c0_128 = arith.constant 0 : index
    %c0_129 = arith.constant 0 : index
    %c0_130 = arith.constant 0 : index
    %103 = vector.load %arg8[%c0_128, %c0_129, %c0_130] : memref<3x8x16xf32, #tpu.memory_space<vmem>>, vector<1x8x16xf32>
    %104 = vector.shape_cast %103 : vector<1x8x16xf32> to vector<8x16xf32>
    %cst_131 = arith.constant dense<0.000000e+00> : vector<8x256xf32>
    %105 = tpu.matmul %104, %101, %cst_131 {dimension_numbers = #tpu.dot_dimension_numbers<[1], [0], [0], [1], [0, 0, 1, 1], [], []>} : vector<8x16xf32>, vector<16x256xf32>, vector<8x256xf32> -> vector<8x256xf32>
    %c0_132 = arith.constant 0 : index
    %c0_133 = arith.constant 0 : index
    %c0_134 = arith.constant 0 : index
    %106 = vector.load %arg9[%c0_132, %c0_133, %c0_134] : memref<3x256x256xf32, #tpu.memory_space<vmem>>, vector<1x256x256xf32>
    %107 = vector.shape_cast %106 : vector<1x256x256xf32> to vector<256x256xf32>
    %cst_135 = arith.constant dense<0.000000e+00> : vector<8x256xf32>
    %108 = tpu.matmul %105, %107, %cst_135 {dimension_numbers = #tpu.dot_dimension_numbers<[1], [0], [0], [1], [0, 0, 1, 1], [], []>} : vector<8x256xf32>, vector<256x256xf32>, vector<8x256xf32> -> vector<8x256xf32>
    %109 = arith.addf %102, %108 : vector<8x256xf32>
    %c1_136 = arith.constant 1 : index
    %c0_137 = arith.constant 0 : index
    %c0_138 = arith.constant 0 : index
    %110 = vector.load %arg8[%c1_136, %c0_137, %c0_138] : memref<3x8x16xf32, #tpu.memory_space<vmem>>, vector<1x8x16xf32>
    %111 = vector.shape_cast %110 : vector<1x8x16xf32> to vector<8x16xf32>
    %cst_139 = arith.constant dense<0.000000e+00> : vector<8x256xf32>
    %112 = tpu.matmul %111, %101, %cst_139 {dimension_numbers = #tpu.dot_dimension_numbers<[1], [0], [0], [1], [0, 0, 1, 1], [], []>} : vector<8x16xf32>, vector<16x256xf32>, vector<8x256xf32> -> vector<8x256xf32>
    %c1_140 = arith.constant 1 : index
    %c0_141 = arith.constant 0 : index
    %c0_142 = arith.constant 0 : index
    %113 = vector.load %arg9[%c1_140, %c0_141, %c0_142] : memref<3x256x256xf32, #tpu.memory_space<vmem>>, vector<1x256x256xf32>
    %114 = vector.shape_cast %113 : vector<1x256x256xf32> to vector<256x256xf32>
    %cst_143 = arith.constant dense<0.000000e+00> : vector<8x256xf32>
    %115 = tpu.matmul %112, %114, %cst_143 {dimension_numbers = #tpu.dot_dimension_numbers<[1], [0], [0], [1], [0, 0, 1, 1], [], []>} : vector<8x256xf32>, vector<256x256xf32>, vector<8x256xf32> -> vector<8x256xf32>
    %116 = arith.addf %109, %115 : vector<8x256xf32>
    %c2_144 = arith.constant 2 : index
    %c0_145 = arith.constant 0 : index
    %c0_146 = arith.constant 0 : index
    %117 = vector.load %arg8[%c2_144, %c0_145, %c0_146] : memref<3x8x16xf32, #tpu.memory_space<vmem>>, vector<1x8x16xf32>
    %118 = vector.shape_cast %117 : vector<1x8x16xf32> to vector<8x16xf32>
    %cst_147 = arith.constant dense<0.000000e+00> : vector<8x256xf32>
    %119 = tpu.matmul %118, %101, %cst_147 {dimension_numbers = #tpu.dot_dimension_numbers<[1], [0], [0], [1], [0, 0, 1, 1], [], []>} : vector<8x16xf32>, vector<16x256xf32>, vector<8x256xf32> -> vector<8x256xf32>
    %c2_148 = arith.constant 2 : index
    %c0_149 = arith.constant 0 : index
    %c0_150 = arith.constant 0 : index
    %120 = vector.load %arg9[%c2_148, %c0_149, %c0_150] : memref<3x256x256xf32, #tpu.memory_space<vmem>>, vector<1x256x256xf32>
    %121 = vector.shape_cast %120 : vector<1x256x256xf32> to vector<256x256xf32>
    %cst_151 = arith.constant dense<0.000000e+00> : vector<8x256xf32>
    %122 = tpu.matmul %119, %121, %cst_151 {dimension_numbers = #tpu.dot_dimension_numbers<[1], [0], [0], [1], [0, 0, 1, 1], [], []>} : vector<8x256xf32>, vector<256x256xf32>, vector<8x256xf32> -> vector<8x256xf32>
    %123 = arith.addf %116, %122 : vector<8x256xf32>
    %c0_152 = arith.constant 0 : index
    %c0_153 = arith.constant 0 : index
    %124 = vector.load %arg10[%c0_152, %c0_153] : memref<1x256xf32, #tpu.memory_space<vmem>>, vector<1x256xf32>
    %125 = vector.broadcast %124 : vector<1x256xf32> to vector<8x256xf32>
    %126 = arith.addf %123, %125 : vector<8x256xf32>
    %cst_154 = arith.constant 0.000000e+00 : f32
    %127 = vector.broadcast %cst_154 : f32 to vector<8x256xf32>
    %128 = arith.maximumf %126, %127 : vector<8x256xf32>
    %c0_155 = arith.constant 0 : index
    %c0_156 = arith.constant 0 : index
    %129 = vector.load %arg12[%c0_155, %c0_156] : memref<1x64xf32, #tpu.memory_space<vmem>>, vector<1x64xf32>
    %130 = vector.extract_strided_slice %128 {offsets = [0, 0], sizes = [1, 256], strides = [1, 1]} : vector<8x256xf32> to vector<1x256xf32>
    %c0_157 = arith.constant 0 : index
    %c0_158 = arith.constant 0 : index
    %c0_159 = arith.constant 0 : index
    %131 = vector.load %arg11[%c0_157, %c0_158, %c0_159] : memref<8x256x64xf32, #tpu.memory_space<vmem>>, vector<1x256x64xf32>
    %132 = vector.shape_cast %131 : vector<1x256x64xf32> to vector<256x64xf32>
    %cst_160 = arith.constant dense<0.000000e+00> : vector<1x64xf32>
    %133 = tpu.matmul %130, %132, %cst_160 {dimension_numbers = #tpu.dot_dimension_numbers<[1], [0], [0], [1], [0, 0, 1, 1], [], []>} : vector<1x256xf32>, vector<256x64xf32>, vector<1x64xf32> -> vector<1x64xf32>
    %134 = arith.addf %129, %133 : vector<1x64xf32>
    %135 = vector.extract_strided_slice %128 {offsets = [1, 0], sizes = [1, 256], strides = [1, 1]} : vector<8x256xf32> to vector<1x256xf32>
    %c1_161 = arith.constant 1 : index
    %c0_162 = arith.constant 0 : index
    %c0_163 = arith.constant 0 : index
    %136 = vector.load %arg11[%c1_161, %c0_162, %c0_163] : memref<8x256x64xf32, #tpu.memory_space<vmem>>, vector<1x256x64xf32>
    %137 = vector.shape_cast %136 : vector<1x256x64xf32> to vector<256x64xf32>
    %cst_164 = arith.constant dense<0.000000e+00> : vector<1x64xf32>
    %138 = tpu.matmul %135, %137, %cst_164 {dimension_numbers = #tpu.dot_dimension_numbers<[1], [0], [0], [1], [0, 0, 1, 1], [], []>} : vector<1x256xf32>, vector<256x64xf32>, vector<1x64xf32> -> vector<1x64xf32>
    %139 = arith.addf %134, %138 : vector<1x64xf32>
    %140 = vector.extract_strided_slice %128 {offsets = [2, 0], sizes = [1, 256], strides = [1, 1]} : vector<8x256xf32> to vector<1x256xf32>
    %c2_165 = arith.constant 2 : index
    %c0_166 = arith.constant 0 : index
    %c0_167 = arith.constant 0 : index
    %141 = vector.load %arg11[%c2_165, %c0_166, %c0_167] : memref<8x256x64xf32, #tpu.memory_space<vmem>>, vector<1x256x64xf32>
    %142 = vector.shape_cast %141 : vector<1x256x64xf32> to vector<256x64xf32>
    %cst_168 = arith.constant dense<0.000000e+00> : vector<1x64xf32>
    %143 = tpu.matmul %140, %142, %cst_168 {dimension_numbers = #tpu.dot_dimension_numbers<[1], [0], [0], [1], [0, 0, 1, 1], [], []>} : vector<1x256xf32>, vector<256x64xf32>, vector<1x64xf32> -> vector<1x64xf32>
    %144 = arith.addf %139, %143 : vector<1x64xf32>
    %145 = vector.extract_strided_slice %128 {offsets = [3, 0], sizes = [1, 256], strides = [1, 1]} : vector<8x256xf32> to vector<1x256xf32>
    %c3 = arith.constant 3 : index
    %c0_169 = arith.constant 0 : index
    %c0_170 = arith.constant 0 : index
    %146 = vector.load %arg11[%c3, %c0_169, %c0_170] : memref<8x256x64xf32, #tpu.memory_space<vmem>>, vector<1x256x64xf32>
    %147 = vector.shape_cast %146 : vector<1x256x64xf32> to vector<256x64xf32>
    %cst_171 = arith.constant dense<0.000000e+00> : vector<1x64xf32>
    %148 = tpu.matmul %145, %147, %cst_171 {dimension_numbers = #tpu.dot_dimension_numbers<[1], [0], [0], [1], [0, 0, 1, 1], [], []>} : vector<1x256xf32>, vector<256x64xf32>, vector<1x64xf32> -> vector<1x64xf32>
    %149 = arith.addf %144, %148 : vector<1x64xf32>
    %150 = vector.extract_strided_slice %128 {offsets = [4, 0], sizes = [1, 256], strides = [1, 1]} : vector<8x256xf32> to vector<1x256xf32>
    %c4 = arith.constant 4 : index
    %c0_172 = arith.constant 0 : index
    %c0_173 = arith.constant 0 : index
    %151 = vector.load %arg11[%c4, %c0_172, %c0_173] : memref<8x256x64xf32, #tpu.memory_space<vmem>>, vector<1x256x64xf32>
    %152 = vector.shape_cast %151 : vector<1x256x64xf32> to vector<256x64xf32>
    %cst_174 = arith.constant dense<0.000000e+00> : vector<1x64xf32>
    %153 = tpu.matmul %150, %152, %cst_174 {dimension_numbers = #tpu.dot_dimension_numbers<[1], [0], [0], [1], [0, 0, 1, 1], [], []>} : vector<1x256xf32>, vector<256x64xf32>, vector<1x64xf32> -> vector<1x64xf32>
    %154 = arith.addf %149, %153 : vector<1x64xf32>
    %155 = vector.extract_strided_slice %128 {offsets = [5, 0], sizes = [1, 256], strides = [1, 1]} : vector<8x256xf32> to vector<1x256xf32>
    %c5 = arith.constant 5 : index
    %c0_175 = arith.constant 0 : index
    %c0_176 = arith.constant 0 : index
    %156 = vector.load %arg11[%c5, %c0_175, %c0_176] : memref<8x256x64xf32, #tpu.memory_space<vmem>>, vector<1x256x64xf32>
    %157 = vector.shape_cast %156 : vector<1x256x64xf32> to vector<256x64xf32>
    %cst_177 = arith.constant dense<0.000000e+00> : vector<1x64xf32>
    %158 = tpu.matmul %155, %157, %cst_177 {dimension_numbers = #tpu.dot_dimension_numbers<[1], [0], [0], [1], [0, 0, 1, 1], [], []>} : vector<1x256xf32>, vector<256x64xf32>, vector<1x64xf32> -> vector<1x64xf32>
    %159 = arith.addf %154, %158 : vector<1x64xf32>
    %160 = vector.extract_strided_slice %128 {offsets = [6, 0], sizes = [1, 256], strides = [1, 1]} : vector<8x256xf32> to vector<1x256xf32>
    %c6 = arith.constant 6 : index
    %c0_178 = arith.constant 0 : index
    %c0_179 = arith.constant 0 : index
    %161 = vector.load %arg11[%c6, %c0_178, %c0_179] : memref<8x256x64xf32, #tpu.memory_space<vmem>>, vector<1x256x64xf32>
    %162 = vector.shape_cast %161 : vector<1x256x64xf32> to vector<256x64xf32>
    %cst_180 = arith.constant dense<0.000000e+00> : vector<1x64xf32>
    %163 = tpu.matmul %160, %162, %cst_180 {dimension_numbers = #tpu.dot_dimension_numbers<[1], [0], [0], [1], [0, 0, 1, 1], [], []>} : vector<1x256xf32>, vector<256x64xf32>, vector<1x64xf32> -> vector<1x64xf32>
    %164 = arith.addf %159, %163 : vector<1x64xf32>
    %165 = vector.extract_strided_slice %128 {offsets = [7, 0], sizes = [1, 256], strides = [1, 1]} : vector<8x256xf32> to vector<1x256xf32>
    %c7 = arith.constant 7 : index
    %c0_181 = arith.constant 0 : index
    %c0_182 = arith.constant 0 : index
    %166 = vector.load %arg11[%c7, %c0_181, %c0_182] : memref<8x256x64xf32, #tpu.memory_space<vmem>>, vector<1x256x64xf32>
    %167 = vector.shape_cast %166 : vector<1x256x64xf32> to vector<256x64xf32>
    %cst_183 = arith.constant dense<0.000000e+00> : vector<1x64xf32>
    %168 = tpu.matmul %165, %167, %cst_183 {dimension_numbers = #tpu.dot_dimension_numbers<[1], [0], [0], [1], [0, 0, 1, 1], [], []>} : vector<1x256xf32>, vector<256x64xf32>, vector<1x64xf32> -> vector<1x64xf32>
    %169 = arith.addf %164, %168 : vector<1x64xf32>
    %cst_184 = arith.constant 0.000000e+00 : f32
    %170 = vector.broadcast %cst_184 : f32 to vector<1x64xf32>
    %171 = arith.maximumf %169, %170 : vector<1x64xf32>
    %c0_185 = arith.constant 0 : index
    %c0_186 = arith.constant 0 : index
    %172 = vector.load %arg13[%c0_185, %c0_186] : memref<64x32xf32, #tpu.memory_space<vmem>>, vector<64x32xf32>
    %cst_187 = arith.constant dense<0.000000e+00> : vector<1x32xf32>
    %173 = tpu.matmul %171, %172, %cst_187 {dimension_numbers = #tpu.dot_dimension_numbers<[1], [0], [0], [1], [0, 0, 1, 1], [], []>} : vector<1x64xf32>, vector<64x32xf32>, vector<1x32xf32> -> vector<1x32xf32>
    %c0_188 = arith.constant 0 : index
    %c0_189 = arith.constant 0 : index
    %174 = vector.load %arg14[%c0_188, %c0_189] : memref<1x32xf32, #tpu.memory_space<vmem>>, vector<1x32xf32>
    %175 = arith.addf %173, %174 : vector<1x32xf32>
    %c0_190 = arith.constant 0 : index
    %c0_191 = arith.constant 0 : index
    %c0_192 = arith.constant 0 : index
    %176 = vector.load %arg15[%c0_190, %c0_191, %c0_192] : memref<1x1x32xf32, #tpu.memory_space<vmem>>, vector<1x1x32xf32>
    %177 = vector.shape_cast %176 : vector<1x1x32xf32> to vector<1x32xf32>
    %178 = vector.shape_cast %175 : vector<1x32xf32> to vector<1x1x32xf32>
    tpu.vector_store %arg15[%c0_190, %c0_191, %c0_192], %178 {strides = array<i32>} : memref<1x1x32xf32, #tpu.memory_space<vmem>>, vector<1x1x32xf32>,
    return
  }
  func.func @transform_0(%arg0: i32) -> (i32, i32, i32, i32) {
    %c0_i32 = arith.constant 0 : i32
    %c0_i32_0 = arith.constant 0 : i32
    %c0_i32_1 = arith.constant 0 : i32
    %c0_i32_2 = arith.constant 0 : i32
    return %arg0, %c0_i32, %c0_i32_0, %c0_i32_1 : i32, i32, i32, i32
  }
  func.func @transform_1(%arg0: i32) -> (i32, i32, i32) {
    %c0_i32 = arith.constant 0 : i32
    %c0_i32_0 = arith.constant 0 : i32
    %c0_i32_1 = arith.constant 0 : i32
    %c0_i32_2 = arith.constant 0 : i32
    return %c0_i32, %c0_i32_0, %c0_i32_1 : i32, i32, i32
  }
  func.func @transform_2(%arg0: i32) -> (i32, i32, i32, i32) {
    %c0_i32 = arith.constant 0 : i32
    %c0_i32_0 = arith.constant 0 : i32
    %c0_i32_1 = arith.constant 0 : i32
    %c0_i32_2 = arith.constant 0 : i32
    %c0_i32_3 = arith.constant 0 : i32
    return %c0_i32, %c0_i32_0, %c0_i32_1, %c0_i32_2 : i32, i32, i32, i32
  }
  func.func @transform_3(%arg0: i32) -> (i32, i32) {
    %c0_i32 = arith.constant 0 : i32
    %c0_i32_0 = arith.constant 0 : i32
    %c0_i32_1 = arith.constant 0 : i32
    return %c0_i32, %c0_i32_0 : i32, i32
  }
  func.func @transform_4(%arg0: i32) -> (i32, i32, i32) {
    %c0_i32 = arith.constant 0 : i32
    %c0_i32_0 = arith.constant 0 : i32
    %c0_i32_1 = arith.constant 0 : i32
    %c0_i32_2 = arith.constant 0 : i32
    return %c0_i32, %c0_i32_0, %c0_i32_1 : i32, i32, i32
  }
  func.func @transform_5(%arg0: i32) -> (i32, i32, i32) {
    %c0_i32 = arith.constant 0 : i32
    %c0_i32_0 = arith.constant 0 : i32
    %c0_i32_1 = arith.constant 0 : i32
    %c0_i32_2 = arith.constant 0 : i32
    return %c0_i32, %c0_i32_0, %c0_i32_1 : i32, i32, i32
  }
  func.func @transform_6(%arg0: i32) -> (i32, i32) {
    %c0_i32 = arith.constant 0 : i32
    %c0_i32_0 = arith.constant 0 : i32
    %c0_i32_1 = arith.constant 0 : i32
    return %c0_i32, %c0_i32_0 : i32, i32
  }
  func.func @transform_7(%arg0: i32) -> (i32, i32, i32) {
    %c0_i32 = arith.constant 0 : i32
    %c0_i32_0 = arith.constant 0 : i32
    %c0_i32_1 = arith.constant 0 : i32
    %c0_i32_2 = arith.constant 0 : i32
    return %c0_i32, %c0_i32_0, %c0_i32_1 : i32, i32, i32
  }
  func.func @transform_8(%arg0: i32) -> (i32, i32, i32) {
    %c0_i32 = arith.constant 0 : i32
    %c0_i32_0 = arith.constant 0 : i32
    %c0_i32_1 = arith.constant 0 : i32
    %c0_i32_2 = arith.constant 0 : i32
    return %c0_i32, %c0_i32_0, %c0_i32_1 : i32, i32, i32
  }
  func.func @transform_9(%arg0: i32) -> (i32, i32) {
    %c0_i32 = arith.constant 0 : i32
    %c0_i32_0 = arith.constant 0 : i32
    %c0_i32_1 = arith.constant 0 : i32
    return %c0_i32, %c0_i32_0 : i32, i32
  }
  func.func @transform_10(%arg0: i32) -> (i32, i32, i32) {
    %c0_i32 = arith.constant 0 : i32
    %c0_i32_0 = arith.constant 0 : i32
    %c0_i32_1 = arith.constant 0 : i32
    %c0_i32_2 = arith.constant 0 : i32
    return %c0_i32, %c0_i32_0, %c0_i32_1 : i32, i32, i32
  }
  func.func @transform_11(%arg0: i32) -> (i32, i32) {
    %c0_i32 = arith.constant 0 : i32
    %c0_i32_0 = arith.constant 0 : i32
    %c0_i32_1 = arith.constant 0 : i32
    return %c0_i32, %c0_i32_0 : i32, i32
  }
  func.func @transform_12(%arg0: i32) -> (i32, i32) {
    %c0_i32 = arith.constant 0 : i32
    %c0_i32_0 = arith.constant 0 : i32
    %c0_i32_1 = arith.constant 0 : i32
    return %c0_i32, %c0_i32_0 : i32, i32
  }
  func.func @transform_13(%arg0: i32) -> (i32, i32) {
    %c0_i32 = arith.constant 0 : i32
    %c0_i32_0 = arith.constant 0 : i32
    %c0_i32_1 = arith.constant 0 : i32
    return %c0_i32, %c0_i32_0 : i32, i32
  }
  func.func @transform_14(%arg0: i32) -> (i32, i32, i32) {
    %c0_i32 = arith.constant 0 : i32
    %c0_i32_0 = arith.constant 0 : i32
    %c0_i32_1 = arith.constant 0 : i32
    return %arg0, %c0_i32, %c0_i32_0 : i32, i32, i32
  }
}

</mosaic_0001>

<bundles_post_ra>
// kernel: img_enc_forward.1
= control target key start
LH: loop header
LB: loop body
LE: loop exit
PB: predicated region body
PF: predicated region fallthrough
CT: control target
= control target key end

     0   :  { %s10560_s0 = inlined_call_operand.hbm [shape: f32[2,3,64,64], index: 0, kind: input, shape index: {}]   ;;  %s10561_s1 = inlined_call_operand.vmem [shape: f32[3,32,64], index: 1, kind: input, shape index: {}]   ;;  %s10562_s2 = inlined_call_operand.hbm [shape: f32[3,3,64,256], index: 2, kind: input, shape index: {}]   ;;  %s10563_s3 = inlined_call_operand.hbm [shape: f32[1,256], index: 3, kind: input, shape index: {}]   ;;  %s10564_s4 = inlined_call_operand.hbm [shape: f32[3,16,32], index: 4, kind: input, shape index: {}]   ;;  %s10565_s5 = inlined_call_operand.vmem [shape: f32[3,256,256], index: 5, kind: input, shape index: {}]   ;;  %s10566_s6 = inlined_call_operand.hbm [shape: f32[1,256], index: 6, kind: input, shape index: {}]   ;;  %s10567_s7 = inlined_call_operand.hbm [shape: f32[3,8,16], index: 7, kind: input, shape index: {}]   ;;  %s10568_s8 = inlined_call_operand.vmem [shape: f32[3,256,256], index: 8, kind: input, shape index: {}]   ;;  %s10569_s9 = inlined_call_operand.hbm [shape: f32[1,256], index: 9, kind: input, shape index: {}]   ;;  %s10570_s10 = inlined_call_operand.vmem [shape: f32[8,256,64], index: 10, kind: input, shape index: {}]   ;;  %s10571_s11 = inlined_call_operand.hbm [shape: f32[1,64], index: 11, kind: input, shape index: {}]   ;;  %s10572_s12 = inlined_call_operand.vmem [shape: f32[64,32], index: 12, kind: input, shape index: {}]   ;;  %s10573_s13 = inlined_call_operand.hbm [shape: f32[1,32], index: 13, kind: input, shape index: {}]   ;;  %s10574_s14 = inlined_call_operand.hbm [shape: f32[2,1,32], index: 14, kind: output, shape index: {}]  }
   0x1   :  { %10586 = sst [smem:[#allocation24_spill]] %s10560_s0 }
   0x2   :  { %10587 = sst [smem:[#allocation25_spill]] %s10561_s1 }
   0x3   :  { %10588 = sst [smem:[#allocation26_spill]] %s10562_s2 }
   0x4   :  { %10589 = sst [smem:[#allocation27_spill]] %s10563_s3 }
   0x5   :  { %10590 = sst [smem:[#allocation28_spill]] %s10564_s4 }
   0x6   :  { %10591 = sst [smem:[#allocation29_spill]] %s10565_s5 }
   0x7   :  { %10592 = sst [smem:[#allocation30_spill]] %s10568_s8 }
   0x8   :  { %10593 = sst [smem:[#allocation31_spill]] %s10570_s10 }
   0x9   :  { %10594 = sst [smem:[#allocation32_spill]] %s10572_s12 }
   0xa   :  { %10595 = sst [smem:[#allocation33_spill]] %s10574_s14 }
   0xb   :  { %19 = vsyncpa [#allocation3], 0 }
   0xc   :  { %21 = vsyncpa [#allocation3 + $0x1], 0 }
   0xd   :  { %22 = vsyncpa [#allocation6], 0 }
   0xe   :  { %23 = vsyncpa [#allocation9], 0 }
   0xf   :  { %24 = vsyncpa [#allocation12], 0 }
  0x10   :  { %25 = vsyncpa [#allocation15], 0 }
  0x11   :  { %26 = vsyncpa [#allocation4], 0 }
  0x12   :  { %28 = vsyncpa [#allocation4 + $0x1], 0  ;;  %s7883_s29 = smov 0   ;;  %s7885_s30 = smov 0  }
  0x13   :  { %s7887_s15 = smov 0   ;;  %s7889_s16 = smov 0  }
  0x14 LB: > { %s7791_s17 = smov [#allocation5]   ;;  %s7904_s19 = sadd.s32 4294967295, %s7789_s16   ;;  %s7789_s16 = sphi %s7889_s16, %s10631_s16   ;;  %s7785_s15 = sphi %s7887_s15, %s10630_s15   ;;  %s7781_s30 = sphi %s7885_s30, %s10629_s30   ;;  %s7777_s29 = sphi %s7883_s29, %s10628_s29  }
  0x15   : > { %s379_s18 = sshll.u32 %s7791_s17, 4  ;;  %p5041_p0 = scmp.ge.s32.totalorder %s7789_s16, 1  ;;  %s7909_s18 = int_to_ptr.vmem [resolvable:$true] %s379_s18 }
  0x16   : > { %p10581_p1 = scmp.eq.s32.totalorder %s7904_s19, 0  ;;  %p364_p2 = scmp.lt.s32.totalorder %s7789_s16, 3 }
  0x17   : > { %s7792_s21 = smov [#allocation8]   ;;  %s7793_s24 = smov [#allocation11]  }
  0x18   : > { %p7911_p3 = pnand %p5041_p0, %p364_p2  ;;  %s403_s22 = sshll.u32 %s7792_s21, 4  ;;  %s7924_s22 = int_to_ptr.vmem [resolvable:$true] %s403_s22 }
  0x19   : > { %s7926_s25 = sshll.u32 %s7793_s24, 4  ;;  %s10598_s2 = sld [smem:[#allocation26_spill]]  ;;  %s431_s25 = int_to_ptr.vmem [resolvable:$true] %s7926_s25 }
  0x1a   : > { %s10596_s20 = scalar_select %p7911_p3, 1, 0 }
  0x1b   : > { %p7355_p5 = pneg %p7911_p3 }
  0x1d   : > { %p7920_p6 = pnand %p7355_p5, %p10581_p1 }
  0x1f   : > { %s7453_s28 = scalar_lea.hbm %s10598_s2, 18432  ;;  %p7936_p8 = pneg %p7920_p6 }
  0x20   : > { %p7454_p7 = scmp.ne.s32.totalorder %s10598_s2, %s7453_s28  ;;  %p7460_p11 = scmp.lt.u32.totalorder %s7453_s28, %s10598_s2 }
  0x22   : > { %p7456_p9 = pnand %p7936_p8, %p7454_p7 }
  0x24   : > { %p7457_p10 = pneg %p7456_p9 }
  0x26   : > { %p7462_p12 = pnand %p7460_p11, %p7457_p10 }
  0x28   : > { %7465 = shalt.err (!%p7462_p12)
}
  0x29   : > { %s7466_s14 = scalar_lea.vmem %s7909_s18, 18432  ;;  %p7474_p5 = scmp.lt.s32.totalorder %s7909_s18, %s7909_s18 }
  0x2a   : > { %p7467_p13 = scmp.ne.s32.totalorder %s7909_s18, %s7466_s14  ;;  %p7475_p4 = scmp.lt.s32.totalorder %s7466_s14, %s7466_s14 }
  0x2c   : > { %p7469_p0 = pnand %p7467_p13, %p7936_p8  ;;  %p7476_p7 = por %p7475_p4, %p7474_p5 }
  0x2e   : > { %p7470_p2 = pneg %p7469_p0 }
  0x30   : > { %p7477_p9 = pnand %p7476_p7, %p7470_p2 }
  0x32   : > { %7480 = shalt.err (!%p7477_p9)
}
  0x33   : > { %s7794_s26 = smov 256   ;;  %s7795_s12 = smov 16  }
  0x34   : > { %7358 = dma.hbm_to_vmem [thread:$0]  (!%p7920_p6), %s10598_s2, 18432, %s7909_s18, [#allocation6], %s7794_s26, %s7794_s26, %s7795_s12  }
  0x35   : > { %s10600_s4 = sld [smem:[#allocation28_spill]] }
  0x3b   : > { %s7481_s10 = scalar_lea.hbm %s10600_s4, 768 }
  0x3c   : > { %p7482_p4 = scmp.ne.s32.totalorder %s10600_s4, %s7481_s10  ;;  %p7488_p12 = scmp.lt.u32.totalorder %s7481_s10, %s10600_s4 }
  0x3e   : > { %p7484_p10 = pnand %p7482_p4, %p7936_p8 }
  0x40   : > { %p7485_p11 = pneg %p7484_p10 }
  0x42   : > { %p7490_p13 = pnand %p7488_p12, %p7485_p11 }
  0x44   : > { %7493 = shalt.err (!%p7490_p13)
}
  0x45   : > { %s7494_s18 = scalar_lea.vmem %s7924_s22, 768  ;;  %p7502_p7 = scmp.lt.s32.totalorder %s7924_s22, %s7924_s22 }
  0x46   : > { %p7495_p0 = scmp.ne.s32.totalorder %s7924_s22, %s7494_s18  ;;  %p7503_p9 = scmp.lt.s32.totalorder %s7494_s18, %s7494_s18 }
  0x48   : > { %p7497_p2 = pnand %p7495_p0, %p7936_p8  ;;  %p7504_p4 = por %p7503_p9, %p7502_p7 }
  0x4a   : > { %p7498_p5 = pneg %p7497_p2 }
  0x4c   : > { %p7505_p10 = pnand %p7504_p4, %p7498_p5 }
  0x4e   : > { %7508 = shalt.err (!%p7505_p10)
}
  0x4f   : > { %s10583_s5 = smov 128   ;;  %s10584_s1 = smov 8  }
  0x50   : > { %7364 = dma.hbm_to_vmem [thread:$0]  (!%p7920_p6), %s10600_s4, 768, %s7924_s22, [#allocation9], %s10583_s5, %s10583_s5, %s10584_s1  }
  0x51   : > { %s7509_s27 = scalar_lea.hbm %s10567_s7, 384 }
  0x52   : > { %p7510_p11 = scmp.ne.s32.totalorder %s10567_s7, %s7509_s27  ;;  %p7516_p0 = scmp.lt.u32.totalorder %s7509_s27, %s10567_s7 }
  0x54   : > { %p7512_p12 = pnand %p7510_p11, %p7936_p8 }
  0x56   : > { %p7513_p13 = pneg %p7512_p12 }
  0x58   : > { %p7518_p2 = pnand %p7516_p0, %p7513_p13 }
  0x5a   : > { %7521 = shalt.err (!%p7518_p2)
}
  0x5b   : > { %s7522_s18 = scalar_lea.vmem %s431_s25, 384  ;;  %p7530_p4 = scmp.lt.s32.totalorder %s431_s25, %s431_s25 }
  0x5c   : > { %p7523_p5 = scmp.ne.s32.totalorder %s431_s25, %s7522_s18  ;;  %p7531_p10 = scmp.lt.s32.totalorder %s7522_s18, %s7522_s18 }
  0x5e   : > { %p7525_p7 = pnand %p7523_p5, %p7936_p8  ;;  %p7532_p1 = por %p7531_p10, %p7530_p4 }
  0x60   : > { %p7526_p9 = pneg %p7525_p7 }
  0x62   : > { %p7533_p3 = pnand %p7532_p1, %p7526_p9 }
  0x64   : > { %7536 = shalt.err (!%p7533_p3)
}
  0x65   : > { %7370 = dma.hbm_to_vmem [thread:$0]  (!%p7920_p6), %s10567_s7, 384, %s431_s25, [#allocation12], %s10583_s5, %s10583_s5, %s10584_s1  }
  0x66   : > { %s7798_s10 = smov [#allocation14]   ;;  %s7799_s12 = smov [#allocation7]  }
  0x67   : > { %s461_s26 = sshll.u32 %s7798_s10, 4  ;;  %s393_s27 = sshll.u32 %s7799_s12, 4  ;;  %s462_s26 = int_to_ptr.vmem [resolvable:$true] %s461_s26  ;;  %s394_s27 = int_to_ptr.vmem [resolvable:$true] %s393_s27 }
  0x68   : > { %s7537_s24 = scalar_lea.hbm %s10571_s11, 16 }
  0x69   : > { %p7538_p1 = scmp.ne.s32.totalorder %s10571_s11, %s7537_s24  ;;  %p7544_p12 = scmp.lt.u32.totalorder %s7537_s24, %s10571_s11 }
  0x6b   : > { %p7540_p3 = pnand %p7538_p1, %p7936_p8 }
  0x6d   : > { %p7541_p11 = pneg %p7540_p3 }
  0x6f   : > { %p7546_p13 = pnand %p7544_p12, %p7541_p11 }
  0x71   : > { %7549 = shalt.err (!%p7546_p13)
}
  0x72   : > { %s7550_s25 = scalar_lea.vmem %s462_s26, 16  ;;  %s7557_s8 = scalar_lea.vmem %s462_s26, 32 }
  0x73   : > { %p7551_p0 = scmp.ne.s32.totalorder %s462_s26, %s7550_s25  ;;  %p7558_p7 = scmp.lt.s32.totalorder %s462_s26, %s462_s26 }
  0x74   : > { %p7559_p9 = scmp.lt.s32.totalorder %s7557_s8, %s7550_s25 }
  0x75   : > { %p7553_p2 = pnand %p7551_p0, %p7936_p8 }
  0x76   : > { %p7560_p4 = por %p7559_p9, %p7558_p7 }
  0x77   : > { %p7554_p5 = pneg %p7553_p2 }
  0x79   : > { %p7561_p10 = pnand %p7560_p4, %p7554_p5 }
  0x7b   : > { %7564 = shalt.err (!%p7561_p10)
}
  0x7c   : > { %7376 = dma.hbm_to_vmem [thread:$0]  (!%p7920_p6), %s10571_s11, 16, %s462_s26, [#allocation15]  }
  0x7d   : > { %s10601_s3 = sld [smem:[#allocation27_spill]] }
  0x83   : > { %s7565_s17 = scalar_lea.hbm %s10601_s3, 32 }
  0x84   : > { %p7566_p1 = scmp.ne.s32.totalorder %s10601_s3, %s7565_s17  ;;  %p7572_p12 = scmp.lt.u32.totalorder %s7565_s17, %s10601_s3 }
  0x86   : > { %p7568_p3 = pnand %p7566_p1, %p7936_p8 }
  0x88   : > { %p7569_p11 = pneg %p7568_p3 }
  0x8a   : > { %p7574_p13 = pnand %p7572_p12, %p7569_p11 }
  0x8c   : > { %7577 = shalt.err (!%p7574_p13)
}
  0x8d   : > { %s7578_s25 = scalar_lea.vmem %s394_s27, 32  ;;  %p7586_p7 = scmp.lt.s32.totalorder %s394_s27, %s394_s27 }
  0x8e   : > { %p7579_p0 = scmp.ne.s32.totalorder %s394_s27, %s7578_s25  ;;  %p7587_p9 = scmp.lt.s32.totalorder %s7578_s25, %s7578_s25 }
  0x90   : > { %p7581_p2 = pnand %p7579_p0, %p7936_p8  ;;  %p7588_p4 = por %p7587_p9, %p7586_p7 }
  0x92   : > { %p7582_p5 = pneg %p7581_p2 }
  0x94   : > { %p7589_p10 = pnand %p7588_p4, %p7582_p5 }
  0x96   : > { %7592 = shalt.err (!%p7589_p10)
}
  0x97   : > { %7361 = dma.hbm_to_vmem [thread:$0]  (!%p7920_p6), %s10601_s3, 32, %s394_s27, [#allocation6]  }
  0x98   : > { %s7800_s10 = smov [#allocation10]   ;;  %s7801_s2 = smov [#allocation13]  }
  0x99   : > { %s420_s12 = sshll.u32 %s7800_s10, 4  ;;  %s447_s28 = sshll.u32 %s7801_s2, 4  ;;  %s421_s12 = int_to_ptr.vmem [resolvable:$true] %s420_s12  ;;  %s448_s28 = int_to_ptr.vmem [resolvable:$true] %s447_s28 }
  0x9a   : > { %s7593_s14 = scalar_lea.hbm %s10566_s6, 32 }
  0x9b   : > { %p7594_p1 = scmp.ne.s32.totalorder %s10566_s6, %s7593_s14  ;;  %p7600_p12 = scmp.lt.u32.totalorder %s7593_s14, %s10566_s6 }
  0x9d   : > { %p7596_p3 = pnand %p7594_p1, %p7936_p8 }
  0x9f   : > { %p7597_p11 = pneg %p7596_p3 }
  0xa1   : > { %p7602_p13 = pnand %p7600_p12, %p7597_p11 }
  0xa3   : > { %7605 = shalt.err (!%p7602_p13)
}
  0xa4   : > { %s7606_s27 = scalar_lea.vmem %s421_s12, 32  ;;  %p7614_p7 = scmp.lt.s32.totalorder %s421_s12, %s421_s12 }
  0xa5   : > { %p7607_p0 = scmp.ne.s32.totalorder %s421_s12, %s7606_s27  ;;  %p7615_p9 = scmp.lt.s32.totalorder %s7606_s27, %s7606_s27 }
  0xa7   : > { %p7609_p2 = pnand %p7607_p0, %p7936_p8  ;;  %p7616_p4 = por %p7615_p9, %p7614_p7 }
  0xa9   : > { %p7610_p5 = pneg %p7609_p2 }
  0xab   : > { %p7617_p10 = pnand %p7616_p4, %p7610_p5 }
  0xad   : > { %7620 = shalt.err (!%p7617_p10)
}
  0xae   : > { %7367 = dma.hbm_to_vmem [thread:$0]  (!%p7920_p6), %s10566_s6, 32, %s421_s12, [#allocation9]  }
  0xaf   : > { %s7621_s24 = scalar_lea.hbm %s10569_s9, 32 }
  0xb0   : > { %p7622_p1 = scmp.ne.s32.totalorder %s10569_s9, %s7621_s24  ;;  %p7628_p12 = scmp.lt.u32.totalorder %s7621_s24, %s10569_s9 }
  0xb2   : > { %p7624_p3 = pnand %p7622_p1, %p7936_p8 }
  0xb4   : > { %p7625_p11 = pneg %p7624_p3 }
  0xb6   : > { %p7630_p13 = pnand %p7628_p12, %p7625_p11 }
  0xb8   : > { %7633 = shalt.err (!%p7630_p13)
}
  0xb9   : > { %s7634_s26 = scalar_lea.vmem %s448_s28, 32  ;;  %p7642_p7 = scmp.lt.s32.totalorder %s448_s28, %s448_s28 }
  0xba   : > { %p7635_p0 = scmp.ne.s32.totalorder %s448_s28, %s7634_s26  ;;  %p7643_p9 = scmp.lt.s32.totalorder %s7634_s26, %s7634_s26 }
  0xbc   : > { %p7637_p2 = pnand %p7635_p0, %p7936_p8  ;;  %p7644_p4 = por %p7643_p9, %p7642_p7 }
  0xbe   : > { %p7638_p5 = pneg %p7637_p2 }
  0xc0   : > { %p7645_p10 = pnand %p7644_p4, %p7638_p5 }
  0xc2   : > { %7648 = shalt.err (!%p7645_p10)
}
  0xc3   : > { %7373 = dma.hbm_to_vmem [thread:$0]  (!%p7920_p6), %s10569_s9, 32, %s448_s28, [#allocation12]  }
  0xc4   : > { %s7802_s8 = smov [#allocation16]   ;;  %s7649_s24 = scalar_lea.hbm %s10573_s13, 16 }
  0xc5   : > { %s475_s10 = sshll.u32 %s7802_s8, 4  ;;  %p7650_p1 = scmp.ne.s32.totalorder %s10573_s13, %s7649_s24  ;;  %s476_s10 = int_to_ptr.vmem [resolvable:$true] %s475_s10 }
  0xc6   : > { %p7656_p12 = scmp.lt.u32.totalorder %s7649_s24, %s10573_s13 }
  0xc7   : > { %p7652_p3 = pnand %p7650_p1, %p7936_p8 }
  0xc9   : > { %p7653_p11 = pneg %p7652_p3 }
  0xcb   : > { %p7658_p13 = pnand %p7656_p12, %p7653_p11 }
  0xcd   : > { %7661 = shalt.err (!%p7658_p13)
}
  0xce   : > { %s7662_s28 = scalar_lea.vmem %s476_s10, 16  ;;  %s7669_s26 = scalar_lea.vmem %s476_s10, 32 }
  0xcf   : > { %p7663_p0 = scmp.ne.s32.totalorder %s476_s10, %s7662_s28  ;;  %p7670_p7 = scmp.lt.s32.totalorder %s476_s10, %s476_s10 }
  0xd0   : > { %p7671_p9 = scmp.lt.s32.totalorder %s7669_s26, %s7662_s28 }
  0xd1   : > { %p7665_p2 = pnand %p7663_p0, %p7936_p8 }
  0xd2   : > { %p7672_p4 = por %p7671_p9, %p7670_p7 }
  0xd3   : > { %p7666_p5 = pneg %p7665_p2 }
  0xd5   : > { %p7673_p10 = pnand %p7672_p4, %p7666_p5 }
  0xd7   : > { %7676 = shalt.err (!%p7673_p10)
}
  0xd8   : > { %7379 = dma.hbm_to_vmem [thread:$0]  (!%p7920_p6), %s10573_s13, 16, %s476_s10, [#allocation15]  }
  0xd9   : > { %s5040_s21 = sadd.s32 4294967294, %s7789_s16   ;;  %s8097_s23 = sadd.s32 1, %s7789_s16  }
  0xda   : > { %s38_s8 = ssub.s32 %s7789_s16, %s8097_s23  ;;  %s41_s2 = sadd.s32 1, %s7785_s15 }
  0xdb   : > { %p39_p8 = scmp.eq.s32.totalorder %s38_s8, 0  ;;  %p48_p1 = scmp.ne.s32.totalorder %s7785_s15, %s7781_s30 }
  0xdc   : > { %p49_p3 = scmp.eq.s32.totalorder %s7789_s16, 0  ;;  %p54_p11 = scmp.ne.s32.totalorder %s7781_s30, %s7777_s29 }
  0xdd   : > { %s8108_s17 = scalar_select %p39_p8, %s7785_s15, %s41_s2  }
  0xde   : > { %p50_p12 = por %p49_p3, %p48_p1  ;;  %p10602_p13 = scmp.eq.s32.totalorder %s7904_s19, 0 }
  0xdf   : > { %p351_p6 = scmp.eq.s32.totalorder %s7904_s19, 1  ;;  %p357_p2 = scmp.eq.s32.totalorder %s5040_s21, 1 }
  0xe0   : > { %p8112_p0 = por %p10602_p13, %p54_p11  ;;  %p7396_p5 = scmp.lt.s32.totalorder %s7789_s16, 2 }
  0xe1   : > { %s486_s10 = sand.u32 1, %s7785_s15   ;;  %p8119_p7 = por %p351_p6, %p48_p1 }
  0xe2   : > { %p8123_p9 = por %p357_p2, %p54_p11  ;;  %s7316_s22 = smul.u32 192, %s486_s10 }
  0xe3   : > { %s10604_s14 = scalar_select %p8119_p7, 1, 0 }
  0xe4   : > { %s10605_s18 = scalar_select %p8123_p9, 1, 0 }
  0xe5   : > { %s7317_s25 = smul.u32 3072, %s7789_s16  ;;  %p8128_p4 = pnand %p7396_p5, %p50_p12 }
  0xe6   : > { %s10607_s0 = sld [smem:[#allocation24_spill]]  ;;  %s490_s21 = scalar_lea.vmem [#allocation2], %s7316_s22 }
  0xe7   : > { %s497_s8 = sshll.u32 %s490_s21, 4  ;;  %s8139_s2 = scalar_lea.sflag [#allocation3], %s486_s10  ;;  %s8137_s8 = int_to_ptr.vmem [resolvable:$true] %s497_s8 }
  0xe8   : > { %p7679_p8 = pneg %p8128_p4 }
  0xec   : > { %s8135_s27 = scalar_lea.hbm %s10607_s0, %s7317_s25  ;;  %s7682_s12 = scalar_lea.hbm %s10607_s0, 6144 }
  0xed   : > { %s7677_s5 = scalar_lea.hbm %s8135_s27, 3072  ;;  %p7683_p11 = scmp.lt.u32.totalorder %s8135_s27, %s10607_s0 }
  0xee   : > { %p7678_p10 = scmp.ne.s32.totalorder %s8135_s27, %s7677_s5  ;;  %p7684_p12 = scmp.lt.u32.totalorder %s7682_s12, %s7677_s5 }
  0xef   : > { %p7686_p6 = scmp.lt.u32.totalorder %s7677_s5, %s8135_s27 }
  0xf0   : > { %p7680_p1 = pnand %p7679_p8, %p7678_p10  ;;  %p7685_p13 = por %p7684_p12, %p7683_p11 }
  0xf2   : > { %p7681_p3 = pneg %p7680_p1  ;;  %p7687_p2 = por %p7686_p6, %p7685_p13 }
  0xf4   : > { %p7688_p5 = pnand %p7687_p2, %p7681_p3 }
  0xf6   : > { %7691 = shalt.err (!%p7688_p5)
}
  0xf7   : > { %s7692_s10 = scalar_lea.vmem %s8137_s8, 3072  ;;  %s7803_s22 = smov [#allocation2]  }
  0xf8   : > { %p7693_p10 = scmp.ne.s32.totalorder %s8137_s8, %s7692_s10  ;;  %s7697_s21 = sshll.u32 %s7803_s22, 4  ;;  %s7698_s21 = int_to_ptr.vmem [resolvable:$false] %s7697_s21 }
  0xf9   : > { %s7699_s3 = scalar_lea.vmem %s7698_s21, 6144  ;;  %p7700_p7 = scmp.lt.s32.totalorder %s8137_s8, %s7698_s21 }
  0xfa   : > { %p7695_p1 = pnand %p7693_p10, %p7679_p8  ;;  %p7701_p11 = scmp.lt.s32.totalorder %s7699_s3, %s7692_s10 }
  0xfc   : > { %p7696_p9 = pneg %p7695_p1  ;;  %p7702_p12 = por %p7701_p11, %p7700_p7 }
  0xfe   : > { %p7703_p13 = pnand %p7702_p12, %p7696_p9 }
 0x100   : > { %7706 = shalt.err (!%p7703_p13)
}
 0x101   : > { %s10608_s5 = smov 8   ;;  %s10609_s1 = smov 128  }
 0x102   : > { %7383 = dma.hbm_to_vmem [thread:$0]  (!%p8128_p4), %s8135_s27, 3072, %s8137_s8, %s8139_s2, %s10609_s1, %s10609_s1, %s10608_s5  }
 0x103   : > { %p10610_p8 = scmp.ne.s32.totalorder %s10596_s20, 0 }
 0x104   : > { %s8173_s25 = sand.u32 (!%p10610_p8), 1, %s7781_s30  }
 0x105   : > { %509 = sbr.rel (%p10610_p8) target bundleno = 2747 (0xabb), region = 76  ;;  %s512_s12 = scalar_lea.sflag (!%p10610_p8), [#allocation3], %s8173_s25 }
 0x106   : > { %s7318_s26 = smul.u32 (!%p10610_p8), 192, %s8173_s25 }
 0x108   : > { %s8177_s10 = scalar_lea.vmem (!%p10610_p8), [#allocation2], %s7318_s26 }
 0x10c   : > { %7752 = dma.done.wait (%p8112_p0), %s512_s12, 3072  }
 0x10d   : > { %7754 = vsyncadd (%p8112_p0), %s512_s12, 4294964224  ;;  %p10611_p7 = scmp.eq.s32.totalorder %s7904_s19, 0 }
 0x10f   : > { %7756 = dma.done.wait (%p10611_p7), [#allocation6], 18464   ;;  %p10612_p9 = pmov %p10611_p7 }
 0x110   : > { %p10613_p4 = pmov %p10611_p7 }
 0x111   : > { %7758 = vsyncadd (%p10612_p9), [#allocation6], 4294948832 }
 0x112   : > { %7760 = dma.done.wait (%p10613_p4), [#allocation9], 800   ;;  %p10614_p3 = pmov %p10613_p4 }
 0x114   : > { %7762 = vsyncadd (%p10614_p3), [#allocation9], 4294966496  ;;  %p10615_p6 = pmov %p10614_p3 }
 0x115   : > { %p10616_p2 = pmov %p10614_p3 }
 0x116   : > { %7764 = dma.done.wait (%p10615_p6), [#allocation12], 416  }
 0x117   : > { %7766 = vsyncadd (%p10616_p2), [#allocation12], 4294966880  ;;  %p10617_p0 = pmov %p10616_p2 }
 0x119   : > { %7768 = dma.done.wait (%p10617_p0), [#allocation15], 32   ;;  %p10618_p5 = pmov %p10617_p0 }
 0x11a   : > { %v5065_v0 = vld [vmem:[%s8177_s10 + $0x40] sm:$0xff]  ;;  %v5066_v1 = vld [vmem:[%s8177_s10 + $0x48] sm:$0xff]  ;;  %v5067_v2 = vld [vmem:[%s8177_s10 + $0x50] sm:$0xff]  ;;  %vm603_vm0 = vcmask 523264   ;;  %s10619_s28 = sld [smem:[#allocation25_spill]]  ;;  %vm2580_vm1 = vcmask 261120  }
 0x11b   : > { %7770 = vsyncadd (%p10618_p5), [#allocation15], 4294967264  ;;  %v8202_v3 = vpack.c.bf16 %v5066_v1, %v5065_v0  ;;  %v5068_v4 = vld [vmem:[%s8177_s10 + $0x58] sm:$0xff]  ;;  %v5069_v6 = vld [vmem:[%s8177_s10 + $0x60] sm:$0xff]  ;;  %s10620_s20 = sld [smem:[#allocation29_spill]]  ;;  %s10621_s24 = sld [smem:[#allocation30_spill]] }
 0x11c   : > { %v8205_v5 = vpack.c.bf16 %v5068_v4, %v5067_v2  ;;  %v5070_v7 = vld [vmem:[%s8177_s10 + $0x68] sm:$0xff]  ;;  %v595_v8 = vld [vmem:[%s8177_s10] sm:$0xff]  ;;  %v597_v12 = vld [vmem:[%s8177_s10 + $0x10] sm:$0xff]  ;;  %vm3286_vm2 = vcmask 130048   ;;  %s10623_s0 = sld [smem:[#allocation32_spill]]  ;;  %vm7806_vm3 = vmmov 0  }
 0x11d   : > { %6281 = vmatprep.subr.bf16.mxu1 %v8202_v3  ;;  %v596_v9 = vld [vmem:[%s8177_s10 + $0x8] sm:$0xff]  ;;  %v598_v13 = vld [vmem:[%s8177_s10 + $0x18] sm:$0xff]  ;;  %v8225_v14 = vpack.c.bf16 %v5070_v7, %v5069_v6  ;;  %v599_v16 = vld [vmem:[%s8177_s10 + $0x20] sm:$0xff]  ;;  %s5647_s4 = sshll.u32 %s7904_s19, 4  ;;  %s590_s27 = scalar_lea.vmem [#allocation17], %s8173_s25  ;;  %vm4883_vm4 = vcmask 253952  }
 0x11e   : > { %6283 = vmatpush3.bf16.msra.mxu1 %v8202_v3  ;;  %v8218_v11 = vpack.c.bf16 %v596_v9, %v595_v8  ;;  %v8227_v15 = vpack.c.bf16 %v598_v13, %v597_v12  ;;  %v600_v17 = vld [vmem:[%s8177_s10 + $0x28] sm:$0xff]  ;;  %v5071_v18 = vld [vmem:[%s8177_s10 + $0x70] sm:$0xff]  ;;  %v5072_v19 = vld [vmem:[%s8177_s10 + $0x78] sm:$0xff]  ;;  %v7804_v13 = vmov 0.0   ;;  %s4898_s8 = sshll.u32 %s590_s27, 4  ;;  %s10624_s21 = sld [smem:[#allocation33_spill]]  ;;  %s10518_s8 = int_to_ptr.vmem [resolvable:$true] %s4898_s8 }
 0x11f   : > { %6285 = vmatprep.subr.bf16.mxu1 %v8205_v5  ;;  %v8239_v20 = vpack.c.bf16 %v600_v17, %v599_v16  ;;  %v8242_v21 = vpack.c.bf16 %v5072_v19, %v5071_v18  ;;  %v601_v22 = vld [vmem:[%s8177_s10 + $0x30] sm:$0xff]  ;;  %v602_v23 = vld [vmem:[%s8177_s10 + $0x38] sm:$0xff]  ;;  %v5085_v24 = vld [vmem:[%s8177_s10 + $0x80] sm:$0xff]  ;;  %s4886_s5 = scalar_lea.sflag [#allocation4], %s8173_s25  ;;  %s7707_s1 = scalar_lea.vmem %s10518_s8, 16 }
 0x120   : > { %v8215_v10 = vld [vmem:[%s10619_s28] sm:$0xff]  ;;  %6265 = vmatprep.subr.bf16.mxu0 %v8218_v11  ;;  %v5086_v25 = vld [vmem:[%s8177_s10 + $0x88] sm:$0xff]  ;;  %v8251_v26 = vpack.c.bf16 %v602_v23, %v601_v22  ;;  %v5087_v28 = vld [vmem:[%s8177_s10 + $0x90] sm:$0xff]  ;;  %p7708_p10 = scmp.ne.s32.totalorder %s10518_s8, %s7707_s1  ;;  %p10625_p1 = scmp.ne.s32.totalorder %s10604_s14, 0 }
 0x121   : > { %6085 = vmatprep.mubr.msk.f32.mxu1 %vm603_vm0, %v8215_v10  ;;  %6063 = vmatprep.mubr.msk.f32.mxu0 %vm603_vm0, %v8215_v10  ;;  %v8254_v27 = vpack.c.bf16 %v5086_v25, %v5085_v24  ;;  %v5088_v29 = vld [vmem:[%s8177_s10 + $0x98] sm:$0xff]  ;;  %v813_v30 = vld [vmem:[#allocation5 + $0x88] sm:$0xff]  ;;  %v593_v33 = vld [vmem:[%s10619_s28 + $0x10] sm:$0xff]  ;;  %s7807_s19 = smov [#allocation17]  }
 0x122   : > { %6267 = vmatpush3.bf16.msra.mxu0 %v8218_v11  ;;  %6287 = vmatpush3.bf16.msra.mxu1 %v8205_v5  ;;  %v815_v31 = vld [vmem:[#allocation5 + $0x98] sm:$0xff]  ;;  %v592_v32 = vld [vmem:[%s10619_s28 + $0x8] sm:$0xff]  ;;  %v8268_v34 = vpack.c.bf16 %v5088_v29, %v5087_v28  ;;  %v5089_v35 = vld [vmem:[%s8177_s10 + $0xa0] sm:$0xff]  ;;  %p7709_p11 = pnand %p7708_p10, %p10625_p1  ;;  %s7711_s26 = sshll.u32 %s7807_s19, 4  ;;  %s7712_s26 = int_to_ptr.vmem [resolvable:$false] %s7711_s26 }
 0x123   : > { %6269 = vmatprep.subr.bf16.mxu0 %v8227_v15  ;;  %6289 = vmatprep.subr.bf16.mxu1 %v8225_v14  ;;  %v6296_v36 = vpack.c.bf16 %v815_v31, %v813_v30  ;;  %v5090_v37 = vld [vmem:[%s8177_s10 + $0xa8] sm:$0xff]  ;;  %v812_v38 = vld [vmem:[#allocation5 + $0x80] sm:$0xff]  ;;  %v814_v39 = vld [vmem:[#allocation5 + $0x90] sm:$0xff]  ;;  %s7713_s12 = scalar_lea.vmem %s7712_s26, 32  ;;  %p7714_p13 = scmp.lt.s32.totalorder %s10518_s8, %s7712_s26 }
 0x124   : > { %v817_v40 = vld [vmem:[#allocation5 + $0xa8] sm:$0xff]  ;;  %v819_v41 = vld [vmem:[#allocation5 + $0xb8] sm:$0xff]  ;;  %v8280_v43 = vpack.c.bf16 %v5090_v37, %v5089_v35  ;;  %v5091_v44 = vld [vmem:[%s8177_s10 + $0xb0] sm:$0xff]  ;;  %v6298_v45 = vpack.c.bf16 %v814_v39, %v812_v38  ;;  %s10516_s3 = scalar_lea.hbm %s10624_s21, %s5647_s4  ;;  %p7710_p12 = pneg %p7709_p11 }
 0x125   : > { %v594_v42 = vld [vmem:[%s10619_s28 + $0x18] sm:$0xff]  ;;  %v6300_v47 = vpack.c.bf16 %v819_v41, %v817_v40  ;;  %v816_v48 = vld [vmem:[#allocation5 + $0xa0] sm:$0xff]  ;;  %v818_v49 = vld [vmem:[#allocation5 + $0xb0] sm:$0xff]  ;;  %p7715_p8 = scmp.lt.s32.totalorder %s7713_s12, %s7707_s1 }
 0x126   : > { %6271 = vmatpush3.bf16.msra.mxu0 %v8227_v15  ;;  %6291 = vmatpush3.bf16.msra.mxu1 %v8225_v14  ;;  %v5092_v46 = vld [vmem:[%s8177_s10 + $0xb8] sm:$0xff]  ;;  %v821_v50 = vld [vmem:[#allocation5 + $0xc8] sm:$0xff]  ;;  %v6302_v53 = vpack.c.bf16 %v818_v49, %v816_v48  ;;  %v820_v55 = vld [vmem:[#allocation5 + $0xc0] sm:$0xff]  ;;  %s10622_s10 = sld [smem:[#allocation31_spill]] }
 0x127   : > { %6273 = vmatprep.subr.bf16.mxu0 %v8239_v20  ;;  %6293 = vmatprep.subr.bf16.mxu1 %v8242_v21  ;;  %v823_v51 = vld [vmem:[#allocation5 + $0xd8] sm:$0xff]  ;;  %v8291_v52 = vpack.c.bf16 %v5092_v46, %v5091_v44  ;;  %v822_v56 = vld [vmem:[#allocation5 + $0xd0] sm:$0xff]  ;;  %v825_v57 = vld [vmem:[#allocation5 + $0xe8] sm:$0xff]  ;;  %p7716_p7 = por %p7715_p8, %p7714_p13 }
 0x128   : > { %v6304_v54 = vpack.c.bf16 %v823_v51, %v821_v50  ;;  %v827_v58 = vld [vmem:[#allocation5 + $0xf8] sm:$0xff]  ;;  %v6306_v59 = vpack.c.bf16 %v822_v56, %v820_v55  ;;  %v824_v61 = vld [vmem:[#allocation5 + $0xe0] sm:$0xff]  ;;  %v826_v62 = vld [vmem:[#allocation5 + $0xf0] sm:$0xff] }
 0x129   : > { %v6308_v60 = vpack.c.bf16 %v827_v58, %v825_v57  ;;  %v6310_v63 = vpack.c.bf16 %v826_v62, %v824_v61  ;;  %v5101_v0 = vld [vmem:[%s10619_s28 + $0x20] sm:$0xff]  ;;  %v5102_v1 = vld [vmem:[%s10619_s28 + $0x28] sm:$0xff]  ;;  %v5103_v2 = vld [vmem:[%s10619_s28 + $0x30] sm:$0xff]  ;;  %p7717_p9 = pnand %p7716_p7, %p7710_p12 }
 0x12a   : > { %6275 = vmatpush3.bf16.msra.mxu0 %v8239_v20  ;;  %6295 = vmatpush3.bf16.msra.mxu1 %v8242_v21  ;;  %v5104_v4 = vld [vmem:[%s10619_s28 + $0x38] sm:$0xff]  ;;  %v5129_v6 = vld [vmem:[%s10619_s28 + $0x40] sm:$0xff]  ;;  %v5130_v7 = vld [vmem:[%s10619_s28 + $0x48] sm:$0xff] }
 0x12b   : > { %6277 = vmatprep.subr.bf16.mxu0 %v8251_v26  ;;  %6329 = vmatprep.subr.bf16.mxu1 %v8254_v27  ;;  %v5131_v8 = vld [vmem:[%s10619_s28 + $0x50] sm:$0xff]  ;;  %v5132_v9 = vld [vmem:[%s10619_s28 + $0x58] sm:$0xff]  ;;  %v705_v19 = vld [vmem:[#allocation5 + $0x20] sm:$0xff] }
 0x12c   : > { %v710_v22 = vld [vmem:[#allocation5 + $0x48] sm:$0xff]  ;;  %v712_v23 = vld [vmem:[#allocation5 + $0x58] sm:$0xff]  ;;  %v709_v28 = vld [vmem:[#allocation5 + $0x40] sm:$0xff] }
 0x12d   : > { %6086 = vmatmul.mubr.msk.f32.vlgmr.msra.gmra.mrb[0].mxu1 %vm603_vm0, %v592_v32  ;;  %v711_v29 = vld [vmem:[#allocation5 + $0x50] sm:$0xff]  ;;  %v713_v37 = vld [vmem:[#allocation5 + $0x60] sm:$0xff]  ;;  %v1126_v40 = vld [vmem:[#allocation5 + $0x108] sm:$0xff] }
 0x12e   : > { %6279 = vmatpush3.bf16.msra.mxu0 %v8251_v26  ;;  %6088 = vmatprep.mubr.msk.f32.mxu1 %vm603_vm0, %v593_v33  ;;  %v715_v38 = vld [vmem:[#allocation5 + $0x70] sm:$0xff]  ;;  %v1128_v41 = vld [vmem:[#allocation5 + $0x118] sm:$0xff]  ;;  %v1125_v44 = vld [vmem:[#allocation5 + $0x100] sm:$0xff] }
 0x12f   : > { %6331 = vmatpush3.bf16.msra.mxu1 %v8254_v27  ;;  %6297 = vmatprep.subr.bf16.mxu0 %v6296_v36  ;;  %v1130_v46 = vld [vmem:[#allocation5 + $0x128] sm:$0xff]  ;;  %v1129_v50 = vld [vmem:[#allocation5 + $0x120] sm:$0xff]  ;;  %v1131_v51 = vld [vmem:[#allocation5 + $0x130] sm:$0xff] }
 0x130   : > { %6333 = vmatprep.subr.bf16.mxu1 %v8268_v34  ;;  %v6350_v56 = vpack.c.bf16 %v1131_v51, %v1129_v50  ;;  %v1133_v58 = vld [vmem:[#allocation5 + $0x140] sm:$0xff]  ;;  %v1138_v61 = vld [vmem:[#allocation5 + $0x168] sm:$0xff]  ;;  %v1140_v62 = vld [vmem:[#allocation5 + $0x178] sm:$0xff] }
 0x131   : > { %6064 = vmatmul.mubr.msk.f32.vlgmr.msra.gmra.mrb[0].mxu0 %vm603_vm0, %v592_v32  ;;  %6089 = vmatmul.mubr.msk.f32.gmra.mrb[2].mxu1 %vm603_vm0, %v594_v42  ;;  %v1572_v51 = vld [vmem:[#allocation5 + $0x240] sm:$0xff] }
 0x132   : > { %6066 = vmatprep.mubr.msk.f32.mxu0 %vm603_vm0, %v593_v33  ;;  %6107 = vmatprep.mubr.msk.f32.mxu1 %vm603_vm0, %v8215_v10  ;;  %v702_v10 = vld [vmem:[#allocation5 + $0x8] sm:$0xff] }
 0x133   : > { %6335 = vmatpush3.bf16.msra.mxu1 %v8268_v34  ;;  %6299 = vmatpush1.bf16.msra.mxu0 %v6298_v45  ;;  %v1127_v45 = vld [vmem:[#allocation5 + $0x110] sm:$0xff] }
 0x134   : > { %6337 = vmatprep.subr.bf16.mxu1 %v8280_v43  ;;  %6301 = vmatprep.subr.bf16.mxu0 %v6300_v47  ;;  %v1132_v47 = vld [vmem:[#allocation5 + $0x138] sm:$0xff]  ;;  %v6346_v48 = vpack.c.bf16 %v1127_v45, %v1125_v44  ;;  %v1570_v44 = vld [vmem:[#allocation5 + $0x230] sm:$0xff] }
 0x135   : > { %6067 = vmatmul.mubr.msk.f32.gmra.mrb[2].mxu0 %vm603_vm0, %v594_v42  ;;  %v6348_v49 = vpack.c.bf16 %v1132_v47, %v1130_v46  ;;  %v1573_v46 = vld [vmem:[#allocation5 + $0x248] sm:$0xff]  ;;  %v1575_v47 = vld [vmem:[#allocation5 + $0x258] sm:$0xff] }
 0x136   : > { %904 = vmatprep.mubr.f32.mxu0 %v7804_v13  ;;  %v6416_v50 = vpack.c.bf16 %v1575_v47, %v1573_v46  ;;  %v2016_v47 = vld [vmem:[#allocation5 + $0x368] sm:$0xff] }
 0x137   : > { %6339 = vmatpush3.bf16.msra.mxu1 %v8280_v43  ;;  %6303 = vmatpush1.bf16.msra.mxu0 %v6302_v53  ;;  %v1134_v53 = vld [vmem:[#allocation5 + $0x148] sm:$0xff] }
 0x138   : > { %6341 = vmatprep.subr.bf16.mxu1 %v8291_v52  ;;  %6305 = vmatprep.subr.bf16.mxu0 %v6304_v54  ;;  %v1136_v54 = vld [vmem:[#allocation5 + $0x158] sm:$0xff] }
 0x139   : > { %v6352_v57 = vpack.c.bf16 %v1136_v54, %v1134_v53  ;;  %v1577_v54 = vld [vmem:[#allocation5 + $0x268] sm:$0xff] }
 0x13b   : > { %6343 = vmatpush3.bf16.msra.mxu1 %v8291_v52  ;;  %6307 = vmatpush1.bf16.msra.mxu0 %v6306_v59  ;;  %v1135_v59 = vld [vmem:[#allocation5 + $0x150] sm:$0xff] }
 0x13c   : > { %6361 = vmatprep.subr.bf16.mxu1 %v8218_v11  ;;  %6309 = vmatprep.subr.bf16.mxu0 %v6308_v60 }
 0x13e   : > { %6108 = vmatmul.mubr.msk.f32.vlgmr.msra.gmra.mrb[4].mxu1 %vm603_vm0, %v592_v32  ;;  %v714_v32 = vld [vmem:[#allocation5 + $0x68] sm:$0xff] }
 0x13f   : > { %6363 = vmatpush3.bf16.msra.mxu1 %v8218_v11  ;;  %6110 = vmatprep.mubr.msk.f32.mxu1 %vm603_vm0, %v593_v33  ;;  %v716_v33 = vld [vmem:[#allocation5 + $0x78] sm:$0xff] }
 0x140   : > { %6365 = vmatprep.subr.bf16.mxu1 %v8227_v15  ;;  %6311 = vmatpush1.bf16.msra.mxu0 %v6310_v63  ;;  %v6324_v36 = vpack.c.bf16 %v716_v33, %v714_v32  ;;  %v1367_v32 = vld [vmem:[#allocation5 + $0x1f0] sm:$0xff]  ;;  %v1565_v33 = vld [vmem:[#allocation5 + $0x208] sm:$0xff] }
 0x142   : > { %6111 = vmatmul.mubr.msk.f32.gmra.mrb[6].mxu1 %vm603_vm0, %v594_v42  ;;  %v6326_v42 = vpack.c.bf16 %v715_v38, %v713_v37  ;;  %v1564_v37 = vld [vmem:[#allocation5 + $0x200] sm:$0xff]  ;;  %v1566_v38 = vld [vmem:[#allocation5 + $0x210] sm:$0xff] }
 0x143   : > { %6367 = vmatpush3.bf16.msra.mxu1 %v8227_v15  ;;  %6129 = vmatprep.mubr.msk.f32.mxu1 %vm603_vm0, %v5101_v0 }
 0x144   : > { %6369 = vmatprep.subr.bf16.mxu1 %v8239_v20 }
 0x147   : > { %6371 = vmatpush3.bf16.msra.mxu1 %v8239_v20 }
 0x148   : > { %6373 = vmatprep.subr.bf16.mxu1 %v8251_v26 }
 0x14b   : > { %6375 = vmatpush3.bf16.msra.mxu1 %v8251_v26 }
 0x14c   : > { %6393 = vmatprep.subr.bf16.mxu1 %v8202_v3 }
 0x14e   : > { %6130 = vmatmul.mubr.msk.f32.vlgmr.msra.gmra.mrb[8].mxu1 %vm603_vm0, %v5102_v1 }
 0x14f   : > { %6395 = vmatpush3.bf16.msra.mxu1 %v8202_v3  ;;  %6132 = vmatprep.mubr.msk.f32.mxu1 %vm603_vm0, %v5103_v2 }
 0x150   : > { %6397 = vmatprep.subr.bf16.mxu1 %v8205_v5 }
 0x152   : > { %6133 = vmatmul.mubr.msk.f32.gmra.mrb[10].mxu1 %vm603_vm0, %v5104_v4 }
 0x153   : > { %6399 = vmatpush3.bf16.msra.mxu1 %v8205_v5  ;;  %6151 = vmatprep.mubr.msk.f32.mxu1 %vm603_vm0, %v5101_v0 }
 0x154   : > { %6401 = vmatprep.subr.bf16.mxu1 %v8225_v14 }
 0x157   : > { %6403 = vmatpush3.bf16.msra.mxu1 %v8225_v14 }
 0x158   : > { %6405 = vmatprep.subr.bf16.mxu1 %v8242_v21 }
 0x15b   : > { %6407 = vmatpush3.bf16.msra.mxu1 %v8242_v21 }
 0x15c   : > { %6425 = vmatprep.subr.bf16.mxu1 %v8254_v27 }
 0x15e   : > { %6152 = vmatmul.mubr.msk.f32.vlgmr.msra.gmra.mrb[12].mxu1 %vm603_vm0, %v5102_v1 }
 0x15f   : > { %6427 = vmatpush3.bf16.msra.mxu1 %v8254_v27  ;;  %6154 = vmatprep.mubr.msk.f32.mxu1 %vm603_vm0, %v5103_v2 }
 0x160   : > { %6429 = vmatprep.subr.bf16.mxu1 %v8268_v34 }
 0x162   : > { %6155 = vmatmul.mubr.msk.f32.gmra.mrb[14].mxu1 %vm603_vm0, %v5104_v4 }
 0x163   : > { %6431 = vmatpush3.bf16.msra.mxu1 %v8268_v34  ;;  %6173 = vmatprep.mubr.msk.f32.mxu1 %vm603_vm0, %v5101_v0  ;;  %v6354_v0 = vpack.c.bf16 %v1135_v59, %v1133_v58  ;;  %v1576_v59 = vld [vmem:[#allocation5 + $0x260] sm:$0xff] }
 0x164   : > { %6433 = vmatprep.subr.bf16.mxu1 %v8280_v43 }
 0x167   : > { %6435 = vmatpush3.bf16.msra.mxu1 %v8280_v43 }
 0x168   : > { %6437 = vmatprep.subr.bf16.mxu1 %v8291_v52 }
 0x16b   : > { %6439 = vmatpush3.bf16.msra.mxu1 %v8291_v52 }
 0x16c   : > { %6457 = vmatprep.subr.bf16.mxu1 %v8218_v11 }
 0x16e   : > { %6174 = vmatmul.mubr.msk.f32.vlgmr.msra.gmra.mrb[16].mxu1 %vm603_vm0, %v5102_v1  ;;  %v6356_v1 = vpack.c.bf16 %v1140_v62, %v1138_v61  ;;  %v1776_v61 = vld [vmem:[#allocation5 + $0x288] sm:$0xff]  ;;  %v1778_v62 = vld [vmem:[#allocation5 + $0x298] sm:$0xff] }
 0x16f   : > { %6459 = vmatpush3.bf16.msra.mxu1 %v8218_v11  ;;  %6176 = vmatprep.mubr.msk.f32.mxu1 %vm603_vm0, %v5103_v2  ;;  %v704_v11 = vld [vmem:[#allocation5 + $0x18] sm:$0xff]  ;;  %v1137_v2 = vld [vmem:[#allocation5 + $0x160] sm:$0xff] }
 0x170   : > { %6461 = vmatprep.subr.bf16.mxu1 %v8227_v15  ;;  %v6312_v12 = vpack.c.bf16 %v704_v11, %v702_v10  ;;  %v1353_v10 = vld [vmem:[#allocation5 + $0x180] sm:$0xff]  ;;  %v1355_v11 = vld [vmem:[#allocation5 + $0x190] sm:$0xff] }
 0x172   : > { %6177 = vmatmul.mubr.msk.f32.gmra.mrb[18].mxu1 %vm603_vm0, %v5104_v4  ;;  %6313 = vmatprep.subr.bf16.mxu0 %v6312_v12  ;;  %v1139_v4 = vld [vmem:[#allocation5 + $0x170] sm:$0xff]  ;;  %v1358_v12 = vld [vmem:[#allocation5 + $0x1a8] sm:$0xff] }
 0x173   : > { %6463 = vmatpush3.bf16.msra.mxu1 %v8227_v15  ;;  %6195 = vmatprep.mubr.msk.f32.mxu1 %vm603_vm0, %v5129_v6  ;;  %v708_v15 = vld [vmem:[#allocation5 + $0x38] sm:$0xff] }
 0x174   : > { %6465 = vmatprep.subr.bf16.mxu1 %v8239_v20 }
 0x177   : > { %6467 = vmatpush3.bf16.msra.mxu1 %v8239_v20  ;;  %v707_v20 = vld [vmem:[#allocation5 + $0x30] sm:$0xff] }
 0x178   : > { %6469 = vmatprep.subr.bf16.mxu1 %v8251_v26  ;;  %v6318_v24 = vpack.c.bf16 %v707_v20, %v705_v19  ;;  %v1364_v19 = vld [vmem:[#allocation5 + $0x1d8] sm:$0xff] }
 0x17b   : > { %6471 = vmatpush3.bf16.msra.mxu1 %v8251_v26 }
 0x17c   : > { %6489 = vmatprep.subr.bf16.mxu1 %v8202_v3 }
 0x17e   : > { %6196 = vmatmul.mubr.msk.f32.vlgmr.msra.gmra.mrb[20].mxu1 %vm603_vm0, %v5130_v7 }
 0x17f   : > { %6491 = vmatpush3.bf16.msra.mxu1 %v8202_v3  ;;  %6198 = vmatprep.mubr.msk.f32.mxu1 %vm603_vm0, %v5131_v8  ;;  %v701_v3 = vld [vmem:[#allocation5] sm:$0xff] }
 0x180   : > { %6493 = vmatprep.subr.bf16.mxu1 %v8205_v5 }
 0x182   : > { %6199 = vmatmul.mubr.msk.f32.gmra.mrb[22].mxu1 %vm603_vm0, %v5132_v9 }
 0x183   : > { %6495 = vmatpush3.bf16.msra.mxu1 %v8205_v5  ;;  %6217 = vmatprep.mubr.msk.f32.mxu1 %vm603_vm0, %v5129_v6  ;;  %v703_v5 = vld [vmem:[#allocation5 + $0x10] sm:$0xff] }
 0x184   : > { %6497 = vmatprep.subr.bf16.mxu1 %v8225_v14  ;;  %v6314_v16 = vpack.c.bf16 %v703_v5, %v701_v3  ;;  %v1360_v3 = vld [vmem:[#allocation5 + $0x1b8] sm:$0xff]  ;;  %v6378_v5 = vpack.c.bf16 %v1355_v11, %v1353_v10  ;;  %v1781_v10 = vld [vmem:[#allocation5 + $0x2b0] sm:$0xff] }
 0x187   : > { %6499 = vmatpush3.bf16.msra.mxu1 %v8225_v14  ;;  %v706_v14 = vld [vmem:[#allocation5 + $0x28] sm:$0xff] }
 0x188   : > { %6501 = vmatprep.subr.bf16.mxu1 %v8242_v21  ;;  %v6316_v18 = vpack.c.bf16 %v708_v15, %v706_v14  ;;  %v6380_v14 = vpack.c.bf16 %v1360_v3, %v1358_v12  ;;  %v1357_v15 = vld [vmem:[#allocation5 + $0x1a0] sm:$0xff]  ;;  %v1784_v12 = vld [vmem:[#allocation5 + $0x2c8] sm:$0xff]  ;;  %v1786_v3 = vld [vmem:[#allocation5 + $0x2d8] sm:$0xff] }
 0x18b   : > { %6503 = vmatpush3.bf16.msra.mxu1 %v8242_v21 }
 0x18c   : > { %6521 = vmatprep.subr.bf16.mxu1 %v8254_v27 }
 0x18e   : > { %6218 = vmatmul.mubr.msk.f32.vlgmr.msra.gmra.mrb[24].mxu1 %vm603_vm0, %v5130_v7 }
 0x18f   : > { %6523 = vmatpush3.bf16.msra.mxu1 %v8254_v27  ;;  %6220 = vmatprep.mubr.msk.f32.mxu1 %vm603_vm0, %v5131_v8  ;;  %v6320_v27 = vpack.c.bf16 %v712_v23, %v710_v22  ;;  %v1361_v23 = vld [vmem:[#allocation5 + $0x1c0] sm:$0xff] }
 0x190   : > { %6525 = vmatprep.subr.bf16.mxu1 %v8268_v34 }
 0x192   : > { %6221 = vmatmul.mubr.msk.f32.gmra.mrb[26].mxu1 %vm603_vm0, %v5132_v9 }
 0x193   : > { %6527 = vmatpush3.bf16.msra.mxu1 %v8268_v34  ;;  %6239 = vmatprep.mubr.msk.f32.mxu1 %vm603_vm0, %v5129_v6  ;;  %v6322_v34 = vpack.c.bf16 %v711_v29, %v709_v28  ;;  %v1354_v6 = vld [vmem:[#allocation5 + $0x188] sm:$0xff] }
 0x194   : > { %6529 = vmatprep.subr.bf16.mxu1 %v8280_v43 }
 0x197   : > { %6531 = vmatpush3.bf16.msra.mxu1 %v8280_v43  ;;  %v6344_v43 = vpack.c.bf16 %v1128_v41, %v1126_v40  ;;  %v1571_v40 = vld [vmem:[#allocation5 + $0x238] sm:$0xff]  ;;  %v6410_v41 = vpack.c.bf16 %v1566_v38, %v1564_v37  ;;  %v2009_v37 = vld [vmem:[#allocation5 + $0x330] sm:$0xff] }
 0x198   : > { %6533 = vmatprep.subr.bf16.mxu1 %v8291_v52 }
 0x19b   : > { %6535 = vmatpush3.bf16.msra.mxu1 %v8291_v52 }
 0x19e   : > { %6240 = vmatmul.mubr.msk.f32.vlgmr.msra.gmra.mrb[28].mxu1 %vm603_vm0, %v5130_v7  ;;  %v1356_v7 = vld [vmem:[#allocation5 + $0x198] sm:$0xff] }
 0x19f   : > { %6242 = vmatprep.mubr.msk.f32.mxu1 %vm603_vm0, %v5131_v8  ;;  %v6358_v8 = vpack.c.bf16 %v1139_v4, %v1137_v2  ;;  %v1777_v2 = vld [vmem:[#allocation5 + $0x290] sm:$0xff]  ;;  %v1780_v4 = vld [vmem:[#allocation5 + $0x2a8] sm:$0xff] }
 0x1a2   : > { %6243 = vmatmul.mubr.msk.f32.gmra.mrb[30].mxu1 %vm603_vm0, %v5132_v9  ;;  %v6376_v9 = vpack.c.bf16 %v1356_v7, %v1354_v6  ;;  %v1782_v6 = vld [vmem:[#allocation5 + $0x2b8] sm:$0xff] }
 0x1a3   : > { %2651 = vmatprep.mubr.f32.mxu1 %v7804_v13 }
 0x200   : > { %v6087_v17 = vpop.f32.mrb[0].mxu1 }
 0x201   : > { %v792_v21 = vpop.f32.mrb[1].mxu1 }
 0x202   : > { %5077 = vmatmul.mubr.msk.f32.vlgmr.msra.gmra.mrb[4].mxu0 %vm603_vm0, %v792_v21 }
 0x203   : > { %6315 = vmatpush1.bf16.msra.mxu0 %v6314_v16  ;;  %910 = vmatprep.mubr.f32.mxu0 %v7804_v13  ;;  %v1359_v16 = vld [vmem:[#allocation5 + $0x1b0] sm:$0xff] }
 0x204   : > { %v6065_v25 = vpop.f32.mrb[0].mxu0  ;;  %6317 = vmatprep.subr.bf16.mxu0 %v6316_v18  ;;  %v6090_v26 = vpop.f32.mrb[2].mxu1  ;;  %v1362_v18 = vld [vmem:[#allocation5 + $0x1c8] sm:$0xff]  ;;  %v6382_v21 = vpack.c.bf16 %v1359_v16, %v1357_v15  ;;  %v6448_v15 = vpack.c.bf16 %v1786_v3, %v1784_v12  ;;  %v1783_v16 = vld [vmem:[#allocation5 + $0x2c0] sm:$0xff] }
 0x205   : > { %v682_v30 = vpop.f32.mrb[1].mxu0  ;;  %v802_v31 = vpop.f32.mrb[3].mxu1  ;;  %v6384_v22 = vpack.c.bf16 %v1364_v19, %v1362_v18  ;;  %v1788_v19 = vld [vmem:[#allocation5 + $0x2e8] sm:$0xff] }
 0x206   : > { %5078 = vmatmul.mubr.msk.f32.gmra.mrb[6].mxu0 %vm603_vm0, %v6087_v17  ;;  %v2227_v3 = vld [vmem:[#allocation5 + $0x3e8] sm:$0xff] }
 0x207   : > { %6319 = vmatpush1.bf16.msra.mxu0 %v6318_v24  ;;  %916 = vmatprep.mubr.f32.mxu0 %v7804_v13  ;;  %v1363_v24 = vld [vmem:[#allocation5 + $0x1d0] sm:$0xff] }
 0x208   : > { %v6068_v35 = vpop.f32.mrb[2].mxu0  ;;  %6321 = vmatprep.subr.bf16.mxu0 %v6320_v27  ;;  %v1368_v27 = vld [vmem:[#allocation5 + $0x1f8] sm:$0xff]  ;;  %v6386_v29 = vpack.c.bf16 %v1363_v24, %v1361_v23  ;;  %v1787_v24 = vld [vmem:[#allocation5 + $0x2e0] sm:$0xff] }
 0x209   : > { %v692_v39 = vpop.f32.mrb[3].mxu0 }
 0x20a   : > { %5079 = vmatmul.mubr.msk.f32.gmra.mrb[8].mxu0 %vm603_vm0, %v802_v31  ;;  %v1365_v31 = vld [vmem:[#allocation5 + $0x1e0] sm:$0xff] }
 0x20b   : > { %6323 = vmatpush1.bf16.msra.mxu0 %v6322_v34  ;;  %922 = vmatprep.mubr.f32.mxu0 %v7804_v13  ;;  %v1567_v34 = vld [vmem:[#allocation5 + $0x218] sm:$0xff] }
 0x20c   : > { %6325 = vmatprep.subr.bf16.mxu0 %v6324_v36  ;;  %v6408_v36 = vpack.c.bf16 %v1567_v34, %v1565_v33  ;;  %v2010_v33 = vld [vmem:[#allocation5 + $0x338] sm:$0xff] }
 0x20e   : > { %5080 = vmatmul.mubr.msk.f32.gmra.mrb[10].mxu0 %vm603_vm0, %v6090_v26  ;;  %v1366_v26 = vld [vmem:[#allocation5 + $0x1e8] sm:$0xff] }
 0x20f   : > { %6327 = vmatpush1.bf16.msra.mxu0 %v6326_v42  ;;  %1005 = vmatprep.mubr.f32.mxu0 %v7804_v13 }
 0x210   : > { %6345 = vmatprep.subr.bf16.mxu0 %v6344_v43  ;;  %v1568_v43 = vld [vmem:[#allocation5 + $0x220] sm:$0xff] }
 0x211   : > { %v6109_v52 = vpop.f32.mrb[4].mxu1 }
 0x212   : > { %v1105_v55 = vpop.f32.mrb[5].mxu1  ;;  %5081 = vmatmul.mubr.msk.f32.vlgmr.msra.gmra.mrb[4].mxu0 %vm603_vm0, %v682_v30  ;;  %v6388_v30 = vpack.c.bf16 %v1368_v27, %v1366_v26  ;;  %v2004_v26 = vld [vmem:[#allocation5 + $0x308] sm:$0xff]  ;;  %v2006_v27 = vld [vmem:[#allocation5 + $0x318] sm:$0xff] }
 0x213   : > { %6347 = vmatpush1.bf16.msra.mxu0 %v6346_v48  ;;  %1011 = vmatprep.mubr.f32.mxu0 %v7804_v13 }
 0x214   : > { %6349 = vmatprep.subr.bf16.mxu0 %v6348_v49  ;;  %v6414_v49 = vpack.c.bf16 %v1570_v44, %v1568_v43  ;;  %v2011_v44 = vld [vmem:[#allocation5 + $0x340] sm:$0xff] }
 0x215   : > { %v8408_v60 = vpop.f32.mrb[6].mxu1 }
 0x216   : > { %v1115_v63 = vpop.f32.mrb[7].mxu1  ;;  %5082 = vmatmul.mubr.msk.f32.gmra.mrb[6].mxu0 %vm603_vm0, %v6065_v25 }
 0x217   : > { %6351 = vmatpush1.bf16.msra.mxu0 %v6350_v56  ;;  %1017 = vmatprep.mubr.f32.mxu0 %v7804_v13 }
 0x218   : > { %6353 = vmatprep.subr.bf16.mxu0 %v6352_v57 }
 0x21a   : > { %5083 = vmatmul.mubr.msk.f32.gmra.mrb[8].mxu0 %vm603_vm0, %v692_v39  ;;  %v1569_v39 = vld [vmem:[#allocation5 + $0x228] sm:$0xff] }
 0x21b   : > { %6355 = vmatpush1.bf16.msra.mxu0 %v6354_v0  ;;  %1023 = vmatprep.mubr.f32.mxu0 %v7804_v13  ;;  %v6412_v42 = vpack.c.bf16 %v1571_v40, %v1569_v39  ;;  %v6440_v0 = vpack.c.bf16 %v1778_v62, %v1776_v61  ;;  %v2012_v39 = vld [vmem:[#allocation5 + $0x348] sm:$0xff]  ;;  %v2014_v40 = vld [vmem:[#allocation5 + $0x358] sm:$0xff] }
 0x21c   : > { %6357 = vmatprep.subr.bf16.mxu0 %v6356_v1  ;;  %v1775_v1 = vld [vmem:[#allocation5 + $0x280] sm:$0xff]  ;;  %v6480_v43 = vpack.c.bf16 %v2014_v40, %v2012_v39  ;;  %v2221_v61 = vld [vmem:[#allocation5 + $0x3b8] sm:$0xff]  ;;  %v2438_v40 = vld [vmem:[#allocation5 + $0x468] sm:$0xff] }
 0x21d   : > { %v6442_v7 = vpack.c.bf16 %v1777_v2, %v1775_v1  ;;  %v2220_v1 = vld [vmem:[#allocation5 + $0x3b0] sm:$0xff] }
 0x21e   : > { %5084 = vmatmul.mubr.msk.f32.gmra.mrb[10].mxu0 %vm603_vm0, %v6068_v35  ;;  %v6390_v35 = vpack.c.bf16 %v1367_v32, %v1365_v31  ;;  %v2005_v31 = vld [vmem:[#allocation5 + $0x310] sm:$0xff]  ;;  %v2008_v32 = vld [vmem:[#allocation5 + $0x328] sm:$0xff] }
 0x21f   : > { %6359 = vmatpush1.bf16.msra.mxu0 %v6358_v8  ;;  %1217 = vmatprep.mubr.f32.mxu0 %v7804_v13  ;;  %v6444_v8 = vpack.c.bf16 %v1782_v6, %v1780_v4  ;;  %v2223_v4 = vld [vmem:[#allocation5 + $0x3c8] sm:$0xff]  ;;  %v2225_v6 = vld [vmem:[#allocation5 + $0x3d8] sm:$0xff] }
 0x220   : > { %6377 = vmatprep.subr.bf16.mxu0 %v6376_v9  ;;  %v1779_v9 = vld [vmem:[#allocation5 + $0x2a0] sm:$0xff] }
 0x221   : > { %v6131_v17 = vpop.f32.mrb[8].mxu1 }
 0x222   : > { %v1333_v20 = vpop.f32.mrb[9].mxu1  ;;  %5097 = vmatmul.mubr.msk.f32.vlgmr.msra.gmra.mrb[4].mxu0 %vm603_vm0, %v1105_v55  ;;  %v1579_v55 = vld [vmem:[#allocation5 + $0x278] sm:$0xff] }
 0x223   : > { %6379 = vmatpush1.bf16.msra.mxu0 %v6378_v5  ;;  %1223 = vmatprep.mubr.f32.mxu0 %v7804_v13  ;;  %v6420_v58 = vpack.c.bf16 %v1579_v55, %v1577_v54  ;;  %v2215_v54 = vld [vmem:[#allocation5 + $0x388] sm:$0xff]  ;;  %v2217_v55 = vld [vmem:[#allocation5 + $0x398] sm:$0xff] }
 0x224   : > { %6381 = vmatprep.subr.bf16.mxu0 %v6380_v14  ;;  %v6446_v14 = vpack.c.bf16 %v1781_v10, %v1779_v9  ;;  %v6512_v9 = vpack.c.bf16 %v2225_v6, %v2223_v4  ;;  %v2222_v10 = vld [vmem:[#allocation5 + $0x3c0] sm:$0xff] }
 0x225   : > { %v8418_v25 = vpop.f32.mrb[10].mxu1 }
 0x226   : > { %v1343_v28 = vpop.f32.mrb[11].mxu1  ;;  %5098 = vmatmul.mubr.msk.f32.gmra.mrb[6].mxu0 %vm603_vm0, %v6109_v52  ;;  %v1574_v52 = vld [vmem:[#allocation5 + $0x250] sm:$0xff] }
 0x227   : > { %6383 = vmatpush1.bf16.msra.mxu0 %v6382_v21  ;;  %1229 = vmatprep.mubr.f32.mxu0 %v7804_v13  ;;  %v6418_v57 = vpack.c.bf16 %v1574_v52, %v1572_v51  ;;  %v2015_v52 = vld [vmem:[#allocation5 + $0x360] sm:$0xff] }
 0x228   : > { %6385 = vmatprep.subr.bf16.mxu0 %v6384_v22 }
 0x22a   : > { %5099 = vmatmul.mubr.msk.f32.gmra.mrb[8].mxu0 %vm603_vm0, %v1115_v63 }
 0x22b   : > { %6387 = vmatpush1.bf16.msra.mxu0 %v6386_v29  ;;  %1235 = vmatprep.mubr.f32.mxu0 %v7804_v13  ;;  %v6472_v29 = vpack.c.bf16 %v2006_v27, %v2004_v26  ;;  %v2432_v26 = vld [vmem:[#allocation5 + $0x438] sm:$0xff] }
 0x22c   : > { %6389 = vmatprep.subr.bf16.mxu0 %v6388_v30  ;;  %v2003_v30 = vld [vmem:[#allocation5 + $0x300] sm:$0xff] }
 0x22d   : > { %v6474_v34 = vpack.c.bf16 %v2005_v31, %v2003_v30  ;;  %v2431_v30 = vld [vmem:[#allocation5 + $0x430] sm:$0xff] }
 0x22e   : > { %5100 = vmatmul.mubr.msk.f32.gmra.mrb[10].mxu0 %vm603_vm0, %v8408_v60  ;;  %v1578_v60 = vld [vmem:[#allocation5 + $0x270] sm:$0xff] }
 0x22f   : > { %6391 = vmatpush1.bf16.msra.mxu0 %v6390_v35  ;;  %1445 = vmatprep.mubr.f32.mxu0 %v7804_v13  ;;  %v6422_v63 = vpack.c.bf16 %v1578_v60, %v1576_v59  ;;  %v6476_v35 = vpack.c.bf16 %v2010_v33, %v2008_v32  ;;  %v2216_v59 = vld [vmem:[#allocation5 + $0x390] sm:$0xff]  ;;  %v2219_v60 = vld [vmem:[#allocation5 + $0x3a8] sm:$0xff]  ;;  %v2436_v33 = vld [vmem:[#allocation5 + $0x458] sm:$0xff] }
 0x230   : > { %6409 = vmatprep.subr.bf16.mxu0 %v6408_v36  ;;  %v2007_v36 = vld [vmem:[#allocation5 + $0x320] sm:$0xff]  ;;  %v2434_v32 = vld [vmem:[#allocation5 + $0x448] sm:$0xff] }
 0x231   : > { %v6153_v45 = vpop.f32.mrb[12].mxu1 }
 0x232   : > { %v1544_v48 = vpop.f32.mrb[13].mxu1  ;;  %5109 = vmatmul.mubr.msk.f32.vlgmr.msra.gmra.mrb[4].mxu0 %vm603_vm0, %v1333_v20  ;;  %v1790_v20 = vld [vmem:[#allocation5 + $0x2f8] sm:$0xff] }
 0x233   : > { %6411 = vmatpush1.bf16.msra.mxu0 %v6410_v41  ;;  %1451 = vmatprep.mubr.f32.mxu0 %v7804_v13  ;;  %v6452_v23 = vpack.c.bf16 %v1790_v20, %v1788_v19  ;;  %v2426_v19 = vld [vmem:[#allocation5 + $0x408] sm:$0xff]  ;;  %v2428_v20 = vld [vmem:[#allocation5 + $0x418] sm:$0xff] }
 0x234   : > { %6413 = vmatprep.subr.bf16.mxu0 %v6412_v42  ;;  %v6478_v42 = vpack.c.bf16 %v2009_v37, %v2007_v36  ;;  %v6544_v36 = vpack.c.bf16 %v2436_v33, %v2434_v32  ;;  %v2433_v37 = vld [vmem:[#allocation5 + $0x440] sm:$0xff] }
 0x235   : > { %v8429_v53 = vpop.f32.mrb[14].mxu1 }
 0x236   : > { %v1554_v56 = vpop.f32.mrb[15].mxu1  ;;  %5110 = vmatmul.mubr.msk.f32.gmra.mrb[6].mxu0 %vm603_vm0, %v6131_v17  ;;  %v1785_v17 = vld [vmem:[#allocation5 + $0x2d0] sm:$0xff] }
 0x237   : > { %6415 = vmatpush1.bf16.msra.mxu0 %v6414_v49  ;;  %1457 = vmatprep.mubr.f32.mxu0 %v7804_v13  ;;  %v6450_v22 = vpack.c.bf16 %v1785_v17, %v1783_v16  ;;  %v2226_v17 = vld [vmem:[#allocation5 + $0x3e0] sm:$0xff] }
 0x238   : > { %6417 = vmatprep.subr.bf16.mxu0 %v6416_v50 }
 0x23a   : > { %5111 = vmatmul.mubr.msk.f32.gmra.mrb[8].mxu0 %vm603_vm0, %v1343_v28 }
 0x23b   : > { %6419 = vmatpush1.bf16.msra.mxu0 %v6418_v57  ;;  %1463 = vmatprep.mubr.f32.mxu0 %v7804_v13  ;;  %v6504_v57 = vpack.c.bf16 %v2217_v55, %v2215_v54 }
 0x23c   : > { %6421 = vmatprep.subr.bf16.mxu0 %v6420_v58  ;;  %v2214_v58 = vld [vmem:[#allocation5 + $0x380] sm:$0xff] }
 0x23d   : > { %v6506_v62 = vpack.c.bf16 %v2216_v59, %v2214_v58 }
 0x23e   : > { %5112 = vmatmul.mubr.msk.f32.gmra.mrb[10].mxu0 %vm603_vm0, %v8418_v25  ;;  %v1789_v25 = vld [vmem:[#allocation5 + $0x2f0] sm:$0xff] }
 0x23f   : > { %6423 = vmatpush1.bf16.msra.mxu0 %v6422_v63  ;;  %1656 = vmatprep.mubr.f32.mxu0 %v7804_v13  ;;  %v6454_v28 = vpack.c.bf16 %v1789_v25, %v1787_v24  ;;  %v6508_v63 = vpack.c.bf16 %v2221_v61, %v2219_v60  ;;  %v2427_v24 = vld [vmem:[#allocation5 + $0x410] sm:$0xff]  ;;  %v2430_v25 = vld [vmem:[#allocation5 + $0x428] sm:$0xff] }
 0x240   : > { %6441 = vmatprep.subr.bf16.mxu0 %v6440_v0  ;;  %v2218_v0 = vld [vmem:[#allocation5 + $0x3a0] sm:$0xff] }
 0x241   : > { %v6175_v11 = vpop.f32.mrb[16].mxu1 }
 0x242   : > { %v1755_v5 = vpop.f32.mrb[17].mxu1  ;;  %5117 = vmatmul.mubr.msk.f32.vlgmr.msra.gmra.mrb[4].mxu0 %vm603_vm0, %v1544_v48  ;;  %v2018_v48 = vld [vmem:[#allocation5 + $0x378] sm:$0xff] }
 0x243   : > { %6443 = vmatpush1.bf16.msra.mxu0 %v6442_v7  ;;  %1662 = vmatprep.mubr.f32.mxu0 %v7804_v13  ;;  %v6484_v51 = vpack.c.bf16 %v2018_v48, %v2016_v47  ;;  %v2552_v48 = vlaneseq }
 0x244   : > { %6445 = vmatprep.subr.bf16.mxu0 %v6444_v8  ;;  %v6510_v8 = vpack.c.bf16 %v2220_v1, %v2218_v0 }
 0x245   : > { %v8440_v18 = vpop.f32.mrb[18].mxu1 }
 0x246   : > { %v1765_v21 = vpop.f32.mrb[19].mxu1  ;;  %5118 = vmatmul.mubr.msk.f32.gmra.mrb[6].mxu0 %vm603_vm0, %v6153_v45  ;;  %v2013_v45 = vld [vmem:[#allocation5 + $0x350] sm:$0xff] }
 0x247   : > { %6447 = vmatpush1.bf16.msra.mxu0 %v6446_v14  ;;  %1668 = vmatprep.mubr.f32.mxu0 %v7804_v13  ;;  %v6482_v50 = vpack.c.bf16 %v2013_v45, %v2011_v44  ;;  %v2437_v45 = vld [vmem:[#allocation5 + $0x460] sm:$0xff] }
 0x248   : > { %6449 = vmatprep.subr.bf16.mxu0 %v6448_v15 }
 0x24a   : > { %5119 = vmatmul.mubr.msk.f32.gmra.mrb[8].mxu0 %vm603_vm0, %v1554_v56 }
 0x24b   : > { %6451 = vmatpush1.bf16.msra.mxu0 %v6450_v22  ;;  %1674 = vmatprep.mubr.f32.mxu0 %v7804_v13  ;;  %v6536_v22 = vpack.c.bf16 %v2428_v20, %v2426_v19  ;;  %v2578_v20 = vld [vmem:[#allocation8] sm:$0xff] }
 0x24c   : > { %6453 = vmatprep.subr.bf16.mxu0 %v6452_v23  ;;  %v2425_v23 = vld [vmem:[#allocation5 + $0x400] sm:$0xff] }
 0x24d   : > { %v6538_v27 = vpack.c.bf16 %v2427_v24, %v2425_v23  ;;  %v5164_v23 = vld [vmem:[%s10620_s20 + $0x218] sm:$0xff]  ;;  %v2579_v24 = vld [vmem:[#allocation8 + $0x8] sm:$0xff] }
 0x24e   : > { %5120 = vmatmul.mubr.msk.f32.gmra.mrb[10].mxu0 %vm603_vm0, %v8429_v53  ;;  %v2017_v53 = vld [vmem:[#allocation5 + $0x370] sm:$0xff] }
 0x24f   : > { %6455 = vmatpush1.bf16.msra.mxu0 %v6454_v28  ;;  %1867 = vmatprep.mubr.f32.mxu0 %v7804_v13  ;;  %v6486_v56 = vpack.c.bf16 %v2017_v53, %v2015_v52  ;;  %v6540_v28 = vpack.c.bf16 %v2432_v26, %v2430_v25  ;;  %v3035_v25 = vld [vmem:[#allocation8 + $0x28] sm:$0xff] }
 0x250   : > { %6473 = vmatprep.subr.bf16.mxu0 %v6472_v29  ;;  %v2429_v29 = vld [vmem:[#allocation5 + $0x420] sm:$0xff] }
 0x251   : > { %v6197_v38 = vpop.f32.mrb[20].mxu1 }
 0x252   : > { %v1983_v41 = vpop.f32.mrb[21].mxu1  ;;  %5125 = vmatmul.mubr.msk.f32.vlgmr.msra.gmra.mrb[4].mxu0 %vm603_vm0, %v1755_v5  ;;  %v2229_v5 = vld [vmem:[#allocation5 + $0x3f8] sm:$0xff] }
 0x253   : > { %6475 = vmatpush1.bf16.msra.mxu0 %v6474_v34  ;;  %1873 = vmatprep.mubr.f32.mxu0 %v7804_v13  ;;  %v6516_v16 = vpack.c.bf16 %v2229_v5, %v2227_v3 }
 0x254   : > { %6477 = vmatprep.subr.bf16.mxu0 %v6476_v35  ;;  %v6542_v35 = vpack.c.bf16 %v2431_v30, %v2429_v29  ;;  %v5166_v29 = vld [vmem:[%s10620_s20 + $0x228] sm:$0xff]  ;;  %v5168_v30 = vld [vmem:[%s10620_s20 + $0x238] sm:$0xff] }
 0x255   : > { %v8451_v46 = vpop.f32.mrb[22].mxu1  ;;  %v6572_v33 = vpack.c.bf16 %v5168_v30, %v5166_v29  ;;  %v5203_v29 = vld [vmem:[%s10620_s20 + $0x350] sm:$0xff]  ;;  %v5206_v30 = vld [vmem:[%s10620_s20 + $0x368] sm:$0xff] }
 0x256   : > { %v1993_v49 = vpop.f32.mrb[23].mxu1  ;;  %5126 = vmatmul.mubr.msk.f32.gmra.mrb[6].mxu0 %vm603_vm0, %v6175_v11  ;;  %v2224_v11 = vld [vmem:[#allocation5 + $0x3d0] sm:$0xff] }
 0x257   : > { %6479 = vmatpush1.bf16.msra.mxu0 %v6478_v42  ;;  %1879 = vmatprep.mubr.f32.mxu0 %v7804_v13  ;;  %v6514_v15 = vpack.c.bf16 %v2224_v11, %v2222_v10 }
 0x258   : > { %6481 = vmatprep.subr.bf16.mxu0 %v6480_v43 }
 0x25a   : > { %5127 = vmatmul.mubr.msk.f32.gmra.mrb[8].mxu0 %vm603_vm0, %v1765_v21 }
 0x25b   : > { %6483 = vmatpush1.bf16.msra.mxu0 %v6482_v50  ;;  %1885 = vmatprep.mubr.f32.mxu0 %v7804_v13 }
 0x25c   : > { %6485 = vmatprep.subr.bf16.mxu0 %v6484_v51  ;;  %v2550_v51 = vld [vmem:[#allocation7] sm:$0x3] }
 0x25e   : > { %5128 = vmatmul.mubr.msk.f32.gmra.mrb[10].mxu0 %vm603_vm0, %v8440_v18  ;;  %v2228_v18 = vld [vmem:[#allocation5 + $0x3f0] sm:$0xff] }
 0x25f   : > { %6487 = vmatpush1.bf16.msra.mxu0 %v6486_v56  ;;  %2095 = vmatprep.mubr.f32.mxu0 %v7804_v13  ;;  %v6518_v21 = vpack.c.bf16 %v2228_v18, %v2226_v17 }
 0x260   : > { %6505 = vmatprep.subr.bf16.mxu0 %v6504_v57 }
 0x261   : > { %v6219_v2 = vpop.f32.mrb[24].mxu1 }
 0x262   : > { %v2194_v7 = vpop.f32.mrb[25].mxu1  ;;  %5137 = vmatmul.mubr.msk.f32.vlgmr.msra.gmra.mrb[4].mxu0 %vm603_vm0, %v1983_v41  ;;  %v2440_v41 = vld [vmem:[#allocation5 + $0x478] sm:$0xff] }
 0x263   : > { %6507 = vmatpush1.bf16.msra.mxu0 %v6506_v62  ;;  %2101 = vmatprep.mubr.f32.mxu0 %v7804_v13  ;;  %v6548_v44 = vpack.c.bf16 %v2440_v41, %v2438_v40  ;;  %v5169_v41 = vld [vmem:[%s10620_s20 + $0x240] sm:$0xff] }
 0x264   : > { %6509 = vmatprep.subr.bf16.mxu0 %v6508_v63 }
 0x265   : > { %v6222_v12 = vpop.f32.mrb[26].mxu1 }
 0x266   : > { %v2204_v14 = vpop.f32.mrb[27].mxu1  ;;  %5138 = vmatmul.mubr.msk.f32.gmra.mrb[6].mxu0 %vm603_vm0, %v6197_v38  ;;  %v2435_v38 = vld [vmem:[#allocation5 + $0x450] sm:$0xff] }
 0x267   : > { %6511 = vmatpush1.bf16.msra.mxu0 %v6510_v8  ;;  %2107 = vmatprep.mubr.f32.mxu0 %v7804_v13  ;;  %v6546_v43 = vpack.c.bf16 %v2435_v38, %v2433_v37  ;;  %v5172_v37 = vld [vmem:[%s10620_s20 + $0x258] sm:$0xff] }
 0x268   : > { %6513 = vmatprep.subr.bf16.mxu0 %v6512_v9  ;;  %v2730_v38 = vld [vmem:[#allocation8 + $0x18] sm:$0xff] }
 0x26a   : > { %5139 = vmatmul.mubr.msk.f32.gmra.mrb[8].mxu0 %vm603_vm0, %v1993_v49  ;;  %v2553_v49 = vshrl.u32 %v2552_v48, 7  ;;  %v5175_v48 = vld [vmem:[%s10620_s20 + $0x270] sm:$0xff] }
 0x26b   : > { %6515 = vmatpush1.bf16.msra.mxu0 %v6514_v15  ;;  %2113 = vmatprep.mubr.f32.mxu0 %v7804_v13 }
 0x26c   : > { %6517 = vmatprep.subr.bf16.mxu0 %v6516_v16  ;;  %v8485_v50 = vsub.s32 0, %v2553_v49  ;;  %v8487_v52 = vsub.s32 1, %v2553_v49  ;;  %v5178_v49 = vld [vmem:[%s10620_s20 + $0x288] sm:$0xff] }
 0x26e   : > { %5140 = vmatmul.mubr.msk.f32.gmra.mrb[10].mxu0 %vm603_vm0, %v8451_v46  ;;  %v2439_v46 = vld [vmem:[#allocation5 + $0x470] sm:$0xff]  ;;  %v2555_v53 = vrot.slane %v2550_v51, %v8485_v50  ;;  %v2559_v55 = vrot.slane %v2550_v51, %v8487_v52  ;;  %v5180_v51 = vld [vmem:[%s10620_s20 + $0x298] sm:$0xff] }
 0x26f   : > { %6519 = vmatpush1.bf16.msra.mxu0 %v6518_v21  ;;  %2306 = vmatprep.mubr.f32.mxu0 %v7804_v13  ;;  %v6550_v47 = vpack.c.bf16 %v2439_v46, %v2437_v45  ;;  %v3034_v21 = vld [vmem:[#allocation8 + $0x20] sm:$0xff] }
 0x270   : > { %6537 = vmatprep.subr.bf16.mxu0 %v6536_v22  ;;  %v5162_v22 = vld [vmem:[%s10620_s20 + $0x208] sm:$0xff] }
 0x271   : > { %v6241_v31 = vpop.f32.mrb[28].mxu1  ;;  %v6568_v26 = vpack.c.bf16 %v5164_v23, %v5162_v22  ;;  %v5197_v22 = vld [vmem:[%s10620_s20 + $0x320] sm:$0xff]  ;;  %v5199_v23 = vld [vmem:[%s10620_s20 + $0x330] sm:$0xff] }
 0x272   : > { %v2405_v34 = vpop.f32.mrb[29].mxu1  ;;  %5145 = vmatmul.mubr.msk.f32.vlgmr.msra.gmra.mrb[4].mxu0 %vm603_vm0, %v2194_v7 }
 0x273   : > { %6539 = vmatpush1.bf16.msra.mxu0 %v6538_v27  ;;  %2312 = vmatprep.mubr.f32.mxu0 %v7804_v13  ;;  %v5161_v27 = vld [vmem:[%s10620_s20 + $0x200] sm:$0xff] }
 0x274   : > { %6541 = vmatprep.subr.bf16.mxu0 %v6540_v28  ;;  %v5163_v28 = vld [vmem:[%s10620_s20 + $0x210] sm:$0xff] }
 0x275   : > { %v6244_v39 = vpop.f32.mrb[30].mxu1  ;;  %v6570_v32 = vpack.c.bf16 %v5163_v28, %v5161_v27  ;;  %v5201_v28 = vld [vmem:[%s10620_s20 + $0x340] sm:$0xff] }
 0x276   : > { %v2415_v42 = vpop.f32.mrb[31].mxu1  ;;  %5146 = vmatmul.mubr.msk.f32.gmra.mrb[6].mxu0 %vm603_vm0, %v6219_v2 }
 0x277   : > { %6543 = vmatpush1.bf16.msra.mxu0 %v6542_v35  ;;  %2318 = vmatprep.mubr.f32.mxu0 %v7804_v13  ;;  %v5167_v35 = vld [vmem:[%s10620_s20 + $0x230] sm:$0xff] }
 0x278   : > { %6545 = vmatprep.subr.bf16.mxu0 %v6544_v36  ;;  %v5170_v36 = vld [vmem:[%s10620_s20 + $0x248] sm:$0xff] }
 0x279   : > { %v6576_v40 = vpack.c.bf16 %v5172_v37, %v5170_v36  ;;  %v5210_v36 = vld [vmem:[%s10620_s20 + $0x388] sm:$0xff]  ;;  %v5212_v37 = vld [vmem:[%s10620_s20 + $0x398] sm:$0xff] }
 0x27a   : > { %5147 = vmatmul.mubr.msk.f32.gmra.mrb[8].mxu0 %vm603_vm0, %v2204_v14 }
 0x27b   : > { %6547 = vmatpush1.bf16.msra.mxu0 %v6546_v43  ;;  %2324 = vmatprep.mubr.f32.mxu0 %v7804_v13  ;;  %v5174_v43 = vld [vmem:[%s10620_s20 + $0x268] sm:$0xff] }
 0x27c   : > { %6549 = vmatprep.subr.bf16.mxu0 %v6548_v44  ;;  %v5176_v44 = vld [vmem:[%s10620_s20 + $0x278] sm:$0xff] }
 0x27d   : > { %v6580_v46 = vpack.c.bf16 %v5176_v44, %v5174_v43  ;;  %v5216_v43 = vld [vmem:[%s10620_s20 + $0x3b8] sm:$0xff] }
 0x27e   : > { %5148 = vmatmul.mubr.msk.f32.gmra.mrb[10].mxu0 %vm603_vm0, %v6222_v12 }
 0x27f   : > { %6551 = vmatpush1.bf16.msra.mxu0 %v6550_v47  ;;  %2517 = vmatprep.mubr.f32.mxu0 %v7804_v13  ;;  %v5173_v47 = vld [vmem:[%s10620_s20 + $0x260] sm:$0xff] }
 0x282   : > { %5153 = vmatmul.mubr.msk.f32.vlgmr.msra.gmra.mrb[4].mxu0 %vm603_vm0, %v2405_v34  ;;  %v5165_v34 = vld [vmem:[%s10620_s20 + $0x220] sm:$0xff] }
 0x283   : > { %2523 = vmatprep.mubr.f32.mxu0 %v7804_v13 }
 0x286   : > { %5154 = vmatmul.mubr.msk.f32.gmra.mrb[6].mxu0 %vm603_vm0, %v6241_v31  ;;  %v2729_v31 = vld [vmem:[#allocation8 + $0x10] sm:$0xff] }
 0x287   : > { %2529 = vmatprep.mubr.f32.mxu0 %v7804_v13 }
 0x28a   : > { %5155 = vmatmul.mubr.msk.f32.gmra.mrb[8].mxu0 %vm603_vm0, %v2415_v42  ;;  %v5171_v42 = vld [vmem:[%s10620_s20 + $0x250] sm:$0xff] }
 0x28b   : > { %2535 = vmatprep.mubr.f32.mxu0 %v7804_v13  ;;  %v6578_v45 = vpack.c.bf16 %v5171_v42, %v5169_v41  ;;  %v5211_v41 = vld [vmem:[%s10620_s20 + $0x390] sm:$0xff]  ;;  %v5214_v42 = vld [vmem:[%s10620_s20 + $0x3a8] sm:$0xff] }
 0x28e   : > { %5156 = vmatmul.mubr.msk.f32.gmra.mrb[10].mxu0 %vm603_vm0, %v6244_v39  ;;  %v6574_v39 = vpack.c.bf16 %v5167_v35, %v5165_v34  ;;  %v5205_v34 = vld [vmem:[%s10620_s20 + $0x360] sm:$0xff]  ;;  %v5207_v35 = vld [vmem:[%s10620_s20 + $0x370] sm:$0xff] }
 0x28f   : > { %3106 = vmatprep.mubr.f32.mxu0 %v7804_v13 }
 0x355   : > { %v2519_v54 = vpop.f32.mrb[4].mxu0 }
 0x356   : > { %v2521_v56 = vpop.f32.mrb[5].mxu0  ;;  %v2562_v57 = vadd.f32 %v2555_v53, %v2519_v54  ;;  %v6584_v54 = vpack.c.bf16 %v5180_v51, %v5178_v49  ;;  %v5218_v49 = vld [vmem:[%s10620_s20 + $0x3c8] sm:$0xff]  ;;  %v5220_v51 = vld [vmem:[%s10620_s20 + $0x3d8] sm:$0xff] }
 0x357   : > { %v2563_v58 = vadd.f32 %v2559_v55, %v2521_v56  ;;  %v5179_v56 = vld [vmem:[%s10620_s20 + $0x290] sm:$0xff] }
 0x358   : > { %v2570_v63 = vmax.f32 %v2562_v57, 0.0  ;;  %v5182_v57 = vld [vmem:[%s10620_s20 + $0x2a8] sm:$0xff] }
 0x359   : > { %v2525_v59 = vpop.f32.mrb[6].mxu0  ;;  %v2571_v1 = vmax.f32 %v2563_v58, 0.0  ;;  %v5184_v58 = vld [vmem:[%s10620_s20 + $0x2b8] sm:$0xff] }
 0x35a   : > { %v2564_v60 = vadd.f32 %v2555_v53, %v2525_v59  ;;  %v2527_v61 = vpop.f32.mrb[7].mxu0 }
 0x35b   : > { %v2565_v62 = vadd.f32 %v2559_v55, %v2527_v61  ;;  %v5181_v61 = vld [vmem:[%s10620_s20 + $0x2a0] sm:$0xff] }
 0x35c   : > { %v2572_v0 = vmax.f32 %v2564_v60, 0.0  ;;  %v6588_v60 = vpack.c.bf16 %v5184_v58, %v5182_v57  ;;  %v5222_v57 = vld [vmem:[%s10620_s20 + $0x3e8] sm:$0xff]  ;;  %v5224_v58 = vld [vmem:[%s10620_s20 + $0x3f8] sm:$0xff] }
 0x35d   : > { %v2573_v2 = vmax.f32 %v2565_v62, 0.0  ;;  %v2531_v4 = vpop.f32.mrb[8].mxu0  ;;  %v5183_v62 = vld [vmem:[%s10620_s20 + $0x2b0] sm:$0xff] }
 0x35e   : > { %v6554_v6 = vpack.c.bf16 %v2572_v0, %v2570_v63  ;;  %v2533_v7 = vpop.f32.mrb[9].mxu0  ;;  %v2566_v9 = vadd.f32 %v2555_v53, %v2531_v4  ;;  %v5186_v63 = vld [vmem:[%s10620_s20 + $0x2c8] sm:$0xff]  ;;  %v5188_v0 = vld [vmem:[%s10620_s20 + $0x2d8] sm:$0xff]  ;;  %v5185_v4 = vld [vmem:[%s10620_s20 + $0x2c0] sm:$0xff] }
 0x35f   : > { %v6552_v8 = vpack.c.bf16 %v2573_v2, %v2571_v1  ;;  %v2567_v10 = vadd.f32 %v2559_v55, %v2533_v7  ;;  %v6590_v1 = vpack.c.bf16 %v5183_v62, %v5181_v61  ;;  %v6592_v2 = vpack.c.bf16 %v5188_v0, %v5186_v63  ;;  %v5190_v7 = vld [vmem:[%s10620_s20 + $0x2e8] sm:$0xff]  ;;  %v5223_v61 = vld [vmem:[%s10620_s20 + $0x3f0] sm:$0xff]  ;;  %v2667_v0 = vld [vmem:[%s10620_s20 + $0x18] sm:$0xff] }
 0x360   : > { %v2574_v14 = vmax.f32 %v2566_v9, 0.0  ;;  %v2665_v63 = vld [vmem:[%s10620_s20 + $0x8] sm:$0xff] }
 0x361   : > { %v2537_v11 = vpop.f32.mrb[10].mxu0  ;;  %6553 = vmatprep.subr.bf16.mxu1 %v6552_v8  ;;  %6697 = vmatprep.subr.bf16.mxu0 %v6552_v8  ;;  %v2575_v16 = vmax.f32 %v2567_v10, 0.0 }
 0x362   : > { %v2568_v12 = vadd.f32 %v2555_v53, %v2537_v11  ;;  %v2539_v3 = vpop.f32.mrb[11].mxu0  ;;  %6555 = vmatpush1.bf16.msra.mxu1 %v6554_v6  ;;  %6699 = vmatpush1.bf16.msra.mxu0 %v6554_v6  ;;  %v6582_v53 = vpack.c.bf16 %v5175_v48, %v5173_v47  ;;  %v5189_v11 = vld [vmem:[%s10620_s20 + $0x2e0] sm:$0xff]  ;;  %v5215_v47 = vld [vmem:[%s10620_s20 + $0x3b0] sm:$0xff] }
 0x363   : > { %v2569_v5 = vadd.f32 %v2559_v55, %v2539_v3  ;;  %v5177_v55 = vld [vmem:[%s10620_s20 + $0x280] sm:$0xff]  ;;  %v5194_v3 = vld [vmem:[%s10620_s20 + $0x308] sm:$0xff] }
 0x364   : > { %v2576_v15 = vmax.f32 %v2568_v12, 0.0  ;;  %v6586_v59 = vpack.c.bf16 %v5179_v56, %v5177_v55  ;;  %v5191_v12 = vld [vmem:[%s10620_s20 + $0x2f0] sm:$0xff] }
 0x365   : > { %v2577_v17 = vmax.f32 %v2569_v5, 0.0  ;;  %v5196_v5 = vld [vmem:[%s10620_s20 + $0x318] sm:$0xff]  ;;  %v5219_v55 = vld [vmem:[%s10620_s20 + $0x3d0] sm:$0xff] }
 0x366   : > { %v6558_v18 = vpack.c.bf16 %v2576_v15, %v2574_v14  ;;  %v6598_v14 = vpack.c.bf16 %v5191_v12, %v5189_v11  ;;  %v6600_v15 = vpack.c.bf16 %v5196_v5, %v5194_v3  ;;  %v2669_v12 = vld [vmem:[%s10620_s20 + $0x28] sm:$0xff]  ;;  %v2671_v3 = vld [vmem:[%s10620_s20 + $0x38] sm:$0xff] }
 0x367   : > { %v6556_v19 = vpack.c.bf16 %v2577_v17, %v2575_v16  ;;  %v5193_v16 = vld [vmem:[%s10620_s20 + $0x300] sm:$0xff]  ;;  %v5195_v17 = vld [vmem:[%s10620_s20 + $0x310] sm:$0xff] }
 0x369   : > { %6557 = vmatprep.subr.bf16.mxu1 %v6556_v19  ;;  %6701 = vmatprep.subr.bf16.mxu0 %v6556_v19 }
 0x36a   : > { %6559 = vmatpush1.bf16.msra.mxu1 %v6558_v18  ;;  %6703 = vmatpush1.bf16.msra.mxu0 %v6558_v18 }
 0x36b   : > { %6561 = vmatprep.subr.bf16.mxu1 %v6552_v8  ;;  %v5192_v8 = vld [vmem:[%s10620_s20 + $0x2f8] sm:$0xff] }
 0x36c   : > { %v6596_v10 = vpack.c.bf16 %v5192_v8, %v5190_v7 }
 0x36d   : > { %5157 = vmatmul.mubr.msk.f32.vlgmr.msra.gmra.mrb[32].mxu1 %vm2580_vm1, %v2578_v20  ;;  %5225 = vmatmul.mubr.msk.f32.vlgmr.msra.gmra.mrb[12].mxu0 %vm2580_vm1, %v3034_v21  ;;  %v6602_v20 = vpack.c.bf16 %v5195_v17, %v5193_v16  ;;  %v6636_v17 = vpack.c.bf16 %v2671_v3, %v2669_v12 }
 0x36e   : > { %6563 = vmatpush1.bf16.msra.mxu1 %v6554_v6  ;;  %2657 = vmatprep.mubr.f32.mxu1 %v7804_v13  ;;  %v5187_v6 = vld [vmem:[%s10620_s20 + $0x2d0] sm:$0xff] }
 0x36f   : > { %6565 = vmatprep.subr.bf16.mxu1 %v6556_v19  ;;  %3112 = vmatprep.mubr.f32.mxu0 %v7804_v13  ;;  %v6594_v9 = vpack.c.bf16 %v5187_v6, %v5185_v4  ;;  %v5200_v19 = vld [vmem:[%s10620_s20 + $0x338] sm:$0xff] }
 0x371   : > { %5158 = vmatmul.mubr.msk.f32.gmra.mrb[34].mxu1 %vm2580_vm1, %v2579_v24  ;;  %5226 = vmatmul.mubr.msk.f32.gmra.mrb[14].mxu0 %vm2580_vm1, %v3035_v25  ;;  %v5202_v24 = vld [vmem:[%s10620_s20 + $0x348] sm:$0xff]  ;;  %v5204_v25 = vld [vmem:[%s10620_s20 + $0x358] sm:$0xff] }
 0x372   : > { %6567 = vmatpush1.bf16.msra.mxu1 %v6558_v18  ;;  %2801 = vmatprep.mubr.f32.mxu1 %v7804_v13  ;;  %v5198_v18 = vld [vmem:[%s10620_s20 + $0x328] sm:$0xff]  ;;  %v6608_v27 = vpack.c.bf16 %v5204_v25, %v5202_v24 }
 0x373   : > { %6569 = vmatprep.subr.bf16.mxu1 %v6568_v26  ;;  %3354 = vmatprep.mubr.f32.mxu0 %v7804_v13  ;;  %v6604_v21 = vpack.c.bf16 %v5200_v19, %v5198_v18  ;;  %v6606_v26 = vpack.c.bf16 %v5199_v23, %v5197_v22  ;;  %v2668_v18 = vld [vmem:[%s10620_s20 + $0x20] sm:$0xff]  ;;  %v2670_v19 = vld [vmem:[%s10620_s20 + $0x30] sm:$0xff] }
 0x374   : > { %v6638_v24 = vpack.c.bf16 %v2670_v19, %v2668_v18 }
 0x375   : > { %5159 = vmatmul.mubr.msk.f32.vlgmr.msra.gmra.mrb[36].mxu1 %vm2580_vm1, %v2729_v31  ;;  %v5208_v31 = vld [vmem:[%s10620_s20 + $0x378] sm:$0xff] }
 0x376   : > { %2807 = vmatprep.mubr.f32.mxu1 %v7804_v13  ;;  %6571 = vmatpush1.bf16.msra.mxu1 %v6570_v32  ;;  %v6610_v32 = vpack.c.bf16 %v5203_v29, %v5201_v28  ;;  %v2674_v28 = vld [vmem:[%s10620_s20 + $0x50] sm:$0xff]  ;;  %v2677_v29 = vld [vmem:[%s10620_s20 + $0x68] sm:$0xff] }
 0x377   : > { %6573 = vmatprep.subr.bf16.mxu1 %v6572_v33  ;;  %v6612_v33 = vpack.c.bf16 %v5208_v31, %v5206_v30  ;;  %v2679_v30 = vld [vmem:[%s10620_s20 + $0x78] sm:$0xff] }
 0x379   : > { %5160 = vmatmul.mubr.msk.f32.gmra.mrb[38].mxu1 %vm2580_vm1, %v2730_v38  ;;  %v6614_v38 = vpack.c.bf16 %v5207_v35, %v5205_v34  ;;  %v2678_v34 = vld [vmem:[%s10620_s20 + $0x70] sm:$0xff]  ;;  %v2681_v35 = vld [vmem:[%s10620_s20 + $0x88] sm:$0xff] }
 0x37a   : > { %6575 = vmatpush1.bf16.msra.mxu1 %v6574_v39  ;;  %v6616_v39 = vpack.c.bf16 %v5212_v37, %v5210_v36  ;;  %v2683_v36 = vld [vmem:[%s10620_s20 + $0x98] sm:$0xff] }
 0x37b   : > { %6577 = vmatprep.subr.bf16.mxu1 %v6576_v40  ;;  %v5209_v40 = vld [vmem:[%s10620_s20 + $0x380] sm:$0xff] }
 0x37c   : > { %v6618_v44 = vpack.c.bf16 %v5211_v41, %v5209_v40  ;;  %v2682_v40 = vld [vmem:[%s10620_s20 + $0x90] sm:$0xff]  ;;  %v2685_v41 = vld [vmem:[%s10620_s20 + $0xa8] sm:$0xff] }
 0x37e   : > { %6579 = vmatpush1.bf16.msra.mxu1 %v6578_v45  ;;  %v6620_v45 = vpack.c.bf16 %v5216_v43, %v5214_v42  ;;  %v2687_v42 = vld [vmem:[%s10620_s20 + $0xb8] sm:$0xff] }
 0x37f   : > { %6581 = vmatprep.subr.bf16.mxu1 %v6580_v46  ;;  %v5213_v46 = vld [vmem:[%s10620_s20 + $0x3a0] sm:$0xff] }
 0x380   : > { %v6622_v48 = vpack.c.bf16 %v5215_v47, %v5213_v46  ;;  %v2686_v46 = vld [vmem:[%s10620_s20 + $0xb0] sm:$0xff]  ;;  %v2689_v47 = vld [vmem:[%s10620_s20 + $0xc8] sm:$0xff] }
 0x382   : > { %6583 = vmatpush1.bf16.msra.mxu1 %v6582_v53  ;;  %v6624_v53 = vpack.c.bf16 %v5220_v51, %v5218_v49 }
 0x383   : > { %6585 = vmatprep.subr.bf16.mxu1 %v6584_v54  ;;  %v5217_v54 = vld [vmem:[%s10620_s20 + $0x3c0] sm:$0xff] }
 0x384   : > { %v6626_v56 = vpack.c.bf16 %v5219_v55, %v5217_v54  ;;  %v2690_v54 = vld [vmem:[%s10620_s20 + $0xd0] sm:$0xff]  ;;  %v2693_v55 = vld [vmem:[%s10620_s20 + $0xe8] sm:$0xff] }
 0x386   : > { %6587 = vmatpush1.bf16.msra.mxu1 %v6586_v59  ;;  %v6628_v59 = vpack.c.bf16 %v5224_v58, %v5222_v57 }
 0x387   : > { %6589 = vmatprep.subr.bf16.mxu1 %v6588_v60  ;;  %v5221_v60 = vld [vmem:[%s10620_s20 + $0x3e0] sm:$0xff] }
 0x388   : > { %v6630_v62 = vpack.c.bf16 %v5223_v61, %v5221_v60  ;;  %v2694_v60 = vld [vmem:[%s10620_s20 + $0xf0] sm:$0xff]  ;;  %v2697_v61 = vld [vmem:[%s10620_s20 + $0x108] sm:$0xff] }
 0x38a   : > { %6591 = vmatpush1.bf16.msra.mxu1 %v6590_v1  ;;  %v6632_v1 = vpack.c.bf16 %v2667_v0, %v2665_v63 }
 0x38b   : > { %6593 = vmatprep.subr.bf16.mxu1 %v6592_v2 }
 0x38e   : > { %6595 = vmatpush1.bf16.msra.mxu1 %v6594_v9  ;;  %v2664_v9 = vld [vmem:[%s10620_s20] sm:$0xff] }
 0x38f   : > { %6597 = vmatprep.subr.bf16.mxu1 %v6596_v10  ;;  %v2666_v10 = vld [vmem:[%s10620_s20 + $0x10] sm:$0xff] }
 0x392   : > { %6599 = vmatpush1.bf16.msra.mxu1 %v6598_v14  ;;  %v6634_v14 = vpack.c.bf16 %v2666_v10, %v2664_v9  ;;  %v2701_v9 = vld [vmem:[%s10620_s20 + $0x128] sm:$0xff]  ;;  %v2703_v10 = vld [vmem:[%s10620_s20 + $0x138] sm:$0xff] }
 0x393   : > { %6601 = vmatprep.subr.bf16.mxu1 %v6600_v15  ;;  %v6668_v3 = vpack.c.bf16 %v2703_v10, %v2701_v9  ;;  %v5236_v9 = vld [vmem:[%s10620_s20 + $0x448] sm:$0xff]  ;;  %v5238_v10 = vld [vmem:[%s10620_s20 + $0x458] sm:$0xff] }
 0x396   : > { %6603 = vmatpush1.bf16.msra.mxu1 %v6602_v20  ;;  %v2673_v20 = vld [vmem:[%s10620_s20 + $0x48] sm:$0xff] }
 0x397   : > { %6605 = vmatprep.subr.bf16.mxu1 %v6604_v21  ;;  %v2675_v21 = vld [vmem:[%s10620_s20 + $0x58] sm:$0xff] }
 0x39a   : > { %6607 = vmatpush1.bf16.msra.mxu1 %v6606_v26  ;;  %v6640_v26 = vpack.c.bf16 %v2675_v21, %v2673_v20  ;;  %v2704_v20 = vld [vmem:[%s10620_s20 + $0x140] sm:$0xff]  ;;  %v2706_v21 = vld [vmem:[%s10620_s20 + $0x150] sm:$0xff] }
 0x39b   : > { %6609 = vmatprep.subr.bf16.mxu1 %v6608_v27  ;;  %v2672_v27 = vld [vmem:[%s10620_s20 + $0x40] sm:$0xff] }
 0x39c   : > { %v6642_v31 = vpack.c.bf16 %v2674_v28, %v2672_v27  ;;  %v2708_v27 = vld [vmem:[%s10620_s20 + $0x160] sm:$0xff]  ;;  %v2710_v28 = vld [vmem:[%s10620_s20 + $0x170] sm:$0xff] }
 0x39e   : > { %6611 = vmatpush1.bf16.msra.mxu1 %v6610_v32  ;;  %v6644_v32 = vpack.c.bf16 %v2679_v30, %v2677_v29  ;;  %v2713_v29 = vld [vmem:[%s10620_s20 + $0x188] sm:$0xff]  ;;  %v2715_v30 = vld [vmem:[%s10620_s20 + $0x198] sm:$0xff] }
 0x39f   : > { %6613 = vmatprep.subr.bf16.mxu1 %v6612_v33  ;;  %v2676_v33 = vld [vmem:[%s10620_s20 + $0x60] sm:$0xff] }
 0x3a0   : > { %v6646_v37 = vpack.c.bf16 %v2678_v34, %v2676_v33  ;;  %v2712_v33 = vld [vmem:[%s10620_s20 + $0x180] sm:$0xff]  ;;  %v2714_v34 = vld [vmem:[%s10620_s20 + $0x190] sm:$0xff] }
 0x3a2   : > { %6615 = vmatpush1.bf16.msra.mxu1 %v6614_v38  ;;  %v6648_v38 = vpack.c.bf16 %v2683_v36, %v2681_v35  ;;  %v2717_v35 = vld [vmem:[%s10620_s20 + $0x1a8] sm:$0xff]  ;;  %v2719_v36 = vld [vmem:[%s10620_s20 + $0x1b8] sm:$0xff] }
 0x3a3   : > { %6617 = vmatprep.subr.bf16.mxu1 %v6616_v39  ;;  %v2680_v39 = vld [vmem:[%s10620_s20 + $0x80] sm:$0xff] }
 0x3a4   : > { %v6650_v43 = vpack.c.bf16 %v2682_v40, %v2680_v39  ;;  %v2716_v39 = vld [vmem:[%s10620_s20 + $0x1a0] sm:$0xff]  ;;  %v2718_v40 = vld [vmem:[%s10620_s20 + $0x1b0] sm:$0xff] }
 0x3a6   : > { %6619 = vmatpush1.bf16.msra.mxu1 %v6618_v44  ;;  %v6652_v44 = vpack.c.bf16 %v2687_v42, %v2685_v41  ;;  %v2721_v41 = vld [vmem:[%s10620_s20 + $0x1c8] sm:$0xff]  ;;  %v2723_v42 = vld [vmem:[%s10620_s20 + $0x1d8] sm:$0xff] }
 0x3a7   : > { %6621 = vmatprep.subr.bf16.mxu1 %v6620_v45  ;;  %v2684_v45 = vld [vmem:[%s10620_s20 + $0xa0] sm:$0xff] }
 0x3a8   : > { %v6654_v49 = vpack.c.bf16 %v2686_v46, %v2684_v45  ;;  %v2720_v45 = vld [vmem:[%s10620_s20 + $0x1c0] sm:$0xff]  ;;  %v2722_v46 = vld [vmem:[%s10620_s20 + $0x1d0] sm:$0xff] }
 0x3aa   : > { %6623 = vmatpush1.bf16.msra.mxu1 %v6622_v48  ;;  %v2691_v48 = vld [vmem:[%s10620_s20 + $0xd8] sm:$0xff] }
 0x3ab   : > { %6625 = vmatprep.subr.bf16.mxu1 %v6624_v53  ;;  %v6656_v51 = vpack.c.bf16 %v2691_v48, %v2689_v47  ;;  %v2688_v53 = vld [vmem:[%s10620_s20 + $0xc0] sm:$0xff]  ;;  %v2725_v47 = vld [vmem:[%s10620_s20 + $0x1e8] sm:$0xff]  ;;  %v2727_v48 = vld [vmem:[%s10620_s20 + $0x1f8] sm:$0xff] }
 0x3ac   : > { %v6658_v57 = vpack.c.bf16 %v2690_v54, %v2688_v53  ;;  %v2724_v53 = vld [vmem:[%s10620_s20 + $0x1e0] sm:$0xff]  ;;  %v2726_v54 = vld [vmem:[%s10620_s20 + $0x1f0] sm:$0xff] }
 0x3ae   : > { %6627 = vmatpush1.bf16.msra.mxu1 %v6626_v56  ;;  %v2695_v56 = vld [vmem:[%s10620_s20 + $0xf8] sm:$0xff] }
 0x3af   : > { %6629 = vmatprep.subr.bf16.mxu1 %v6628_v59  ;;  %v6660_v58 = vpack.c.bf16 %v2695_v56, %v2693_v55  ;;  %v2692_v59 = vld [vmem:[%s10620_s20 + $0xe0] sm:$0xff]  ;;  %v5228_v55 = vld [vmem:[%s10620_s20 + $0x408] sm:$0xff]  ;;  %v5230_v56 = vld [vmem:[%s10620_s20 + $0x418] sm:$0xff] }
 0x3b0   : > { %v6662_v63 = vpack.c.bf16 %v2694_v60, %v2692_v59  ;;  %v5227_v59 = vld [vmem:[%s10620_s20 + $0x400] sm:$0xff]  ;;  %v5229_v60 = vld [vmem:[%s10620_s20 + $0x410] sm:$0xff] }
 0x3b2   : > { %6631 = vmatpush1.bf16.msra.mxu1 %v6630_v62  ;;  %v2699_v62 = vld [vmem:[%s10620_s20 + $0x118] sm:$0xff] }
 0x3b3   : > { %6633 = vmatprep.subr.bf16.mxu1 %v6632_v1  ;;  %v6664_v0 = vpack.c.bf16 %v2699_v62, %v2697_v61  ;;  %v2696_v1 = vld [vmem:[%s10620_s20 + $0x100] sm:$0xff]  ;;  %v5232_v61 = vld [vmem:[%s10620_s20 + $0x428] sm:$0xff]  ;;  %v5234_v62 = vld [vmem:[%s10620_s20 + $0x438] sm:$0xff] }
 0x440   : > { %v8700_v2 = vpop.f32.mrb[32].mxu1  ;;  %v8704_v7 = vpop.f32.mrb[12].mxu0 }
 0x441   : > { %v2655_v4 = vpop.f32.mrb[33].mxu1  ;;  %v8714_v11 = vpop.f32.mrb[13].mxu0 }
 0x444   : > { %v8702_v6 = vpop.f32.mrb[34].mxu1  ;;  %v8722_v15 = vpop.f32.mrb[14].mxu0 }
 0x445   : > { %v8706_v8 = vpop.f32.mrb[35].mxu1  ;;  %v8736_v22 = vpop.f32.mrb[15].mxu0 }
 0x448   : > { %v2803_v5 = vpop.f32.mrb[36].mxu1 }
 0x449   : > { %v2805_v16 = vpop.f32.mrb[37].mxu1 }
 0x44a   : > { %2943 = vmatprep.mubr.f32.mxu1 %v2805_v16  ;;  %v2705_v16 = vld [vmem:[%s10620_s20 + $0x148] sm:$0xff] }
 0x44b   : > { %2944 = vmatmul.mubr.f32.vlgmr.msra.gmra.mrb[40].mxu1 %v2803_v5  ;;  %v2700_v5 = vld [vmem:[%s10620_s20 + $0x120] sm:$0xff] }
 0x44c   : > { %6635 = vmatpush1.bf16.msra.mxu1 %v6634_v14  ;;  %v2809_v23 = vpop.f32.mrb[38].mxu1  ;;  %v2702_v14 = vld [vmem:[%s10620_s20 + $0x130] sm:$0xff] }
 0x44d   : > { %v2811_v25 = vpop.f32.mrb[39].mxu1  ;;  %6637 = vmatprep.subr.bf16.mxu1 %v6636_v17  ;;  %v2707_v17 = vld [vmem:[%s10620_s20 + $0x158] sm:$0xff]  ;;  %v6670_v18 = vpack.c.bf16 %v2702_v14, %v2700_v5  ;;  %v5235_v5 = vld [vmem:[%s10620_s20 + $0x440] sm:$0xff]  ;;  %v5237_v14 = vld [vmem:[%s10620_s20 + $0x450] sm:$0xff] }
 0x44e   : > { %2949 = vmatprep.mubr.f32.mxu1 %v2811_v25  ;;  %v6672_v19 = vpack.c.bf16 %v2707_v17, %v2705_v16  ;;  %v6674_v25 = vpack.c.bf16 %v2706_v21, %v2704_v20  ;;  %v5240_v16 = vld [vmem:[%s10620_s20 + $0x468] sm:$0xff] }
 0x44f   : > { %2950 = vmatmul.mubr.f32.gmra.mrb[42].mxu1 %v2809_v23  ;;  %v2709_v23 = vld [vmem:[%s10620_s20 + $0x168] sm:$0xff] }
 0x450   : > { %6639 = vmatpush1.bf16.msra.mxu1 %v6638_v24  ;;  %3020 = vmatprep.mubr.f32.mxu1 %v2655_v4  ;;  %v2698_v4 = vld [vmem:[%s10620_s20 + $0x110] sm:$0xff]  ;;  %v2711_v24 = vld [vmem:[%s10620_s20 + $0x178] sm:$0xff]  ;;  %v5244_v20 = vld [vmem:[%s10620_s20 + $0x488] sm:$0xff] }
 0x451   : > { %6641 = vmatprep.subr.bf16.mxu1 %v6640_v26  ;;  %v6666_v12 = vpack.c.bf16 %v2698_v4, %v2696_v1  ;;  %v6676_v26 = vpack.c.bf16 %v2711_v24, %v2709_v23  ;;  %v5231_v1 = vld [vmem:[%s10620_s20 + $0x420] sm:$0xff]  ;;  %v5233_v4 = vld [vmem:[%s10620_s20 + $0x430] sm:$0xff] }
 0x452   : > { %v5243_v23 = vld [vmem:[%s10620_s20 + $0x480] sm:$0xff]  ;;  %v5245_v24 = vld [vmem:[%s10620_s20 + $0x490] sm:$0xff] }
 0x454   : > { %6643 = vmatpush1.bf16.msra.mxu1 %v6642_v31  ;;  %v6678_v31 = vpack.c.bf16 %v2710_v28, %v2708_v27  ;;  %v6722_v27 = vpack.c.bf16 %v5245_v24, %v5243_v23 }
 0x455   : > { %6645 = vmatprep.subr.bf16.mxu1 %v6644_v32  ;;  %v6680_v32 = vpack.c.bf16 %v2715_v30, %v2713_v29  ;;  %v5247_v29 = vld [vmem:[%s10620_s20 + $0x4a0] sm:$0xff]  ;;  %v5249_v30 = vld [vmem:[%s10620_s20 + $0x4b0] sm:$0xff] }
 0x458   : > { %6647 = vmatpush1.bf16.msra.mxu1 %v6646_v37  ;;  %v6682_v37 = vpack.c.bf16 %v2714_v34, %v2712_v33  ;;  %v6726_v33 = vpack.c.bf16 %v5249_v30, %v5247_v29 }
 0x459   : > { %6649 = vmatprep.subr.bf16.mxu1 %v6648_v38  ;;  %v6684_v38 = vpack.c.bf16 %v2719_v36, %v2717_v35  ;;  %v5251_v35 = vld [vmem:[%s10620_s20 + $0x4c0] sm:$0xff]  ;;  %v5253_v36 = vld [vmem:[%s10620_s20 + $0x4d0] sm:$0xff] }
 0x45c   : > { %6651 = vmatpush1.bf16.msra.mxu1 %v6650_v43  ;;  %v6686_v43 = vpack.c.bf16 %v2718_v40, %v2716_v39  ;;  %v6730_v39 = vpack.c.bf16 %v5253_v36, %v5251_v35 }
 0x45d   : > { %6653 = vmatprep.subr.bf16.mxu1 %v6652_v44  ;;  %v6688_v44 = vpack.c.bf16 %v2723_v42, %v2721_v41  ;;  %v5255_v41 = vld [vmem:[%s10620_s20 + $0x4e0] sm:$0xff]  ;;  %v5257_v42 = vld [vmem:[%s10620_s20 + $0x4f0] sm:$0xff] }
 0x460   : > { %6655 = vmatpush1.bf16.msra.mxu1 %v6654_v49  ;;  %v6690_v49 = vpack.c.bf16 %v2722_v46, %v2720_v45  ;;  %v6734_v45 = vpack.c.bf16 %v5257_v42, %v5255_v41 }
 0x461   : > { %6657 = vmatprep.subr.bf16.mxu1 %v6656_v51  ;;  %v6692_v51 = vpack.c.bf16 %v2727_v48, %v2725_v47  ;;  %v5259_v47 = vld [vmem:[%s10620_s20 + $0x500] sm:$0xff]  ;;  %v5261_v48 = vld [vmem:[%s10620_s20 + $0x510] sm:$0xff] }
 0x464   : > { %6659 = vmatpush1.bf16.msra.mxu1 %v6658_v57  ;;  %v6694_v57 = vpack.c.bf16 %v2726_v54, %v2724_v53  ;;  %v6738_v53 = vpack.c.bf16 %v5261_v48, %v5259_v47  ;;  %v5294_v48 = vld [vmem:[%s10621_s24 + $0x208] sm:$0xff] }
 0x465   : > { %6661 = vmatprep.subr.bf16.mxu1 %v6660_v58  ;;  %v6704_v58 = vpack.c.bf16 %v5230_v56, %v5228_v55  ;;  %v5263_v55 = vld [vmem:[%s10620_s20 + $0x520] sm:$0xff]  ;;  %v5265_v56 = vld [vmem:[%s10620_s20 + $0x530] sm:$0xff] }
 0x468   : > { %6663 = vmatpush1.bf16.msra.mxu1 %v6662_v63  ;;  %v6706_v63 = vpack.c.bf16 %v5229_v60, %v5227_v59  ;;  %v6742_v59 = vpack.c.bf16 %v5265_v56, %v5263_v55  ;;  %v5295_v55 = vld [vmem:[%s10621_s24 + $0x210] sm:$0xff]  ;;  %v5298_v56 = vld [vmem:[%s10621_s24 + $0x228] sm:$0xff] }
 0x469   : > { %6665 = vmatprep.subr.bf16.mxu1 %v6664_v0  ;;  %v6708_v0 = vpack.c.bf16 %v5234_v62, %v5232_v61  ;;  %v5267_v61 = vld [vmem:[%s10620_s20 + $0x540] sm:$0xff]  ;;  %v5269_v62 = vld [vmem:[%s10620_s20 + $0x550] sm:$0xff] }
 0x46c   : > { %6667 = vmatpush1.bf16.msra.mxu1 %v6666_v12  ;;  %v6710_v12 = vpack.c.bf16 %v5233_v4, %v5231_v1  ;;  %v6746_v1 = vpack.c.bf16 %v5269_v62, %v5267_v61  ;;  %v5297_v61 = vld [vmem:[%s10621_s24 + $0x220] sm:$0xff]  ;;  %v5299_v62 = vld [vmem:[%s10621_s24 + $0x230] sm:$0xff] }
 0x46d   : > { %6669 = vmatprep.subr.bf16.mxu1 %v6668_v3  ;;  %v6712_v3 = vpack.c.bf16 %v5238_v10, %v5236_v9  ;;  %v5271_v9 = vld [vmem:[%s10620_s20 + $0x560] sm:$0xff]  ;;  %v5273_v10 = vld [vmem:[%s10620_s20 + $0x570] sm:$0xff] }
 0x470   : > { %6671 = vmatpush1.bf16.msra.mxu1 %v6670_v18  ;;  %v5239_v18 = vld [vmem:[%s10620_s20 + $0x460] sm:$0xff] }
 0x471   : > { %6673 = vmatprep.subr.bf16.mxu1 %v6672_v19  ;;  %v5241_v19 = vld [vmem:[%s10620_s20 + $0x470] sm:$0xff] }
 0x474   : > { %6675 = vmatpush1.bf16.msra.mxu1 %v6674_v25  ;;  %v5248_v25 = vld [vmem:[%s10620_s20 + $0x4a8] sm:$0xff] }
 0x475   : > { %6677 = vmatprep.subr.bf16.mxu1 %v6676_v26  ;;  %v5250_v26 = vld [vmem:[%s10620_s20 + $0x4b8] sm:$0xff] }
 0x476   : > { %v6724_v28 = vpack.c.bf16 %v5250_v26, %v5248_v25  ;;  %v5283_v25 = vld [vmem:[%s10620_s20 + $0x5c0] sm:$0xff]  ;;  %v5285_v26 = vld [vmem:[%s10620_s20 + $0x5d0] sm:$0xff] }
 0x477   : > { %v6762_v29 = vpack.c.bf16 %v5285_v26, %v5283_v25  ;;  %v5313_v25 = vld [vmem:[%s10621_s24 + $0x2a0] sm:$0xff]  ;;  %v5315_v26 = vld [vmem:[%s10621_s24 + $0x2b0] sm:$0xff] }
 0x478   : > { %6679 = vmatpush1.bf16.msra.mxu1 %v6678_v31  ;;  %v5252_v31 = vld [vmem:[%s10620_s20 + $0x4c8] sm:$0xff] }
 0x479   : > { %6681 = vmatprep.subr.bf16.mxu1 %v6680_v32  ;;  %v5254_v32 = vld [vmem:[%s10620_s20 + $0x4d8] sm:$0xff] }
 0x47a   : > { %v6728_v34 = vpack.c.bf16 %v5254_v32, %v5252_v31  ;;  %v5287_v31 = vld [vmem:[%s10620_s20 + $0x5e0] sm:$0xff]  ;;  %v5289_v32 = vld [vmem:[%s10620_s20 + $0x5f0] sm:$0xff] }
 0x47c   : > { %6683 = vmatpush1.bf16.msra.mxu1 %v6682_v37  ;;  %v5256_v37 = vld [vmem:[%s10620_s20 + $0x4e8] sm:$0xff] }
 0x47d   : > { %6685 = vmatprep.subr.bf16.mxu1 %v6684_v38  ;;  %v5258_v38 = vld [vmem:[%s10620_s20 + $0x4f8] sm:$0xff] }
 0x47e   : > { %v6732_v40 = vpack.c.bf16 %v5258_v38, %v5256_v37 }
 0x480   : > { %6687 = vmatpush1.bf16.msra.mxu1 %v6686_v43  ;;  %v5260_v43 = vld [vmem:[%s10620_s20 + $0x508] sm:$0xff] }
 0x481   : > { %6689 = vmatprep.subr.bf16.mxu1 %v6688_v44  ;;  %v5262_v44 = vld [vmem:[%s10620_s20 + $0x518] sm:$0xff] }
 0x482   : > { %v6736_v46 = vpack.c.bf16 %v5262_v44, %v5260_v43 }
 0x484   : > { %6691 = vmatpush1.bf16.msra.mxu1 %v6690_v49  ;;  %v5264_v49 = vld [vmem:[%s10620_s20 + $0x528] sm:$0xff] }
 0x485   : > { %6693 = vmatprep.subr.bf16.mxu1 %v6692_v51  ;;  %v5266_v51 = vld [vmem:[%s10620_s20 + $0x538] sm:$0xff] }
 0x486   : > { %v6740_v54 = vpack.c.bf16 %v5266_v51, %v5264_v49  ;;  %v5296_v49 = vld [vmem:[%s10621_s24 + $0x218] sm:$0xff] }
 0x487   : > { %v3285_v51 = vld [vmem:[#allocation11] sm:$0xff] }
 0x488   : > { %6695 = vmatpush1.bf16.msra.mxu1 %v6694_v57  ;;  %v5268_v57 = vld [vmem:[%s10620_s20 + $0x548] sm:$0xff] }
 0x489   : > { %6705 = vmatprep.subr.bf16.mxu1 %v6704_v58  ;;  %v5270_v58 = vld [vmem:[%s10620_s20 + $0x558] sm:$0xff] }
 0x48a   : > { %v6744_v60 = vpack.c.bf16 %v5270_v58, %v5268_v57  ;;  %v5300_v57 = vld [vmem:[%s10621_s24 + $0x238] sm:$0xff] }
 0x48b   : > { %3021 = vmatmul.mubr.f32.vlgmr.msra.gmra.mrb[40].mxu1 %v8700_v2  ;;  %v5242_v2 = vld [vmem:[%s10620_s20 + $0x478] sm:$0xff] }
 0x48c   : > { %3026 = vmatprep.mubr.f32.mxu1 %v8706_v8  ;;  %6707 = vmatpush1.bf16.msra.mxu1 %v6706_v63  ;;  %v6714_v8 = vpack.c.bf16 %v5237_v14, %v5235_v5  ;;  %v6716_v17 = vpack.c.bf16 %v5242_v2, %v5240_v16  ;;  %v5272_v63 = vld [vmem:[%s10620_s20 + $0x568] sm:$0xff]  ;;  %v6750_v5 = vpack.c.bf16 %v5273_v10, %v5271_v9  ;;  %v5275_v16 = vld [vmem:[%s10620_s20 + $0x580] sm:$0xff]  ;;  %v5277_v2 = vld [vmem:[%s10620_s20 + $0x590] sm:$0xff] }
 0x48d   : > { %6709 = vmatprep.subr.bf16.mxu1 %v6708_v0  ;;  %v5274_v0 = vld [vmem:[%s10620_s20 + $0x578] sm:$0xff]  ;;  %v5301_v9 = vld [vmem:[%s10621_s24 + $0x240] sm:$0xff]  ;;  %v5303_v10 = vld [vmem:[%s10621_s24 + $0x250] sm:$0xff] }
 0x48e   : > { %v6748_v4 = vpack.c.bf16 %v5274_v0, %v5272_v63  ;;  %v3426_v58 = vld [vmem:[#allocation11 + $0x8] sm:$0xff]  ;;  %v5302_v63 = vld [vmem:[%s10621_s24 + $0x248] sm:$0xff] }
 0x48f   : > { %3027 = vmatmul.mubr.f32.gmra.mrb[42].mxu1 %v8702_v6  ;;  %v5246_v6 = vld [vmem:[%s10620_s20 + $0x498] sm:$0xff] }
 0x490   : > { %6711 = vmatpush1.bf16.msra.mxu1 %v6710_v12  ;;  %3248 = vmatprep.mubr.f32.mxu1 %v8714_v11  ;;  %v6718_v11 = vpack.c.bf16 %v5241_v19, %v5239_v18  ;;  %v6720_v21 = vpack.c.bf16 %v5246_v6, %v5244_v20  ;;  %v5276_v12 = vld [vmem:[%s10620_s20 + $0x588] sm:$0xff]  ;;  %v6754_v18 = vpack.c.bf16 %v5277_v2, %v5275_v16  ;;  %v5279_v20 = vld [vmem:[%s10620_s20 + $0x5a0] sm:$0xff]  ;;  %v5281_v6 = vld [vmem:[%s10620_s20 + $0x5b0] sm:$0xff] }
 0x491   : > { %6713 = vmatprep.subr.bf16.mxu1 %v6712_v3  ;;  %v5278_v3 = vld [vmem:[%s10620_s20 + $0x598] sm:$0xff]  ;;  %v6758_v23 = vpack.c.bf16 %v5281_v6, %v5279_v20  ;;  %v5305_v16 = vld [vmem:[%s10621_s24 + $0x260] sm:$0xff]  ;;  %v5307_v2 = vld [vmem:[%s10621_s24 + $0x270] sm:$0xff] }
 0x492   : > { %v6752_v14 = vpack.c.bf16 %v5278_v3, %v5276_v12  ;;  %v5304_v0 = vld [vmem:[%s10621_s24 + $0x258] sm:$0xff]  ;;  %v5306_v12 = vld [vmem:[%s10621_s24 + $0x268] sm:$0xff]  ;;  %v5309_v20 = vld [vmem:[%s10621_s24 + $0x280] sm:$0xff] }
 0x493   : > { %v5308_v3 = vld [vmem:[%s10621_s24 + $0x278] sm:$0xff]  ;;  %v5311_v6 = vld [vmem:[%s10621_s24 + $0x290] sm:$0xff] }
 0x494   : > { %6715 = vmatpush1.bf16.msra.mxu1 %v6714_v8  ;;  %v5280_v8 = vld [vmem:[%s10620_s20 + $0x5a8] sm:$0xff] }
 0x495   : > { %6717 = vmatprep.subr.bf16.mxu1 %v6716_v17  ;;  %v5282_v17 = vld [vmem:[%s10620_s20 + $0x5b8] sm:$0xff] }
 0x496   : > { %v6756_v19 = vpack.c.bf16 %v5282_v17, %v5280_v8  ;;  %v5310_v8 = vld [vmem:[%s10621_s24 + $0x288] sm:$0xff]  ;;  %v5312_v17 = vld [vmem:[%s10621_s24 + $0x298] sm:$0xff] }
 0x498   : > { %6719 = vmatpush1.bf16.msra.mxu1 %v6718_v11  ;;  %v5284_v11 = vld [vmem:[%s10620_s20 + $0x5c8] sm:$0xff] }
 0x499   : > { %6721 = vmatprep.subr.bf16.mxu1 %v6720_v21  ;;  %v5286_v21 = vld [vmem:[%s10620_s20 + $0x5d8] sm:$0xff] }
 0x49a   : > { %v6760_v24 = vpack.c.bf16 %v5286_v21, %v5284_v11  ;;  %v5314_v11 = vld [vmem:[%s10621_s24 + $0x2a8] sm:$0xff]  ;;  %v5316_v21 = vld [vmem:[%s10621_s24 + $0x2b8] sm:$0xff] }
 0x49c   : > { %6723 = vmatpush1.bf16.msra.mxu1 %v6722_v27  ;;  %v5288_v27 = vld [vmem:[%s10620_s20 + $0x5e8] sm:$0xff] }
 0x49d   : > { %6725 = vmatprep.subr.bf16.mxu1 %v6724_v28  ;;  %v5290_v28 = vld [vmem:[%s10620_s20 + $0x5f8] sm:$0xff] }
 0x49e   : > { %v6764_v30 = vpack.c.bf16 %v5290_v28, %v5288_v27  ;;  %v5318_v27 = vld [vmem:[%s10621_s24 + $0x2c8] sm:$0xff]  ;;  %v5320_v28 = vld [vmem:[%s10621_s24 + $0x2d8] sm:$0xff] }
 0x4a0   : > { %6727 = vmatpush1.bf16.msra.mxu1 %v6726_v33  ;;  %v6766_v33 = vpack.c.bf16 %v5289_v32, %v5287_v31  ;;  %v5317_v31 = vld [vmem:[%s10621_s24 + $0x2c0] sm:$0xff]  ;;  %v5319_v32 = vld [vmem:[%s10621_s24 + $0x2d0] sm:$0xff] }
 0x4a1   : > { %6729 = vmatprep.subr.bf16.mxu1 %v6728_v34  ;;  %v3265_v34 = vld [vmem:[#allocation10] sm:$0x3] }
 0x4a2   : > { %v3270_v35 = vrot.slane %v3265_v34, %v8485_v50  ;;  %v3274_v37 = vrot.slane %v3265_v34, %v8487_v52  ;;  %v5324_v34 = vld [vmem:[%s10621_s24 + $0x2f8] sm:$0xff] }
 0x4a4   : > { %6731 = vmatpush1.bf16.msra.mxu1 %v6730_v39 }
 0x4a5   : > { %6733 = vmatprep.subr.bf16.mxu1 %v6732_v40 }
 0x4a8   : > { %6735 = vmatpush1.bf16.msra.mxu1 %v6734_v45 }
 0x4a9   : > { %6737 = vmatprep.subr.bf16.mxu1 %v6736_v46 }
 0x4ac   : > { %6739 = vmatpush1.bf16.msra.mxu1 %v6738_v53  ;;  %v6776_v53 = vpack.c.bf16 %v5296_v49, %v5294_v48  ;;  %v5329_v48 = vld [vmem:[%s10621_s24 + $0x320] sm:$0xff]  ;;  %v5331_v49 = vld [vmem:[%s10621_s24 + $0x330] sm:$0xff] }
 0x4ad   : > { %6741 = vmatprep.subr.bf16.mxu1 %v6740_v54  ;;  %v5293_v54 = vld [vmem:[%s10621_s24 + $0x200] sm:$0xff] }
 0x4b0   : > { %6743 = vmatpush1.bf16.msra.mxu1 %v6742_v59  ;;  %v6778_v59 = vpack.c.bf16 %v5295_v55, %v5293_v54  ;;  %v6814_v54 = vpack.c.bf16 %v5331_v49, %v5329_v48  ;;  %v3371_v48 = vld [vmem:[%s10621_s24 + $0x50] sm:$0xff]  ;;  %v3374_v49 = vld [vmem:[%s10621_s24 + $0x68] sm:$0xff] }
 0x4b1   : > { %6745 = vmatprep.subr.bf16.mxu1 %v6744_v60  ;;  %v6780_v60 = vpack.c.bf16 %v5300_v57, %v5298_v56  ;;  %v5333_v56 = vld [vmem:[%s10621_s24 + $0x340] sm:$0xff]  ;;  %v5335_v57 = vld [vmem:[%s10621_s24 + $0x350] sm:$0xff] }
 0x4b4   : > { %6747 = vmatpush1.bf16.msra.mxu1 %v6746_v1  ;;  %v6782_v1 = vpack.c.bf16 %v5299_v62, %v5297_v61  ;;  %v5337_v62 = vld [vmem:[%s10621_s24 + $0x360] sm:$0xff] }
 0x4b5   : > { %6749 = vmatprep.subr.bf16.mxu1 %v6748_v4  ;;  %v6784_v4 = vpack.c.bf16 %v5304_v0, %v5302_v63  ;;  %v5339_v63 = vld [vmem:[%s10621_s24 + $0x370] sm:$0xff]  ;;  %v5342_v0 = vld [vmem:[%s10621_s24 + $0x388] sm:$0xff] }
 0x4b8   : > { %6751 = vmatpush1.bf16.msra.mxu1 %v6750_v5  ;;  %v6786_v5 = vpack.c.bf16 %v5303_v10, %v5301_v9  ;;  %v5341_v10 = vld [vmem:[%s10621_s24 + $0x380] sm:$0xff] }
 0x4b9   : > { %6753 = vmatprep.subr.bf16.mxu1 %v6752_v14  ;;  %v6788_v14 = vpack.c.bf16 %v5308_v3, %v5306_v12  ;;  %v5343_v12 = vld [vmem:[%s10621_s24 + $0x390] sm:$0xff]  ;;  %v5346_v3 = vld [vmem:[%s10621_s24 + $0x3a8] sm:$0xff] }
 0x4bc   : > { %6755 = vmatpush1.bf16.msra.mxu1 %v6754_v18  ;;  %v6790_v18 = vpack.c.bf16 %v5307_v2, %v5305_v16  ;;  %v5345_v2 = vld [vmem:[%s10621_s24 + $0x3a0] sm:$0xff] }
 0x4bd   : > { %6757 = vmatprep.subr.bf16.mxu1 %v6756_v19  ;;  %v6792_v19 = vpack.c.bf16 %v5312_v17, %v5310_v8  ;;  %v5347_v8 = vld [vmem:[%s10621_s24 + $0x3b0] sm:$0xff]  ;;  %v5350_v17 = vld [vmem:[%s10621_s24 + $0x3c8] sm:$0xff] }
 0x4c0   : > { %6759 = vmatpush1.bf16.msra.mxu1 %v6758_v23  ;;  %v6794_v23 = vpack.c.bf16 %v5311_v6, %v5309_v20  ;;  %v5349_v6 = vld [vmem:[%s10621_s24 + $0x3c0] sm:$0xff] }
 0x4c1   : > { %6761 = vmatprep.subr.bf16.mxu1 %v6760_v24  ;;  %v6796_v24 = vpack.c.bf16 %v5316_v21, %v5314_v11  ;;  %v5351_v11 = vld [vmem:[%s10621_s24 + $0x3d0] sm:$0xff] }
 0x4c2   : > { %v6834_v21 = vpack.c.bf16 %v5351_v11, %v5349_v6  ;;  %v3391_v6 = vld [vmem:[%s10621_s24 + $0xf0] sm:$0xff]  ;;  %v3394_v11 = vld [vmem:[%s10621_s24 + $0x108] sm:$0xff] }
 0x4c4   : > { %6763 = vmatpush1.bf16.msra.mxu1 %v6762_v29  ;;  %v6798_v29 = vpack.c.bf16 %v5315_v26, %v5313_v25  ;;  %v5353_v26 = vld [vmem:[%s10621_s24 + $0x3e0] sm:$0xff] }
 0x4c5   : > { %6765 = vmatprep.subr.bf16.mxu1 %v6764_v30  ;;  %v6800_v30 = vpack.c.bf16 %v5320_v28, %v5318_v27  ;;  %v5355_v27 = vld [vmem:[%s10621_s24 + $0x3f0] sm:$0xff] }
 0x4c6   : > { %v6838_v28 = vpack.c.bf16 %v5355_v27, %v5353_v26  ;;  %v3395_v26 = vld [vmem:[%s10621_s24 + $0x110] sm:$0xff]  ;;  %v3398_v27 = vld [vmem:[%s10621_s24 + $0x128] sm:$0xff] }
 0x4c8   : > { %6767 = vmatpush1.bf16.msra.mxu1 %v6766_v33  ;;  %v5322_v33 = vld [vmem:[%s10621_s24 + $0x2e8] sm:$0xff] }
 0x4cb   : > { %3249 = vmatmul.mubr.f32.vlgmr.msra.gmra.mrb[40].mxu1 %v8704_v7 }
 0x4cc   : > { %3254 = vmatprep.mubr.f32.mxu1 %v8736_v22 }
 0x4cf   : > { %3255 = vmatmul.mubr.f32.gmra.mrb[42].mxu1 %v8722_v15 }
 0x59e   : > { %v3250_v36 = vpop.f32.mrb[40].mxu1 }
 0x59f   : > { %v3252_v38 = vpop.f32.mrb[41].mxu1  ;;  %v3277_v39 = vadd.f32 %v3270_v35, %v3250_v36  ;;  %v6804_v36 = vpack.c.bf16 %v5324_v34, %v5322_v33  ;;  %v3361_v34 = vld [vmem:[%s10621_s24] sm:$0xff] }
 0x5a0   : > { %v3278_v40 = vadd.f32 %v3274_v37, %v3252_v38  ;;  %v5323_v38 = vld [vmem:[%s10621_s24 + $0x2f0] sm:$0xff] }
 0x5a1   : > { %v3281_v45 = vmax.f32 %v3277_v39, 0.0  ;;  %v5326_v39 = vld [vmem:[%s10621_s24 + $0x308] sm:$0xff] }
 0x5a2   : > { %v3256_v41 = vpop.f32.mrb[42].mxu1  ;;  %v3282_v7 = vmax.f32 %v3278_v40, 0.0  ;;  %v5328_v40 = vld [vmem:[%s10621_s24 + $0x318] sm:$0xff] }
 0x5a3   : > { %v3279_v42 = vadd.f32 %v3270_v35, %v3256_v41  ;;  %v3258_v43 = vpop.f32.mrb[43].mxu1  ;;  %v6802_v35 = vpack.c.bf16 %v5319_v32, %v5317_v31 }
 0x5a4   : > { %v3280_v44 = vadd.f32 %v3274_v37, %v3258_v43  ;;  %v5321_v37 = vld [vmem:[%s10621_s24 + $0x2e0] sm:$0xff] }
 0x5a5   : > { %v3283_v46 = vmax.f32 %v3279_v42, 0.0  ;;  %v6806_v41 = vpack.c.bf16 %v5323_v38, %v5321_v37  ;;  %v6808_v42 = vpack.c.bf16 %v5328_v40, %v5326_v39  ;;  %v5325_v43 = vld [vmem:[%s10621_s24 + $0x300] sm:$0xff]  ;;  %v3368_v37 = vld [vmem:[%s10621_s24 + $0x38] sm:$0xff] }
 0x5a6   : > { %v3284_v47 = vmax.f32 %v3280_v44, 0.0  ;;  %v5327_v44 = vld [vmem:[%s10621_s24 + $0x310] sm:$0xff] }
 0x5a7   : > { %v9101_v22 = vpack.c.bf16 %v3283_v46, %v3281_v45  ;;  %v5330_v45 = vld [vmem:[%s10621_s24 + $0x328] sm:$0xff]  ;;  %v5332_v46 = vld [vmem:[%s10621_s24 + $0x338] sm:$0xff] }
 0x5a8   : > { %v9103_v15 = vpack.c.bf16 %v3284_v47, %v3282_v7  ;;  %v6810_v7 = vpack.c.bf16 %v5327_v44, %v5325_v43  ;;  %v6812_v47 = vpack.c.bf16 %v5332_v46, %v5330_v45  ;;  %v3367_v43 = vld [vmem:[%s10621_s24 + $0x30] sm:$0xff]  ;;  %v3370_v44 = vld [vmem:[%s10621_s24 + $0x48] sm:$0xff]  ;;  %v3372_v45 = vld [vmem:[%s10621_s24 + $0x58] sm:$0xff] }
 0x5aa   : > { %6769 = vmatprep.subr.bf16.mxu0 %v9103_v15 }
 0x5ab   : > { %6771 = vmatpush1.bf16.msra.mxu0 %v9101_v22 }
 0x5ac   : > { %6773 = vmatprep.subr.bf16.mxu0 %v9103_v15 }
 0x5ae   : > { %5291 = vmatmul.mubr.msk.f32.vlgmr.msra.gmra.mrb[16].mxu0 %vm3286_vm2, %v3285_v51  ;;  %v5334_v51 = vld [vmem:[%s10621_s24 + $0x348] sm:$0xff] }
 0x5af   : > { %6775 = vmatpush1.bf16.msra.mxu0 %v9101_v22  ;;  %3494 = vmatprep.mubr.f32.mxu0 %v7804_v13 }
 0x5b0   : > { %6777 = vmatprep.subr.bf16.mxu0 %v6776_v53  ;;  %v5336_v53 = vld [vmem:[%s10621_s24 + $0x358] sm:$0xff] }
 0x5b1   : > { %v6816_v55 = vpack.c.bf16 %v5336_v53, %v5334_v51  ;;  %v3376_v51 = vld [vmem:[%s10621_s24 + $0x78] sm:$0xff] }
 0x5b2   : > { %5292 = vmatmul.mubr.msk.f32.vlgmr.msra.gmra.mrb[18].mxu0 %vm3286_vm2, %v3426_v58  ;;  %v5338_v58 = vld [vmem:[%s10621_s24 + $0x368] sm:$0xff] }
 0x5b3   : > { %6779 = vmatpush1.bf16.msra.mxu0 %v6778_v59  ;;  %v5340_v59 = vld [vmem:[%s10621_s24 + $0x378] sm:$0xff] }
 0x5b4   : > { %6781 = vmatprep.subr.bf16.mxu0 %v6780_v60  ;;  %v6818_v60 = vpack.c.bf16 %v5335_v57, %v5333_v56  ;;  %v6820_v61 = vpack.c.bf16 %v5340_v59, %v5338_v58  ;;  %v3375_v56 = vld [vmem:[%s10621_s24 + $0x70] sm:$0xff]  ;;  %v3378_v57 = vld [vmem:[%s10621_s24 + $0x88] sm:$0xff]  ;;  %v3380_v58 = vld [vmem:[%s10621_s24 + $0x98] sm:$0xff] }
 0x5b7   : > { %6783 = vmatpush1.bf16.msra.mxu0 %v6782_v1  ;;  %v5344_v1 = vld [vmem:[%s10621_s24 + $0x398] sm:$0xff] }
 0x5b8   : > { %6785 = vmatprep.subr.bf16.mxu0 %v6784_v4  ;;  %v6822_v4 = vpack.c.bf16 %v5339_v63, %v5337_v62  ;;  %v6824_v9 = vpack.c.bf16 %v5344_v1, %v5342_v0  ;;  %v3379_v62 = vld [vmem:[%s10621_s24 + $0x90] sm:$0xff]  ;;  %v3382_v63 = vld [vmem:[%s10621_s24 + $0xa8] sm:$0xff]  ;;  %v3384_v0 = vld [vmem:[%s10621_s24 + $0xb8] sm:$0xff] }
 0x5bb   : > { %6787 = vmatpush1.bf16.msra.mxu0 %v6786_v5  ;;  %v5348_v5 = vld [vmem:[%s10621_s24 + $0x3b8] sm:$0xff] }
 0x5bc   : > { %6789 = vmatprep.subr.bf16.mxu0 %v6788_v14  ;;  %v6826_v14 = vpack.c.bf16 %v5343_v12, %v5341_v10  ;;  %v6828_v16 = vpack.c.bf16 %v5348_v5, %v5346_v3  ;;  %v3383_v10 = vld [vmem:[%s10621_s24 + $0xb0] sm:$0xff]  ;;  %v3386_v12 = vld [vmem:[%s10621_s24 + $0xc8] sm:$0xff]  ;;  %v3388_v3 = vld [vmem:[%s10621_s24 + $0xd8] sm:$0xff] }
 0x5bf   : > { %6791 = vmatpush1.bf16.msra.mxu0 %v6790_v18  ;;  %v5352_v18 = vld [vmem:[%s10621_s24 + $0x3d8] sm:$0xff] }
 0x5c0   : > { %6793 = vmatprep.subr.bf16.mxu0 %v6792_v19  ;;  %v6830_v19 = vpack.c.bf16 %v5347_v8, %v5345_v2  ;;  %v6832_v20 = vpack.c.bf16 %v5352_v18, %v5350_v17  ;;  %v3387_v2 = vld [vmem:[%s10621_s24 + $0xd0] sm:$0xff]  ;;  %v3390_v8 = vld [vmem:[%s10621_s24 + $0xe8] sm:$0xff]  ;;  %v3392_v17 = vld [vmem:[%s10621_s24 + $0xf8] sm:$0xff] }
 0x5c3   : > { %6795 = vmatpush1.bf16.msra.mxu0 %v6794_v23  ;;  %v5354_v23 = vld [vmem:[%s10621_s24 + $0x3e8] sm:$0xff] }
 0x5c4   : > { %6797 = vmatprep.subr.bf16.mxu0 %v6796_v24  ;;  %v5356_v24 = vld [vmem:[%s10621_s24 + $0x3f8] sm:$0xff] }
 0x5c5   : > { %v6836_v25 = vpack.c.bf16 %v5356_v24, %v5354_v23 }
 0x5c7   : > { %6799 = vmatpush1.bf16.msra.mxu0 %v6798_v29  ;;  %v3362_v29 = vld [vmem:[%s10621_s24 + $0x8] sm:$0xff] }
 0x5c8   : > { %6801 = vmatprep.subr.bf16.mxu0 %v6800_v30  ;;  %v3364_v30 = vld [vmem:[%s10621_s24 + $0x18] sm:$0xff] }
 0x5c9   : > { %v6840_v31 = vpack.c.bf16 %v3364_v30, %v3362_v29 }
 0x5cb   : > { %6803 = vmatpush1.bf16.msra.mxu0 %v6802_v35  ;;  %v3363_v35 = vld [vmem:[%s10621_s24 + $0x10] sm:$0xff] }
 0x5cc   : > { %6805 = vmatprep.subr.bf16.mxu0 %v6804_v36  ;;  %v3366_v36 = vld [vmem:[%s10621_s24 + $0x28] sm:$0xff]  ;;  %v6842_v39 = vpack.c.bf16 %v3363_v35, %v3361_v34  ;;  %v3404_v35 = vld [vmem:[%s10621_s24 + $0x158] sm:$0xff] }
 0x5cd   : > { %v3402_v34 = vld [vmem:[%s10621_s24 + $0x148] sm:$0xff] }
 0x5cf   : > { %6807 = vmatpush1.bf16.msra.mxu0 %v6806_v41  ;;  %v6844_v41 = vpack.c.bf16 %v3368_v37, %v3366_v36  ;;  %v6880_v37 = vpack.c.bf16 %v3404_v35, %v3402_v34  ;;  %v5375_v34 = vld [vmem:[%s10621_s24 + $0x488] sm:$0xff]  ;;  %v5377_v35 = vld [vmem:[%s10621_s24 + $0x498] sm:$0xff] }
 0x5d0   : > { %6809 = vmatprep.subr.bf16.mxu0 %v6808_v42  ;;  %v3365_v42 = vld [vmem:[%s10621_s24 + $0x20] sm:$0xff] }
 0x5d1   : > { %v6846_v46 = vpack.c.bf16 %v3367_v43, %v3365_v42 }
 0x5d3   : > { %6811 = vmatpush1.bf16.msra.mxu0 %v6810_v7  ;;  %v6848_v7 = vpack.c.bf16 %v3372_v45, %v3370_v44  ;;  %v3405_v44 = vld [vmem:[%s10621_s24 + $0x160] sm:$0xff]  ;;  %v3407_v45 = vld [vmem:[%s10621_s24 + $0x170] sm:$0xff] }
 0x5d4   : > { %6813 = vmatprep.subr.bf16.mxu0 %v6812_v47  ;;  %v3369_v47 = vld [vmem:[%s10621_s24 + $0x40] sm:$0xff] }
 0x5d5   : > { %v6850_v53 = vpack.c.bf16 %v3371_v48, %v3369_v47  ;;  %v6886_v47 = vpack.c.bf16 %v3407_v45, %v3405_v44  ;;  %v5378_v44 = vld [vmem:[%s10621_s24 + $0x4a0] sm:$0xff]  ;;  %v5380_v45 = vld [vmem:[%s10621_s24 + $0x4b0] sm:$0xff] }
 0x5d7   : > { %6815 = vmatpush1.bf16.msra.mxu0 %v6814_v54  ;;  %v6852_v54 = vpack.c.bf16 %v3376_v51, %v3374_v49  ;;  %v3409_v49 = vld [vmem:[%s10621_s24 + $0x180] sm:$0xff]  ;;  %v3411_v51 = vld [vmem:[%s10621_s24 + $0x190] sm:$0xff] }
 0x5d8   : > { %6817 = vmatprep.subr.bf16.mxu0 %v6816_v55  ;;  %v3373_v55 = vld [vmem:[%s10621_s24 + $0x60] sm:$0xff] }
 0x5d9   : > { %v6854_v59 = vpack.c.bf16 %v3375_v56, %v3373_v55  ;;  %v6890_v55 = vpack.c.bf16 %v3411_v51, %v3409_v49  ;;  %v5382_v49 = vld [vmem:[%s10621_s24 + $0x4c0] sm:$0xff]  ;;  %v5384_v51 = vld [vmem:[%s10621_s24 + $0x4d0] sm:$0xff] }
 0x5db   : > { %6819 = vmatpush1.bf16.msra.mxu0 %v6818_v60  ;;  %v6856_v60 = vpack.c.bf16 %v3380_v58, %v3378_v57  ;;  %v3413_v57 = vld [vmem:[%s10621_s24 + $0x1a0] sm:$0xff]  ;;  %v3415_v58 = vld [vmem:[%s10621_s24 + $0x1b0] sm:$0xff] }
 0x5dc   : > { %6821 = vmatprep.subr.bf16.mxu0 %v6820_v61  ;;  %v3377_v61 = vld [vmem:[%s10621_s24 + $0x80] sm:$0xff] }
 0x5dd   : > { %v6858_v1 = vpack.c.bf16 %v3379_v62, %v3377_v61  ;;  %v6894_v61 = vpack.c.bf16 %v3415_v58, %v3413_v57  ;;  %v5386_v57 = vld [vmem:[%s10621_s24 + $0x4e0] sm:$0xff]  ;;  %v5388_v58 = vld [vmem:[%s10621_s24 + $0x4f0] sm:$0xff] }
 0x5df   : > { %6823 = vmatpush1.bf16.msra.mxu0 %v6822_v4  ;;  %v6860_v4 = vpack.c.bf16 %v3384_v0, %v3382_v63  ;;  %v3417_v63 = vld [vmem:[%s10621_s24 + $0x1c0] sm:$0xff]  ;;  %v3419_v0 = vld [vmem:[%s10621_s24 + $0x1d0] sm:$0xff] }
 0x5e0   : > { %6825 = vmatprep.subr.bf16.mxu0 %v6824_v9  ;;  %v3381_v9 = vld [vmem:[%s10621_s24 + $0xa0] sm:$0xff] }
 0x5e1   : > { %v6862_v5 = vpack.c.bf16 %v3383_v10, %v3381_v9  ;;  %v6898_v9 = vpack.c.bf16 %v3419_v0, %v3417_v63  ;;  %v5390_v63 = vld [vmem:[%s10621_s24 + $0x500] sm:$0xff]  ;;  %v5392_v0 = vld [vmem:[%s10621_s24 + $0x510] sm:$0xff] }
 0x5e3   : > { %6827 = vmatpush1.bf16.msra.mxu0 %v6826_v14  ;;  %v6864_v14 = vpack.c.bf16 %v3388_v3, %v3386_v12  ;;  %v3421_v12 = vld [vmem:[%s10621_s24 + $0x1e0] sm:$0xff]  ;;  %v3423_v3 = vld [vmem:[%s10621_s24 + $0x1f0] sm:$0xff] }
 0x5e4   : > { %6829 = vmatprep.subr.bf16.mxu0 %v6828_v16  ;;  %v3385_v16 = vld [vmem:[%s10621_s24 + $0xc0] sm:$0xff] }
 0x5e5   : > { %v6866_v18 = vpack.c.bf16 %v3387_v2, %v3385_v16  ;;  %v5361_v16 = vld [vmem:[%s10621_s24 + $0x418] sm:$0xff] }
 0x5e7   : > { %6831 = vmatpush1.bf16.msra.mxu0 %v6830_v19  ;;  %v6868_v19 = vpack.c.bf16 %v3392_v17, %v3390_v8  ;;  %v5358_v8 = vld [vmem:[%s10621_s24 + $0x400] sm:$0xff]  ;;  %v5360_v17 = vld [vmem:[%s10621_s24 + $0x410] sm:$0xff] }
 0x5e8   : > { %6833 = vmatprep.subr.bf16.mxu0 %v6832_v20  ;;  %v3389_v20 = vld [vmem:[%s10621_s24 + $0xe0] sm:$0xff] }
 0x5e9   : > { %v6870_v23 = vpack.c.bf16 %v3391_v6, %v3389_v20  ;;  %v6910_v20 = vpack.c.bf16 %v5360_v17, %v5358_v8  ;;  %v5398_v8 = vld [vmem:[%s10621_s24 + $0x540] sm:$0xff]  ;;  %v5400_v17 = vld [vmem:[%s10621_s24 + $0x550] sm:$0xff] }
 0x5eb   : > { %6835 = vmatpush1.bf16.msra.mxu0 %v6834_v21  ;;  %v3396_v21 = vld [vmem:[%s10621_s24 + $0x118] sm:$0xff] }
 0x5ec   : > { %6837 = vmatprep.subr.bf16.mxu0 %v6836_v25  ;;  %v6872_v24 = vpack.c.bf16 %v3396_v21, %v3394_v11  ;;  %v3393_v25 = vld [vmem:[%s10621_s24 + $0x100] sm:$0xff]  ;;  %v5364_v21 = vld [vmem:[%s10621_s24 + $0x430] sm:$0xff] }
 0x5ed   : > { %v6874_v29 = vpack.c.bf16 %v3395_v26, %v3393_v25  ;;  %v5362_v11 = vld [vmem:[%s10621_s24 + $0x420] sm:$0xff]  ;;  %v5368_v26 = vld [vmem:[%s10621_s24 + $0x450] sm:$0xff] }
 0x5ee   : > { %v5366_v25 = vld [vmem:[%s10621_s24 + $0x440] sm:$0xff] }
 0x5ef   : > { %6839 = vmatpush1.bf16.msra.mxu0 %v6838_v28  ;;  %v3400_v28 = vld [vmem:[%s10621_s24 + $0x138] sm:$0xff] }
 0x5f0   : > { %6841 = vmatprep.subr.bf16.mxu0 %v6840_v31  ;;  %v6876_v30 = vpack.c.bf16 %v3400_v28, %v3398_v27  ;;  %v3397_v31 = vld [vmem:[%s10621_s24 + $0x120] sm:$0xff]  ;;  %v5371_v27 = vld [vmem:[%s10621_s24 + $0x468] sm:$0xff]  ;;  %v5373_v28 = vld [vmem:[%s10621_s24 + $0x478] sm:$0xff] }
 0x681   : > { %v9310_v32 = vpop.f32.mrb[16].mxu0 }
 0x682   : > { %v3358_v33 = vpop.f32.mrb[17].mxu0 }
 0x685   : > { %v3496_v38 = vpop.f32.mrb[18].mxu0 }
 0x686   : > { %v3498_v40 = vpop.f32.mrb[19].mxu0 }
 0x687   : > { %3630 = vmatprep.mubr.f32.mxu0 %v3498_v40  ;;  %v3406_v40 = vld [vmem:[%s10621_s24 + $0x168] sm:$0xff] }
 0x688   : > { %3631 = vmatmul.mubr.f32.vlgmr.msra.gmra.mrb[20].mxu0 %v3496_v38  ;;  %v3401_v38 = vld [vmem:[%s10621_s24 + $0x140] sm:$0xff] }
 0x689   : > { %6843 = vmatpush1.bf16.msra.mxu0 %v6842_v39  ;;  %3701 = vmatprep.mubr.f32.mxu0 %v3358_v33  ;;  %v3399_v33 = vld [vmem:[%s10621_s24 + $0x130] sm:$0xff] }
 0x68a   : > { %6845 = vmatprep.subr.bf16.mxu0 %v6844_v41  ;;  %v6878_v36 = vpack.c.bf16 %v3399_v33, %v3397_v31  ;;  %v3403_v39 = vld [vmem:[%s10621_s24 + $0x150] sm:$0xff]  ;;  %v3408_v41 = vld [vmem:[%s10621_s24 + $0x178] sm:$0xff]  ;;  %v5370_v31 = vld [vmem:[%s10621_s24 + $0x460] sm:$0xff] }
 0x68b   : > { %v6882_v42 = vpack.c.bf16 %v3403_v39, %v3401_v38  ;;  %v6884_v43 = vpack.c.bf16 %v3408_v41, %v3406_v40  ;;  %v5372_v33 = vld [vmem:[%s10621_s24 + $0x470] sm:$0xff]  ;;  %v5374_v38 = vld [vmem:[%s10621_s24 + $0x480] sm:$0xff]  ;;  %v5379_v40 = vld [vmem:[%s10621_s24 + $0x4a8] sm:$0xff] }
 0x68c   : > { %v5376_v39 = vld [vmem:[%s10621_s24 + $0x490] sm:$0xff]  ;;  %v5381_v41 = vld [vmem:[%s10621_s24 + $0x4b8] sm:$0xff] }
 0x68d   : > { %6847 = vmatpush1.bf16.msra.mxu0 %v6846_v46  ;;  %v3410_v46 = vld [vmem:[%s10621_s24 + $0x188] sm:$0xff] }
 0x68e   : > { %6849 = vmatprep.subr.bf16.mxu0 %v6848_v7  ;;  %v3412_v7 = vld [vmem:[%s10621_s24 + $0x198] sm:$0xff] }
 0x68f   : > { %v6888_v48 = vpack.c.bf16 %v3412_v7, %v3410_v46  ;;  %v5383_v46 = vld [vmem:[%s10621_s24 + $0x4c8] sm:$0xff]  ;;  %v5385_v7 = vld [vmem:[%s10621_s24 + $0x4d8] sm:$0xff] }
 0x691   : > { %6851 = vmatpush1.bf16.msra.mxu0 %v6850_v53  ;;  %v3414_v53 = vld [vmem:[%s10621_s24 + $0x1a8] sm:$0xff] }
 0x692   : > { %6853 = vmatprep.subr.bf16.mxu0 %v6852_v54  ;;  %v3416_v54 = vld [vmem:[%s10621_s24 + $0x1b8] sm:$0xff] }
 0x693   : > { %v6892_v56 = vpack.c.bf16 %v3416_v54, %v3414_v53  ;;  %v5387_v53 = vld [vmem:[%s10621_s24 + $0x4e8] sm:$0xff]  ;;  %v5389_v54 = vld [vmem:[%s10621_s24 + $0x4f8] sm:$0xff] }
 0x695   : > { %6855 = vmatpush1.bf16.msra.mxu0 %v6854_v59  ;;  %v3418_v59 = vld [vmem:[%s10621_s24 + $0x1c8] sm:$0xff] }
 0x696   : > { %6857 = vmatprep.subr.bf16.mxu0 %v6856_v60  ;;  %v3420_v60 = vld [vmem:[%s10621_s24 + $0x1d8] sm:$0xff] }
 0x697   : > { %v6896_v62 = vpack.c.bf16 %v3420_v60, %v3418_v59  ;;  %v5391_v59 = vld [vmem:[%s10621_s24 + $0x508] sm:$0xff]  ;;  %v5393_v60 = vld [vmem:[%s10621_s24 + $0x518] sm:$0xff] }
 0x699   : > { %6859 = vmatpush1.bf16.msra.mxu0 %v6858_v1  ;;  %v3422_v1 = vld [vmem:[%s10621_s24 + $0x1e8] sm:$0xff] }
 0x69a   : > { %6861 = vmatprep.subr.bf16.mxu0 %v6860_v4  ;;  %v3424_v4 = vld [vmem:[%s10621_s24 + $0x1f8] sm:$0xff] }
 0x69b   : > { %v6900_v10 = vpack.c.bf16 %v3424_v4, %v3422_v1  ;;  %v5395_v1 = vld [vmem:[%s10621_s24 + $0x528] sm:$0xff]  ;;  %v5397_v4 = vld [vmem:[%s10621_s24 + $0x538] sm:$0xff] }
 0x69d   : > { %6863 = vmatpush1.bf16.msra.mxu0 %v6862_v5  ;;  %v6902_v5 = vpack.c.bf16 %v3423_v3, %v3421_v12  ;;  %v5394_v12 = vld [vmem:[%s10621_s24 + $0x520] sm:$0xff]  ;;  %v5396_v3 = vld [vmem:[%s10621_s24 + $0x530] sm:$0xff] }
 0x69e   : > { %6865 = vmatprep.subr.bf16.mxu0 %v6864_v14  ;;  %v5359_v14 = vld [vmem:[%s10621_s24 + $0x408] sm:$0xff] }
 0x69f   : > { %v6908_v2 = vpack.c.bf16 %v5361_v16, %v5359_v14  ;;  %v5401_v14 = vld [vmem:[%s10621_s24 + $0x558] sm:$0xff]  ;;  %v6946_v16 = vpack.c.bf16 %v5396_v3, %v5394_v12  ;;  %v3945_v3 = vld [vmem:[%s10622_s10 + $0x30] sm:$0xff] }
 0x6a0   : > { %v3962_v12 = vld [vmem:[%s10622_s10 + $0xb8] sm:$0xff] }
 0x6a1   : > { %6867 = vmatpush1.bf16.msra.mxu0 %v6866_v18  ;;  %v5363_v18 = vld [vmem:[%s10621_s24 + $0x428] sm:$0xff] }
 0x6a2   : > { %6869 = vmatprep.subr.bf16.mxu0 %v6868_v19  ;;  %v5365_v19 = vld [vmem:[%s10621_s24 + $0x438] sm:$0xff] }
 0x6a3   : > { %v6912_v6 = vpack.c.bf16 %v5365_v19, %v5363_v18  ;;  %v5403_v18 = vld [vmem:[%s10621_s24 + $0x568] sm:$0xff]  ;;  %v5405_v19 = vld [vmem:[%s10621_s24 + $0x578] sm:$0xff] }
 0x6a5   : > { %6871 = vmatpush1.bf16.msra.mxu0 %v6870_v23  ;;  %v6914_v23 = vpack.c.bf16 %v5364_v21, %v5362_v11  ;;  %v5404_v11 = vld [vmem:[%s10621_s24 + $0x570] sm:$0xff]  ;;  %v5407_v21 = vld [vmem:[%s10621_s24 + $0x588] sm:$0xff] }
 0x6a6   : > { %6873 = vmatprep.subr.bf16.mxu0 %v6872_v24 }
 0x6a9   : > { %6875 = vmatpush1.bf16.msra.mxu0 %v6874_v29  ;;  %v6918_v29 = vpack.c.bf16 %v5368_v26, %v5366_v25  ;;  %v5408_v25 = vld [vmem:[%s10621_s24 + $0x590] sm:$0xff]  ;;  %v5411_v26 = vld [vmem:[%s10621_s24 + $0x5a8] sm:$0xff] }
 0x6aa   : > { %6877 = vmatprep.subr.bf16.mxu0 %v6876_v30  ;;  %v6920_v30 = vpack.c.bf16 %v5373_v28, %v5371_v27  ;;  %v5413_v27 = vld [vmem:[%s10621_s24 + $0x5b8] sm:$0xff] }
 0x6ad   : > { %6879 = vmatpush1.bf16.msra.mxu0 %v6878_v36  ;;  %v6922_v36 = vpack.c.bf16 %v5372_v33, %v5370_v31  ;;  %v5412_v31 = vld [vmem:[%s10621_s24 + $0x5b0] sm:$0xff]  ;;  %v5415_v33 = vld [vmem:[%s10621_s24 + $0x5c8] sm:$0xff] }
 0x6ae   : > { %6881 = vmatprep.subr.bf16.mxu0 %v6880_v37  ;;  %v6924_v37 = vpack.c.bf16 %v5377_v35, %v5375_v34  ;;  %v5417_v34 = vld [vmem:[%s10621_s24 + $0x5d8] sm:$0xff] }
 0x6b1   : > { %6883 = vmatpush1.bf16.msra.mxu0 %v6882_v42  ;;  %v6926_v42 = vpack.c.bf16 %v5376_v39, %v5374_v38  ;;  %v5416_v38 = vld [vmem:[%s10621_s24 + $0x5d0] sm:$0xff]  ;;  %v5419_v39 = vld [vmem:[%s10621_s24 + $0x5e8] sm:$0xff] }
 0x6b2   : > { %6885 = vmatprep.subr.bf16.mxu0 %v6884_v43  ;;  %v6928_v43 = vpack.c.bf16 %v5381_v41, %v5379_v40  ;;  %v5421_v40 = vld [vmem:[%s10621_s24 + $0x5f8] sm:$0xff] }
 0x6b5   : > { %6887 = vmatpush1.bf16.msra.mxu0 %v6886_v47  ;;  %v6930_v47 = vpack.c.bf16 %v5380_v45, %v5378_v44  ;;  %v5420_v44 = vld [vmem:[%s10621_s24 + $0x5f0] sm:$0xff] }
 0x6b6   : > { %6889 = vmatprep.subr.bf16.mxu0 %v6888_v48  ;;  %v6932_v48 = vpack.c.bf16 %v5385_v7, %v5383_v46  ;;  %v3955_v46 = vld [vmem:[%s10622_s10 + $0x80] sm:$0xff]  ;;  %v3956_v7 = vld [vmem:[%s10622_s10 + $0x88] sm:$0xff] }
 0x6b9   : > { %6891 = vmatpush1.bf16.msra.mxu0 %v6890_v55  ;;  %v6934_v55 = vpack.c.bf16 %v5384_v51, %v5382_v49  ;;  %v3940_v49 = vld [vmem:[%s10622_s10 + $0x8] sm:$0xff]  ;;  %v5470_v51 = vld [vmem:[%s10622_s10 + $0x280] sm:$0xff] }
 0x6ba   : > { %6893 = vmatprep.subr.bf16.mxu0 %v6892_v56  ;;  %v6936_v56 = vpack.c.bf16 %v5389_v54, %v5387_v53  ;;  %v5471_v53 = vld [vmem:[%s10622_s10 + $0x288] sm:$0xff] }
 0x6bd   : > { %6895 = vmatpush1.bf16.msra.mxu0 %v6894_v61  ;;  %v6938_v61 = vpack.c.bf16 %v5388_v58, %v5386_v57  ;;  %v3958_v57 = vld [vmem:[%s10622_s10 + $0x98] sm:$0xff]  ;;  %v3941_v58 = vld [vmem:[%s10622_s10 + $0x10] sm:$0xff] }
 0x6be   : > { %6897 = vmatprep.subr.bf16.mxu0 %v6896_v62  ;;  %v6940_v62 = vpack.c.bf16 %v5393_v60, %v5391_v59  ;;  %v3942_v59 = vld [vmem:[%s10622_s10 + $0x18] sm:$0xff] }
 0x6c1   : > { %6899 = vmatpush1.bf16.msra.mxu0 %v6898_v9  ;;  %v6942_v9 = vpack.c.bf16 %v5392_v0, %v5390_v63  ;;  %v3960_v63 = vld [vmem:[%s10622_s10 + $0xa8] sm:$0xff] }
 0x6c2   : > { %6901 = vmatprep.subr.bf16.mxu0 %v6900_v10  ;;  %v6944_v10 = vpack.c.bf16 %v5397_v4, %v5395_v1  ;;  %v3943_v1 = vld [vmem:[%s10622_s10 + $0x20] sm:$0xff]  ;;  %v3944_v4 = vld [vmem:[%s10622_s10 + $0x28] sm:$0xff] }
 0x6c5   : > { %6903 = vmatpush1.bf16.msra.mxu0 %v6902_v5  ;;  %v5399_v5 = vld [vmem:[%s10621_s24 + $0x548] sm:$0xff] }
 0x6c6   : > { %6905 = vmatprep.subr.bf16.mxu0 %v9103_v15  ;;  %v3709_v15 = vld [vmem:[#allocation11 + $0x10] sm:$0xff] }
 0x6c8   : > { %3702 = vmatmul.mubr.f32.vlgmr.msra.gmra.mrb[20].mxu0 %v9310_v32  ;;  %v5367_v32 = vld [vmem:[%s10621_s24 + $0x448] sm:$0xff] }
 0x6c9   : > { %6907 = vmatpush1.bf16.msra.mxu0 %v9101_v22  ;;  %3777 = vmatprep.mubr.f32.mxu0 %v7804_v13  ;;  %v5369_v22 = vld [vmem:[%s10621_s24 + $0x458] sm:$0xff] }
 0x6ca   : > { %6909 = vmatprep.subr.bf16.mxu0 %v6908_v2  ;;  %v6916_v24 = vpack.c.bf16 %v5369_v22, %v5367_v32  ;;  %v6948_v2 = vpack.c.bf16 %v5401_v14, %v5399_v5  ;;  %v5409_v32 = vld [vmem:[%s10621_s24 + $0x598] sm:$0xff] }
 0x6cb   : > { %v3946_v14 = vld [vmem:[%s10622_s10 + $0x38] sm:$0xff] }
 0x6cc   : > { %5357 = vmatmul.mubr.msk.f32.vlgmr.msra.gmra.mrb[22].mxu0 %vm3286_vm2, %v3709_v15  ;;  %v6950_v15 = vpack.c.bf16 %v5400_v17, %v5398_v8  ;;  %v3964_v8 = vld [vmem:[%s10622_s10 + $0xc8] sm:$0xff]  ;;  %v3947_v17 = vld [vmem:[%s10622_s10 + $0x40] sm:$0xff] }
 0x6cd   : > { %6911 = vmatpush1.bf16.msra.mxu0 %v6910_v20  ;;  %v6952_v20 = vpack.c.bf16 %v5405_v19, %v5403_v18  ;;  %v3948_v19 = vld [vmem:[%s10622_s10 + $0x48] sm:$0xff] }
 0x6ce   : > { %6913 = vmatprep.subr.bf16.mxu0 %v6912_v6  ;;  %v5402_v6 = vld [vmem:[%s10621_s24 + $0x560] sm:$0xff] }
 0x6cf   : > { %v6954_v22 = vpack.c.bf16 %v5404_v11, %v5402_v6  ;;  %v3966_v6 = vld [vmem:[%s10622_s10 + $0xd8] sm:$0xff]  ;;  %v3949_v11 = vld [vmem:[%s10622_s10 + $0x50] sm:$0xff] }
 0x6d1   : > { %6915 = vmatpush1.bf16.msra.mxu0 %v6914_v23  ;;  %v6956_v23 = vpack.c.bf16 %v5409_v32, %v5407_v21  ;;  %v3950_v32 = vld [vmem:[%s10622_s10 + $0x58] sm:$0xff] }
 0x6d2   : > { %6917 = vmatprep.subr.bf16.mxu0 %v6916_v24  ;;  %v5406_v24 = vld [vmem:[%s10621_s24 + $0x580] sm:$0xff] }
 0x6d3   : > { %v6958_v28 = vpack.c.bf16 %v5408_v25, %v5406_v24  ;;  %v3968_v24 = vld [vmem:[%s10622_s10 + $0xe8] sm:$0xff]  ;;  %v3951_v25 = vld [vmem:[%s10622_s10 + $0x60] sm:$0xff] }
 0x6d5   : > { %6919 = vmatpush1.bf16.msra.mxu0 %v6918_v29  ;;  %v6960_v29 = vpack.c.bf16 %v5413_v27, %v5411_v26  ;;  %v3952_v27 = vld [vmem:[%s10622_s10 + $0x68] sm:$0xff] }
 0x6d6   : > { %6921 = vmatprep.subr.bf16.mxu0 %v6920_v30  ;;  %v5410_v30 = vld [vmem:[%s10621_s24 + $0x5a0] sm:$0xff] }
 0x6d7   : > { %v6962_v35 = vpack.c.bf16 %v5412_v31, %v5410_v30  ;;  %v5455_v30 = vld [vmem:[%s10622_s10 + $0x208] sm:$0xff]  ;;  %v5472_v31 = vld [vmem:[%s10622_s10 + $0x290] sm:$0xff] }
 0x6d9   : > { %6923 = vmatpush1.bf16.msra.mxu0 %v6922_v36  ;;  %v6964_v36 = vpack.c.bf16 %v5417_v34, %v5415_v33  ;;  %v5473_v33 = vld [vmem:[%s10622_s10 + $0x298] sm:$0xff] }
 0x6da   : > { %6925 = vmatprep.subr.bf16.mxu0 %v6924_v37  ;;  %v5414_v37 = vld [vmem:[%s10621_s24 + $0x5c0] sm:$0xff] }
 0x6db   : > { %v6966_v41 = vpack.c.bf16 %v5416_v38, %v5414_v37  ;;  %v7040_v37 = vpack.c.bf16 %v5473_v33, %v5472_v31  ;;  %v5456_v38 = vld [vmem:[%s10622_s10 + $0x210] sm:$0xff] }
 0x6dd   : > { %6927 = vmatpush1.bf16.msra.mxu0 %v6926_v42  ;;  %v6968_v42 = vpack.c.bf16 %v5421_v40, %v5419_v39  ;;  %v5457_v39 = vld [vmem:[%s10622_s10 + $0x218] sm:$0xff]  ;;  %v5474_v40 = vld [vmem:[%s10622_s10 + $0x2a0] sm:$0xff] }
 0x6de   : > { %6929 = vmatprep.subr.bf16.mxu0 %v6928_v43  ;;  %v5418_v43 = vld [vmem:[%s10621_s24 + $0x5e0] sm:$0xff] }
 0x6df   : > { %v6970_v45 = vpack.c.bf16 %v5420_v44, %v5418_v43  ;;  %v5458_v44 = vld [vmem:[%s10622_s10 + $0x220] sm:$0xff] }
 0x6e1   : > { %6931 = vmatpush1.bf16.msra.mxu0 %v6930_v47  ;;  %v3939_v47 = vld [vmem:[%s10622_s10] sm:$0xff] }
 0x6e2   : > { %6933 = vmatprep.subr.bf16.mxu0 %v6932_v48  ;;  %v6972_v48 = vpack.c.bf16 %v3956_v7, %v3955_v46  ;;  %v6974_v54 = vpack.c.bf16 %v3940_v49, %v3939_v47  ;;  %v5476_v46 = vld [vmem:[%s10622_s10 + $0x2b0] sm:$0xff]  ;;  %v5477_v7 = vld [vmem:[%s10622_s10 + $0x2b8] sm:$0xff] }
 0x6e3   : > { %v5460_v49 = vld [vmem:[%s10622_s10 + $0x230] sm:$0xff] }
 0x6e4   : > { %6973 = vmatprep.subr.bf16.mxu1 %v6972_v48  ;;  %v7048_v48 = vpack.c.bf16 %v5477_v7, %v5476_v46  ;;  %v5537_v46 = vld [vmem:[%s10622_s10 + $0x498] sm:$0xff] }
 0x6e5   : > { %6935 = vmatpush1.bf16.msra.mxu0 %v6934_v55  ;;  %v7036_v55 = vpack.c.bf16 %v5471_v53, %v5470_v51  ;;  %6975 = vmatpush3.bf16.msra.mxu1 %v6974_v54  ;;  %v5461_v51 = vld [vmem:[%s10622_s10 + $0x238] sm:$0xff]  ;;  %v5478_v53 = vld [vmem:[%s10622_s10 + $0x2c0] sm:$0xff]  ;;  %v5479_v54 = vld [vmem:[%s10622_s10 + $0x2c8] sm:$0xff] }
 0x6e6   : > { %6937 = vmatprep.subr.bf16.mxu0 %v6936_v56  ;;  %v3957_v56 = vld [vmem:[%s10622_s10 + $0x90] sm:$0xff] }
 0x6e7   : > { %v6976_v60 = vpack.c.bf16 %v3958_v57, %v3957_v56  ;;  %v7052_v56 = vpack.c.bf16 %v5479_v54, %v5478_v53  ;;  %v5462_v57 = vld [vmem:[%s10622_s10 + $0x240] sm:$0xff] }
 0x6e9   : > { %6939 = vmatpush1.bf16.msra.mxu0 %v6938_v61  ;;  %v6978_v61 = vpack.c.bf16 %v3942_v59, %v3941_v58  ;;  %6977 = vmatprep.subr.bf16.mxu1 %v6976_v60  ;;  %v5463_v58 = vld [vmem:[%s10622_s10 + $0x248] sm:$0xff]  ;;  %v5480_v59 = vld [vmem:[%s10622_s10 + $0x2d0] sm:$0xff]  ;;  %v5481_v60 = vld [vmem:[%s10622_s10 + $0x2d8] sm:$0xff] }
 0x6ea   : > { %6941 = vmatprep.subr.bf16.mxu0 %v6940_v62  ;;  %v3959_v62 = vld [vmem:[%s10622_s10 + $0xa0] sm:$0xff] }
 0x6eb   : > { %v6980_v0 = vpack.c.bf16 %v3960_v63, %v3959_v62  ;;  %6979 = vmatpush3.bf16.msra.mxu1 %v6978_v61  ;;  %v7054_v61 = vpack.c.bf16 %v5463_v58, %v5462_v57  ;;  %v7056_v62 = vpack.c.bf16 %v5481_v60, %v5480_v59  ;;  %v5464_v63 = vld [vmem:[%s10622_s10 + $0x250] sm:$0xff]  ;;  %v5521_v57 = vld [vmem:[%s10622_s10 + $0x418] sm:$0xff]  ;;  %v5426_v58 = vld [vmem:[%s10622_s10 + $0x120] sm:$0xff] }
 0x6ed   : > { %6943 = vmatpush1.bf16.msra.mxu0 %v6942_v9  ;;  %v6982_v9 = vpack.c.bf16 %v3944_v4, %v3943_v1  ;;  %6981 = vmatprep.subr.bf16.mxu1 %v6980_v0  ;;  %v5465_v0 = vld [vmem:[%s10622_s10 + $0x258] sm:$0xff]  ;;  %v5482_v4 = vld [vmem:[%s10622_s10 + $0x2e0] sm:$0xff] }
 0x6ee   : > { %6945 = vmatprep.subr.bf16.mxu0 %v6944_v10  ;;  %v3961_v10 = vld [vmem:[%s10622_s10 + $0xb0] sm:$0xff]  ;;  %v7058_v1 = vpack.c.bf16 %v5465_v0, %v5464_v63  ;;  %v5539_v63 = vld [vmem:[%s10622_s10 + $0x4a8] sm:$0xff] }
 0x6ef   : > { %v6984_v5 = vpack.c.bf16 %v3962_v12, %v3961_v10  ;;  %6983 = vmatpush3.bf16.msra.mxu1 %v6982_v9  ;;  %v5483_v9 = vld [vmem:[%s10622_s10 + $0x2e8] sm:$0xff]  ;;  %v5466_v12 = vld [vmem:[%s10622_s10 + $0x260] sm:$0xff]  ;;  %v5444_v0 = vld [vmem:[%s10622_s10 + $0x1b0] sm:$0xff] }
 0x6f0   : > { %v7060_v10 = vpack.c.bf16 %v5483_v9, %v5482_v4 }
 0x6f1   : > { %6947 = vmatpush1.bf16.msra.mxu0 %v6946_v16  ;;  %v6986_v16 = vpack.c.bf16 %v3946_v14, %v3945_v3  ;;  %6985 = vmatprep.subr.bf16.mxu1 %v6984_v5  ;;  %v5467_v3 = vld [vmem:[%s10622_s10 + $0x268] sm:$0xff]  ;;  %v3969_v14 = vld [vmem:[%s10622_s10 + $0xf0] sm:$0xff] }
 0x6f2   : > { %6949 = vmatprep.subr.bf16.mxu0 %v6948_v2  ;;  %v3963_v2 = vld [vmem:[%s10622_s10 + $0xc0] sm:$0xff]  ;;  %v7062_v5 = vpack.c.bf16 %v5467_v3, %v5466_v12  ;;  %v5523_v3 = vld [vmem:[%s10622_s10 + $0x428] sm:$0xff] }
 0x6f3   : > { %v6988_v18 = vpack.c.bf16 %v3964_v8, %v3963_v2  ;;  %6987 = vmatpush3.bf16.msra.mxu1 %v6986_v16  ;;  %v3970_v16 = vld [vmem:[%s10622_s10 + $0xf8] sm:$0xff]  ;;  %v3953_v8 = vld [vmem:[%s10622_s10 + $0x70] sm:$0xff]  ;;  %v5522_v12 = vld [vmem:[%s10622_s10 + $0x420] sm:$0xff] }
 0x6f4   : > { %v7000_v2 = vpack.c.bf16 %v3970_v16, %v3969_v14  ;;  %v5429_v16 = vld [vmem:[%s10622_s10 + $0x138] sm:$0xff] }
 0x6f5   : > { %6951 = vmatpush1.bf16.msra.mxu0 %v6950_v15  ;;  %v6990_v15 = vpack.c.bf16 %v3948_v19, %v3947_v17  ;;  %6989 = vmatprep.subr.bf16.mxu1 %v6988_v18  ;;  %v3954_v17 = vld [vmem:[%s10622_s10 + $0x78] sm:$0xff]  ;;  %v5484_v19 = vld [vmem:[%s10622_s10 + $0x2f0] sm:$0xff] }
 0x6f6   : > { %6953 = vmatprep.subr.bf16.mxu0 %v6952_v20  ;;  %v3965_v20 = vld [vmem:[%s10622_s10 + $0xd0] sm:$0xff]  ;;  %v7002_v18 = vpack.c.bf16 %v3954_v17, %v3953_v8  ;;  %v5541_v8 = vld [vmem:[%s10622_s10 + $0x4b8] sm:$0xff]  ;;  %v5446_v17 = vld [vmem:[%s10622_s10 + $0x1c0] sm:$0xff] }
 0x6f7   : > { %v6992_v21 = vpack.c.bf16 %v3966_v6, %v3965_v20  ;;  %6991 = vmatpush3.bf16.msra.mxu1 %v6990_v15  ;;  %v5485_v15 = vld [vmem:[%s10622_s10 + $0x2f8] sm:$0xff]  ;;  %v5468_v6 = vld [vmem:[%s10622_s10 + $0x270] sm:$0xff] }
 0x6f8   : > { %v7064_v20 = vpack.c.bf16 %v5485_v15, %v5484_v19  ;;  %v7110_v19 = vpack.c.bf16 %v5523_v3, %v5522_v12  ;;  %v5533_v12 = vld [vmem:[%s10622_s10 + $0x478] sm:$0xff] }
 0x6f9   : > { %6955 = vmatpush1.bf16.msra.mxu0 %v6954_v22  ;;  %v6994_v22 = vpack.c.bf16 %v3950_v32, %v3949_v11  ;;  %6993 = vmatprep.subr.bf16.mxu1 %v6992_v21  ;;  %v5469_v11 = vld [vmem:[%s10622_s10 + $0x278] sm:$0xff]  ;;  %v5438_v32 = vld [vmem:[%s10622_s10 + $0x180] sm:$0xff] }
 0x6fa   : > { %6957 = vmatprep.subr.bf16.mxu0 %v6956_v23  ;;  %v3967_v23 = vld [vmem:[%s10622_s10 + $0xe0] sm:$0xff]  ;;  %v7066_v21 = vpack.c.bf16 %v5469_v11, %v5468_v6  ;;  %v5524_v6 = vld [vmem:[%s10622_s10 + $0x430] sm:$0xff]  ;;  %v5525_v11 = vld [vmem:[%s10622_s10 + $0x438] sm:$0xff] }
 0x6fb   : > { %v6996_v26 = vpack.c.bf16 %v3968_v24, %v3967_v23  ;;  %6995 = vmatpush3.bf16.msra.mxu1 %v6994_v22  ;;  %v5439_v22 = vld [vmem:[%s10622_s10 + $0x188] sm:$0xff]  ;;  %v5534_v24 = vld [vmem:[%s10622_s10 + $0x480] sm:$0xff] }
 0x6fc   : > { %v7004_v23 = vpack.c.bf16 %v5439_v22, %v5438_v32  ;;  %v5431_v22 = vld [vmem:[%s10622_s10 + $0x148] sm:$0xff] }
 0x6fd   : > { %6959 = vmatpush1.bf16.msra.mxu0 %v6958_v28  ;;  %v6998_v28 = vpack.c.bf16 %v3952_v27, %v3951_v25  ;;  %6997 = vmatprep.subr.bf16.mxu1 %v6996_v26  ;;  %v5535_v25 = vld [vmem:[%s10622_s10 + $0x488] sm:$0xff] }
 0x6fe   : > { %6961 = vmatprep.subr.bf16.mxu0 %v6960_v29  ;;  %v5454_v29 = vld [vmem:[%s10622_s10 + $0x200] sm:$0xff]  ;;  %v7100_v26 = vpack.c.bf16 %v5535_v25, %v5534_v24  ;;  %v3922_v27 = vld [vmem:[#allocation13] sm:$0x3]  ;;  %v5448_v25 = vld [vmem:[%s10622_s10 + $0x1d0] sm:$0xff] }
 0x6ff   : > { %6999 = vmatpush3.bf16.msra.mxu1 %v6998_v28  ;;  %v3927_v28 = vrot.slane %v3922_v27, %v8485_v50  ;;  %v5441_v50 = vld [vmem:[%s10622_s10 + $0x198] sm:$0xff]  ;;  %v5543_v24 = vld [vmem:[%s10622_s10 + $0x4c8] sm:$0xff] }
 0x700   : > { %7001 = vmatprep.subr.bf16.mxu1 %v7000_v2  ;;  %v5540_v2 = vld [vmem:[%s10622_s10 + $0x4b0] sm:$0xff] }
 0x701   : > { %6963 = vmatpush1.bf16.msra.mxu0 %v6962_v35  ;;  %v7038_v35 = vpack.c.bf16 %v5455_v30, %v5454_v29  ;;  %v3931_v29 = vrot.slane %v3922_v27, %v8487_v52  ;;  %v7114_v27 = vpack.c.bf16 %v5525_v11, %v5524_v6  ;;  %v5488_v6 = vld [vmem:[%s10622_s10 + $0x310] sm:$0xff] }
 0x702   : > { %6965 = vmatprep.subr.bf16.mxu0 %v6964_v36 }
 0x703   : > { %7003 = vmatpush3.bf16.msra.mxu1 %v7002_v18  ;;  %v5447_v18 = vld [vmem:[%s10622_s10 + $0x1c8] sm:$0xff] }
 0x704   : > { %7005 = vmatprep.subr.bf16.mxu1 %v7004_v23  ;;  %v7020_v32 = vpack.c.bf16 %v5447_v18, %v5446_v17  ;;  %v5542_v23 = vld [vmem:[%s10622_s10 + $0x4c0] sm:$0xff]  ;;  %v5505_v17 = vld [vmem:[%s10622_s10 + $0x398] sm:$0xff] }
 0x705   : > { %6967 = vmatpush1.bf16.msra.mxu0 %v6966_v41  ;;  %v5475_v41 = vld [vmem:[%s10622_s10 + $0x2a8] sm:$0xff] }
 0x706   : > { %6969 = vmatprep.subr.bf16.mxu0 %v6968_v42  ;;  %v7042_v42 = vpack.c.bf16 %v5457_v39, %v5456_v38  ;;  %v7044_v43 = vpack.c.bf16 %v5475_v41, %v5474_v40  ;;  %v5518_v40 = vld [vmem:[%s10622_s10 + $0x400] sm:$0xff]  ;;  %v5519_v41 = vld [vmem:[%s10622_s10 + $0x408] sm:$0xff] }
 0x709   : > { %6971 = vmatpush1.bf16.msra.mxu0 %v6970_v45  ;;  %v5459_v45 = vld [vmem:[%s10622_s10 + $0x228] sm:$0xff] }
 0x70a   : > { %7037 = vmatprep.subr.bf16.mxu0 %v7036_v55  ;;  %v7046_v47 = vpack.c.bf16 %v5459_v45, %v5458_v44  ;;  %v7050_v55 = vpack.c.bf16 %v5461_v51, %v5460_v49  ;;  %v5425_v44 = vld [vmem:[%s10622_s10 + $0x118] sm:$0xff]  ;;  %v5536_v45 = vld [vmem:[%s10622_s10 + $0x490] sm:$0xff]  ;;  %v5443_v49 = vld [vmem:[%s10622_s10 + $0x1a8] sm:$0xff]  ;;  %v7102_v51 = vpack.c.bf16 %v5519_v41, %v5518_v40 }
 0x79f   : > { %v3779_v34 = vpop.f32.mrb[22].mxu0 }
 0x7a0   : > { %v3781_v36 = vpop.f32.mrb[23].mxu0 }
 0x7a1   : > { %3913 = vmatprep.mubr.f32.mxu0 %v3781_v36 }
 0x7a2   : > { %3914 = vmatmul.mubr.f32.vlgmr.msra.gmra.mrb[20].mxu0 %v3779_v34  ;;  %v5422_v34 = vld [vmem:[%s10622_s10 + $0x100] sm:$0xff] }
 0x7a3   : > { %7039 = vmatpush3.bf16.msra.mxu0 %v7038_v35  ;;  %v5423_v35 = vld [vmem:[%s10622_s10 + $0x108] sm:$0xff] }
 0x7a4   : > { %7041 = vmatprep.subr.bf16.mxu0 %v7040_v37  ;;  %v5440_v37 = vld [vmem:[%s10622_s10 + $0x190] sm:$0xff]  ;;  %v7006_v39 = vpack.c.bf16 %v5423_v35, %v5422_v34  ;;  %v5433_v35 = vld [vmem:[%s10622_s10 + $0x158] sm:$0xff] }
 0x7a7   : > { %7043 = vmatpush3.bf16.msra.mxu0 %v7042_v42  ;;  %v5424_v42 = vld [vmem:[%s10622_s10 + $0x110] sm:$0xff] }
 0x7a8   : > { %7045 = vmatprep.subr.bf16.mxu0 %v7044_v43  ;;  %v7008_v43 = vpack.c.bf16 %v5441_v50, %v5440_v37  ;;  %v7010_v54 = vpack.c.bf16 %v5425_v44, %v5424_v42  ;;  %v5545_v37 = vld [vmem:[%s10622_s10 + $0x4d8] sm:$0xff]  ;;  %v5450_v50 = vld [vmem:[%s10622_s10 + $0x1e0] sm:$0xff] }
 0x7a9   : > { %v5529_v44 = vld [vmem:[%s10622_s10 + $0x458] sm:$0xff] }
 0x7ab   : > { %7047 = vmatpush3.bf16.msra.mxu0 %v7046_v47 }
 0x7ac   : > { %7049 = vmatprep.subr.bf16.mxu0 %v7048_v48  ;;  %v5442_v48 = vld [vmem:[%s10622_s10 + $0x1a0] sm:$0xff] }
 0x7ad   : > { %v7012_v60 = vpack.c.bf16 %v5443_v49, %v5442_v48  ;;  %v5547_v48 = vld [vmem:[%s10622_s10 + $0x4e8] sm:$0xff]  ;;  %v5452_v49 = vld [vmem:[%s10622_s10 + $0x1f0] sm:$0xff] }
 0x7af   : > { %7051 = vmatpush3.bf16.msra.mxu0 %v7050_v55  ;;  %v7104_v55 = vpack.c.bf16 %v5537_v46, %v5536_v45  ;;  %v5434_v45 = vld [vmem:[%s10622_s10 + $0x160] sm:$0xff] }
 0x7b0   : > { %7053 = vmatprep.subr.bf16.mxu0 %v7052_v56  ;;  %v5520_v56 = vld [vmem:[%s10622_s10 + $0x410] sm:$0xff] }
 0x7b1   : > { %v7106_v4 = vpack.c.bf16 %v5521_v57, %v5520_v56  ;;  %v5530_v56 = vld [vmem:[%s10622_s10 + $0x460] sm:$0xff]  ;;  %v5531_v57 = vld [vmem:[%s10622_s10 + $0x468] sm:$0xff] }
 0x7b3   : > { %7055 = vmatpush3.bf16.msra.mxu0 %v7054_v61  ;;  %v5427_v61 = vld [vmem:[%s10622_s10 + $0x128] sm:$0xff] }
 0x7b4   : > { %7057 = vmatprep.subr.bf16.mxu0 %v7056_v62  ;;  %v5538_v62 = vld [vmem:[%s10622_s10 + $0x4a0] sm:$0xff]  ;;  %v7014_v9 = vpack.c.bf16 %v5427_v61, %v5426_v58  ;;  %v5436_v58 = vld [vmem:[%s10622_s10 + $0x170] sm:$0xff] }
 0x7b5   : > { %v5548_v61 = vld [vmem:[%s10622_s10 + $0x4f0] sm:$0xff] }
 0x7b7   : > { %7059 = vmatpush3.bf16.msra.mxu0 %v7058_v1  ;;  %v5445_v1 = vld [vmem:[%s10622_s10 + $0x1b8] sm:$0xff] }
 0x7b8   : > { %7061 = vmatprep.subr.bf16.mxu0 %v7060_v10  ;;  %v7108_v10 = vpack.c.bf16 %v5539_v63, %v5538_v62  ;;  %v7016_v14 = vpack.c.bf16 %v5445_v1, %v5444_v0  ;;  %v5549_v62 = vld [vmem:[%s10622_s10 + $0x4f8] sm:$0xff]  ;;  %v5502_v63 = vld [vmem:[%s10622_s10 + $0x380] sm:$0xff]  ;;  %v5503_v0 = vld [vmem:[%s10622_s10 + $0x388] sm:$0xff]  ;;  %v7126_v1 = vpack.c.bf16 %v5531_v57, %v5530_v56 }
 0x7b9   : > { %v7068_v3 = vpack.c.bf16 %v5503_v0, %v5502_v63  ;;  %v5495_v63 = vld [vmem:[%s10622_s10 + $0x348] sm:$0xff]  ;;  %v5606_v0 = vld [vmem:[%s10622_s10 + $0x6c0] sm:$0xff] }
 0x7bb   : > { %7063 = vmatpush3.bf16.msra.mxu0 %v7062_v5  ;;  %v5428_v5 = vld [vmem:[%s10622_s10 + $0x130] sm:$0xff] }
 0x7bc   : > { %7065 = vmatprep.subr.bf16.mxu0 %v7064_v20  ;;  %v7018_v15 = vpack.c.bf16 %v5429_v16, %v5428_v5  ;;  %v7112_v20 = vpack.c.bf16 %v5541_v8, %v5540_v2  ;;  %v5486_v5 = vld [vmem:[%s10622_s10 + $0x300] sm:$0xff]  ;;  %v5599_v2 = vld [vmem:[%s10622_s10 + $0x688] sm:$0xff]  ;;  %v5504_v8 = vld [vmem:[%s10622_s10 + $0x390] sm:$0xff] }
 0x7bd   : > { %v5598_v16 = vld [vmem:[%s10622_s10 + $0x680] sm:$0xff] }
 0x7bf   : > { %7067 = vmatpush3.bf16.msra.mxu0 %v7066_v21  ;;  %v5430_v21 = vld [vmem:[%s10622_s10 + $0x140] sm:$0xff] }
 0x7c0   : > { %7101 = vmatprep.subr.bf16.mxu0 %v7100_v26  ;;  %v5449_v26 = vld [vmem:[%s10622_s10 + $0x1d8] sm:$0xff] }
 0x7c1   : > { %v7024_v34 = vpack.c.bf16 %v5449_v26, %v5448_v25  ;;  %v5506_v26 = vld [vmem:[%s10622_s10 + $0x3a0] sm:$0xff] }
 0x875   : > { %v3915_v30 = vpop.f32.mrb[20].mxu0 }
 0x876   : > { %v3934_v31 = vadd.f32 %v3927_v28, %v3915_v30  ;;  %v3917_v33 = vpop.f32.mrb[21].mxu0  ;;  %v7022_v28 = vpack.c.bf16 %v5431_v22, %v5430_v21  ;;  %v5526_v30 = vld [vmem:[%s10622_s10 + $0x440] sm:$0xff]  ;;  %v7164_v21 = vpack.c.bf16 %v5599_v2, %v5598_v16  ;;  %v5489_v22 = vld [vmem:[%s10622_s10 + $0x318] sm:$0xff]  ;;  %v5496_v16 = vld [vmem:[%s10622_s10 + $0x350] sm:$0xff] }
 0x877   : > { %v3935_v36 = vadd.f32 %v3931_v29, %v3917_v33  ;;  %v7116_v29 = vpack.c.bf16 %v5543_v24, %v5542_v23  ;;  %v5432_v33 = vld [vmem:[%s10622_s10 + $0x150] sm:$0xff]  ;;  %v5601_v24 = vld [vmem:[%s10622_s10 + $0x698] sm:$0xff] }
 0x878   : > { %v9913_v52 = vmax.f32 %v3934_v31, 0.0  ;;  %v5527_v31 = vld [vmem:[%s10622_s10 + $0x448] sm:$0xff]  ;;  %v7026_v41 = vpack.c.bf16 %v5433_v35, %v5432_v33  ;;  %v5600_v23 = vld [vmem:[%s10622_s10 + $0x690] sm:$0xff]  ;;  %v5490_v35 = vld [vmem:[%s10622_s10 + $0x320] sm:$0xff] }
 0x879   : > { %v9915_v38 = vmax.f32 %v3935_v36, 0.0  ;;  %v5544_v36 = vld [vmem:[%s10622_s10 + $0x4d0] sm:$0xff]  ;;  %v7118_v40 = vpack.c.bf16 %v5527_v31, %v5526_v30  ;;  %v7074_v30 = vpack.c.bf16 %v5489_v22, %v5488_v6  ;;  %v7168_v31 = vpack.c.bf16 %v5601_v24, %v5600_v23  ;;  %v5498_v22 = vld [vmem:[%s10622_s10 + $0x360] sm:$0xff]  ;;  %v5499_v24 = vld [vmem:[%s10622_s10 + $0x368] sm:$0xff] }
 0x87a   : > { %v4185_v53 = vrot.slane %v9913_v52, 2  ;;  %v7120_v42 = vpack.c.bf16 %v5545_v37, %v5544_v36  ;;  %v4077_v11 = vrot.slane %v9913_v52, 1  ;;  %v5584_v33 = vld [vmem:[%s10622_s10 + $0x610] sm:$0xff] }
 0x87b   : > { %4035 = vmatprep.mubr.f32.mxu1 %v9915_v38  ;;  %v4078_v7 = vrot.slane %v9915_v38, 1  ;;  %v4186_v47 = vrot.slane %v9915_v38, 2  ;;  %v4402_v59 = vrot.slane %v9915_v38, 4  ;;  %v4294_v25 = vrot.slane %v9915_v38, 3 }
 0x87c   : > { %4036 = vmatmul.mubr.f32.vlgmr.msra.gmra.mrb[44].mxu1 %v9913_v52  ;;  %v4618_v36 = vrot.slane %v9915_v38, 6 }
 0x87d   : > { %7007 = vmatpush3.bf16.msra.mxu1 %v7006_v39  ;;  %4145 = vmatprep.mubr.f32.mxu1 %v4078_v7  ;;  %v5451_v39 = vld [vmem:[%s10622_s10 + $0x1e8] sm:$0xff] }
 0x87e   : > { %4253 = vmatprep.mubr.f32.mxu0 %v4186_v47  ;;  %7009 = vmatprep.subr.bf16.mxu1 %v7008_v43  ;;  %v5528_v43 = vld [vmem:[%s10622_s10 + $0x450] sm:$0xff]  ;;  %v7028_v46 = vpack.c.bf16 %v5451_v39, %v5450_v50  ;;  %v5435_v7 = vld [vmem:[%s10622_s10 + $0x168] sm:$0xff]  ;;  %v5546_v47 = vld [vmem:[%s10622_s10 + $0x4e0] sm:$0xff] }
 0x87f   : > { %4254 = vmatmul.mubr.f32.vlgmr.msra.gmra.mrb[24].mxu0 %v4185_v53  ;;  %v7122_v53 = vpack.c.bf16 %v5529_v44, %v5528_v43  ;;  %v5491_v50 = vld [vmem:[%s10622_s10 + $0x328] sm:$0xff]  ;;  %v5602_v39 = vld [vmem:[%s10622_s10 + $0x6a0] sm:$0xff] }
 0x880   : > { %7103 = vmatpush3.bf16.msra.mxu0 %v7102_v51  ;;  %4469 = vmatprep.mubr.f32.mxu0 %v4402_v59  ;;  %v5453_v51 = vld [vmem:[%s10622_s10 + $0x1f8] sm:$0xff]  ;;  %v7078_v44 = vpack.c.bf16 %v5491_v50, %v5490_v35  ;;  %v5500_v35 = vld [vmem:[%s10622_s10 + $0x370] sm:$0xff] }
 0x881   : > { %7011 = vmatpush3.bf16.msra.mxu1 %v7010_v54  ;;  %7105 = vmatprep.subr.bf16.mxu0 %v7104_v55  ;;  %v7030_v54 = vpack.c.bf16 %v5435_v7, %v5434_v45  ;;  %v7124_v55 = vpack.c.bf16 %v5547_v48, %v5546_v47  ;;  %v7032_v59 = vpack.c.bf16 %v5453_v51, %v5452_v49  ;;  %v5587_v7 = vld [vmem:[%s10622_s10 + $0x628] sm:$0xff]  ;;  %v5492_v47 = vld [vmem:[%s10622_s10 + $0x330] sm:$0xff]  ;;  %v5493_v49 = vld [vmem:[%s10622_s10 + $0x338] sm:$0xff] }
 0x882   : > { %7013 = vmatprep.subr.bf16.mxu1 %v7012_v60  ;;  %v5437_v60 = vld [vmem:[%s10622_s10 + $0x178] sm:$0xff]  ;;  %v5604_v51 = vld [vmem:[%s10622_s10 + $0x6b0] sm:$0xff]  ;;  %v7082_v57 = vpack.c.bf16 %v5493_v49, %v5492_v47  ;;  %v5550_v47 = vld [vmem:[%s10622_s10 + $0x500] sm:$0xff] }
 0x883   : > { %v5612_v50 = vld [vmem:[%s10622_s10 + $0x6f0] sm:$0xff] }
 0x884   : > { %7107 = vmatpush3.bf16.msra.mxu0 %v7106_v4  ;;  %v7034_v4 = vpack.c.bf16 %v5437_v60, %v5436_v58  ;;  %v5589_v60 = vld [vmem:[%s10622_s10 + $0x638] sm:$0xff]  ;;  %v5568_v49 = vld [vmem:[%s10622_s10 + $0x590] sm:$0xff] }
 0x885   : > { %7015 = vmatpush3.bf16.msra.mxu1 %v7014_v9  ;;  %7109 = vmatprep.subr.bf16.mxu0 %v7108_v10  ;;  %v7128_v9 = vpack.c.bf16 %v5549_v62, %v5548_v61  ;;  %v5532_v10 = vld [vmem:[%s10622_s10 + $0x470] sm:$0xff]  ;;  %v5494_v61 = vld [vmem:[%s10622_s10 + $0x340] sm:$0xff] }
 0x886   : > { %7017 = vmatprep.subr.bf16.mxu1 %v7016_v14  ;;  %v5487_v14 = vld [vmem:[%s10622_s10 + $0x308] sm:$0xff]  ;;  %v7130_v18 = vpack.c.bf16 %v5533_v12, %v5532_v10  ;;  %v7086_v12 = vpack.c.bf16 %v5495_v63, %v5494_v61 }
 0x887   : > { %v5571_v61 = vld [vmem:[%s10622_s10 + $0x5a8] sm:$0xff] }
 0x888   : > { %7111 = vmatpush3.bf16.msra.mxu0 %v7110_v19  ;;  %v7070_v19 = vpack.c.bf16 %v5487_v14, %v5486_v5  ;;  %v5590_v5 = vld [vmem:[%s10622_s10 + $0x640] sm:$0xff]  ;;  %v5591_v14 = vld [vmem:[%s10622_s10 + $0x648] sm:$0xff] }
 0x889   : > { %7019 = vmatpush3.bf16.msra.mxu1 %v7018_v15  ;;  %7113 = vmatprep.subr.bf16.mxu0 %v7112_v20  ;;  %v5582_v15 = vld [vmem:[%s10622_s10 + $0x600] sm:$0xff]  ;;  %v5583_v20 = vld [vmem:[%s10622_s10 + $0x608] sm:$0xff] }
 0x88a   : > { %7021 = vmatprep.subr.bf16.mxu1 %v7020_v32  ;;  %v7072_v32 = vpack.c.bf16 %v5505_v17, %v5504_v8  ;;  %v5497_v8 = vld [vmem:[%s10622_s10 + $0x358] sm:$0xff]  ;;  %v5608_v17 = vld [vmem:[%s10622_s10 + $0x6d0] sm:$0xff] }
 0x88b   : > { %v7090_v6 = vpack.c.bf16 %v5497_v8, %v5496_v16  ;;  %v5574_v16 = vld [vmem:[%s10622_s10 + $0x5c0] sm:$0xff] }
 0x88c   : > { %7115 = vmatpush3.bf16.msra.mxu0 %v7114_v27  ;;  %v5507_v27 = vld [vmem:[%s10622_s10 + $0x3a8] sm:$0xff] }
 0x88d   : > { %7023 = vmatpush3.bf16.msra.mxu1 %v7022_v28  ;;  %7117 = vmatprep.subr.bf16.mxu0 %v7116_v29  ;;  %v7166_v28 = vpack.c.bf16 %v5583_v20, %v5582_v15  ;;  %v4401_v29 = vrot.slane %v9913_v52, 4  ;;  %v7076_v37 = vpack.c.bf16 %v5507_v27, %v5506_v26  ;;  %v5515_v15 = vld [vmem:[%s10622_s10 + $0x3e8] sm:$0xff]  ;;  %v7182_v20 = vpack.c.bf16 %v5591_v14, %v5590_v5  ;;  %v5516_v27 = vld [vmem:[%s10622_s10 + $0x3f0] sm:$0xff]  ;;  %v5557_v14 = vld [vmem:[%s10622_s10 + $0x538] sm:$0xff] }
 0x88e   : > { %7025 = vmatprep.subr.bf16.mxu1 %v7024_v34  ;;  %v5585_v34 = vld [vmem:[%s10622_s10 + $0x618] sm:$0xff]  ;;  %v5611_v26 = vld [vmem:[%s10622_s10 + $0x6e8] sm:$0xff]  ;;  %v5556_v5 = vld [vmem:[%s10622_s10 + $0x530] sm:$0xff] }
 0x88f   : > { %v7170_v43 = vpack.c.bf16 %v5585_v34, %v5584_v33  ;;  %v5594_v33 = vld [vmem:[%s10622_s10 + $0x660] sm:$0xff]  ;;  %v5595_v34 = vld [vmem:[%s10622_s10 + $0x668] sm:$0xff]  ;;  %v7146_v8 = vpack.c.bf16 %v5557_v14, %v5556_v5  ;;  %v5624_v5 = vld [vmem:[%s10622_s10 + $0x750] sm:$0xff] }
 0x890   : > { %7119 = vmatpush3.bf16.msra.mxu0 %v7118_v40  ;;  %v5603_v40 = vld [vmem:[%s10622_s10 + $0x6a8] sm:$0xff]  ;;  %v5625_v14 = vld [vmem:[%s10622_s10 + $0x758] sm:$0xff] }
 0x891   : > { %7027 = vmatpush3.bf16.msra.mxu1 %v7026_v41  ;;  %7121 = vmatprep.subr.bf16.mxu0 %v7120_v42  ;;  %v5508_v41 = vld [vmem:[%s10622_s10 + $0x3b0] sm:$0xff]  ;;  %v5509_v42 = vld [vmem:[%s10622_s10 + $0x3b8] sm:$0xff]  ;;  %v7172_v45 = vpack.c.bf16 %v5603_v40, %v5602_v39  ;;  %v5566_v40 = vld [vmem:[%s10622_s10 + $0x580] sm:$0xff] }
 0x892   : > { %7029 = vmatprep.subr.bf16.mxu1 %v7028_v46  ;;  %v5586_v46 = vld [vmem:[%s10622_s10 + $0x620] sm:$0xff]  ;;  %v7080_v48 = vpack.c.bf16 %v5509_v42, %v5508_v41  ;;  %v5613_v39 = vld [vmem:[%s10622_s10 + $0x6f8] sm:$0xff]  ;;  %v5567_v41 = vld [vmem:[%s10622_s10 + $0x588] sm:$0xff]  ;;  %v7190_v42 = vpack.c.bf16 %v5595_v34, %v5594_v33 }
 0x893   : > { %v7174_v56 = vpack.c.bf16 %v5587_v7, %v5586_v46  ;;  %v5597_v46 = vld [vmem:[%s10622_s10 + $0x678] sm:$0xff]  ;;  %v7132_v7 = vpack.c.bf16 %v5567_v41, %v5566_v40  ;;  %v5564_v33 = vld [vmem:[%s10622_s10 + $0x570] sm:$0xff]  ;;  %v5615_v40 = vld [vmem:[%s10622_s10 + $0x708] sm:$0xff] }
 0x894   : > { %7123 = vmatpush3.bf16.msra.mxu0 %v7122_v53  ;;  %v5605_v53 = vld [vmem:[%s10622_s10 + $0x6b8] sm:$0xff]  ;;  %v5632_v41 = vld [vmem:[%s10622_s10 + $0x790] sm:$0xff] }
 0x895   : > { %7031 = vmatpush3.bf16.msra.mxu1 %v7030_v54  ;;  %7125 = vmatprep.subr.bf16.mxu0 %v7124_v55  ;;  %v5510_v54 = vld [vmem:[%s10622_s10 + $0x3c0] sm:$0xff]  ;;  %v5511_v55 = vld [vmem:[%s10622_s10 + $0x3c8] sm:$0xff]  ;;  %v7176_v58 = vpack.c.bf16 %v5605_v53, %v5604_v51  ;;  %v5569_v51 = vld [vmem:[%s10622_s10 + $0x598] sm:$0xff] }
 0x896   : > { %7033 = vmatprep.subr.bf16.mxu1 %v7032_v59  ;;  %v5588_v59 = vld [vmem:[%s10622_s10 + $0x630] sm:$0xff]  ;;  %v7084_v62 = vpack.c.bf16 %v5511_v55, %v5510_v54  ;;  %v4293_v55 = vrot.slane %v9913_v52, 3  ;;  %v5565_v34 = vld [vmem:[%s10622_s10 + $0x578] sm:$0xff] }
 0x897   : > { %v7178_v10 = vpack.c.bf16 %v5589_v60, %v5588_v59  ;;  %v4510_v59 = vrot.slane %v9915_v38, 5  ;;  %v5570_v60 = vld [vmem:[%s10622_s10 + $0x5a0] sm:$0xff] }
 0x898   : > { %7127 = vmatpush3.bf16.msra.mxu0 %v7126_v1  ;;  %v5607_v1 = vld [vmem:[%s10622_s10 + $0x6c8] sm:$0xff] }
 0x899   : > { %7035 = vmatpush3.bf16.msra.mxu1 %v7034_v4  ;;  %7129 = vmatprep.subr.bf16.mxu0 %v7128_v9  ;;  %v5512_v4 = vld [vmem:[%s10622_s10 + $0x3d0] sm:$0xff]  ;;  %v5513_v9 = vld [vmem:[%s10622_s10 + $0x3d8] sm:$0xff] }
 0x89a   : > { %7069 = vmatprep.subr.bf16.mxu1 %v7068_v3  ;;  %v7180_v3 = vpack.c.bf16 %v5607_v1, %v5606_v0  ;;  %v7088_v2 = vpack.c.bf16 %v5513_v9, %v5512_v4  ;;  %v7140_v0 = vpack.c.bf16 %v5571_v61, %v5570_v60  ;;  %v5554_v1 = vld [vmem:[%s10622_s10 + $0x520] sm:$0xff]  ;;  %v5555_v4 = vld [vmem:[%s10622_s10 + $0x528] sm:$0xff]  ;;  %v5572_v9 = vld [vmem:[%s10622_s10 + $0x5b0] sm:$0xff] }
 0x89b   : > { %v5621_v60 = vld [vmem:[%s10622_s10 + $0x738] sm:$0xff]  ;;  %v5638_v61 = vld [vmem:[%s10622_s10 + $0x7c0] sm:$0xff] }
 0x89c   : > { %7131 = vmatpush3.bf16.msra.mxu0 %v7130_v18  ;;  %4146 = vmatmul.mubr.f32.vlgmr.msra.gmra.mrb[46].mxu1 %v4077_v11  ;;  %v5609_v18 = vld [vmem:[%s10622_s10 + $0x6d8] sm:$0xff] }
 0x89d   : > { %7071 = vmatpush3.bf16.msra.mxu1 %v7070_v19  ;;  %4361 = vmatprep.mubr.f32.mxu1 %v4294_v25  ;;  %v5514_v19 = vld [vmem:[%s10622_s10 + $0x3e0] sm:$0xff]  ;;  %v7184_v11 = vpack.c.bf16 %v5609_v18, %v5608_v17 }
 0x89e   : > { %7165 = vmatprep.subr.bf16.mxu0 %v7164_v21  ;;  %7073 = vmatprep.subr.bf16.mxu1 %v7072_v32  ;;  %v5592_v21 = vld [vmem:[%s10622_s10 + $0x650] sm:$0xff]  ;;  %v5593_v32 = vld [vmem:[%s10622_s10 + $0x658] sm:$0xff]  ;;  %v7092_v23 = vpack.c.bf16 %v5515_v15, %v5514_v19  ;;  %v5610_v25 = vld [vmem:[%s10622_s10 + $0x6e0] sm:$0xff] }
 0x89f   : > { %4470 = vmatmul.mubr.f32.vlgmr.msra.gmra.mrb[26].mxu0 %v4401_v29  ;;  %v7186_v29 = vpack.c.bf16 %v5593_v32, %v5592_v21  ;;  %v5558_v18 = vld [vmem:[%s10622_s10 + $0x540] sm:$0xff]  ;;  %v5559_v19 = vld [vmem:[%s10622_s10 + $0x548] sm:$0xff]  ;;  %v5576_v15 = vld [vmem:[%s10622_s10 + $0x5d0] sm:$0xff] }
 0x8a0   : > { %7167 = vmatpush3.bf16.msra.mxu0 %v7166_v28  ;;  %4685 = vmatprep.mubr.f32.mxu0 %v4618_v36  ;;  %v5517_v28 = vld [vmem:[%s10622_s10 + $0x3f8] sm:$0xff]  ;;  %v5560_v21 = vld [vmem:[%s10622_s10 + $0x550] sm:$0xff] }
 0x8a1   : > { %7075 = vmatpush3.bf16.msra.mxu1 %v7074_v30  ;;  %7169 = vmatprep.subr.bf16.mxu0 %v7168_v31  ;;  %v7094_v30 = vpack.c.bf16 %v5499_v24, %v5498_v22  ;;  %v7188_v31 = vpack.c.bf16 %v5611_v26, %v5610_v25  ;;  %v7096_v36 = vpack.c.bf16 %v5517_v28, %v5516_v27  ;;  %v5561_v32 = vld [vmem:[%s10622_s10 + $0x558] sm:$0xff]  ;;  %v5578_v22 = vld [vmem:[%s10622_s10 + $0x5e0] sm:$0xff]  ;;  %v5563_v27 = vld [vmem:[%s10622_s10 + $0x568] sm:$0xff] }
 0x8a2   : > { %7077 = vmatprep.subr.bf16.mxu1 %v7076_v37  ;;  %v5501_v37 = vld [vmem:[%s10622_s10 + $0x378] sm:$0xff]  ;;  %v7154_v24 = vpack.c.bf16 %v5561_v32, %v5560_v21  ;;  %v5562_v26 = vld [vmem:[%s10622_s10 + $0x560] sm:$0xff]  ;;  %v5580_v28 = vld [vmem:[%s10622_s10 + $0x5f0] sm:$0xff] }
 0x8a3   : > { %v5628_v21 = vld [vmem:[%s10622_s10 + $0x770] sm:$0xff]  ;;  %v5629_v32 = vld [vmem:[%s10622_s10 + $0x778] sm:$0xff] }
 0x8a4   : > { %7171 = vmatpush3.bf16.msra.mxu0 %v7170_v43  ;;  %v7098_v43 = vpack.c.bf16 %v5501_v37, %v5500_v35  ;;  %v5630_v35 = vld [vmem:[%s10622_s10 + $0x780] sm:$0xff]  ;;  %v7162_v37 = vpack.c.bf16 %v5565_v34, %v5564_v33  ;;  %v4806_v33 = vld [vmem:[%s10623_s0 + $0x28] sm:$0xff] }
 0x8a5   : > { %7079 = vmatpush3.bf16.msra.mxu1 %v7078_v44  ;;  %7173 = vmatprep.subr.bf16.mxu0 %v7172_v45  ;;  %v7192_v44 = vpack.c.bf16 %v5613_v39, %v5612_v50  ;;  %v5596_v45 = vld [vmem:[%s10622_s10 + $0x670] sm:$0xff]  ;;  %v5614_v39 = vld [vmem:[%s10622_s10 + $0x700] sm:$0xff] }
 0x8a6   : > { %7081 = vmatprep.subr.bf16.mxu1 %v7080_v48  ;;  %v5551_v48 = vld [vmem:[%s10622_s10 + $0x508] sm:$0xff]  ;;  %v7194_v53 = vpack.c.bf16 %v5597_v46, %v5596_v45  ;;  %v5616_v46 = vld [vmem:[%s10622_s10 + $0x710] sm:$0xff] }
 0x8a7   : > { %v7134_v54 = vpack.c.bf16 %v5551_v48, %v5550_v47  ;;  %v4726_v47 = vrot.slane %v9915_v38, 7  ;;  %v5634_v48 = vld [vmem:[%s10622_s10 + $0x7a0] sm:$0xff]  ;;  %v5619_v38 = vld [vmem:[%s10622_s10 + $0x728] sm:$0xff] }
 0x8a8   : > { %7175 = vmatpush3.bf16.msra.mxu0 %v7174_v56  ;;  %v7136_v56 = vpack.c.bf16 %v5569_v51, %v5568_v49  ;;  %v5635_v49 = vld [vmem:[%s10622_s10 + $0x7a8] sm:$0xff] }
 0x8a9   : > { %7083 = vmatpush3.bf16.msra.mxu1 %v7082_v57  ;;  %7177 = vmatprep.subr.bf16.mxu0 %v7176_v58  ;;  %v5552_v57 = vld [vmem:[%s10622_s10 + $0x510] sm:$0xff]  ;;  %v5553_v58 = vld [vmem:[%s10622_s10 + $0x518] sm:$0xff] }
 0x8aa   : > { %7085 = vmatprep.subr.bf16.mxu1 %v7084_v62  ;;  %v4617_v62 = vrot.slane %v9913_v52, 6  ;;  %v7138_v63 = vpack.c.bf16 %v5553_v58, %v5552_v57 }
 0x8ac   : > { %7179 = vmatpush3.bf16.msra.mxu0 %v7178_v10  ;;  %v5573_v10 = vld [vmem:[%s10622_s10 + $0x5b8] sm:$0xff] }
 0x8ad   : > { %7087 = vmatpush3.bf16.msra.mxu1 %v7086_v12  ;;  %7181 = vmatprep.subr.bf16.mxu0 %v7180_v3  ;;  %v7142_v12 = vpack.c.bf16 %v5555_v4, %v5554_v1  ;;  %v7144_v3 = vpack.c.bf16 %v5573_v10, %v5572_v9  ;;  %v5622_v1 = vld [vmem:[%s10622_s10 + $0x740] sm:$0xff]  ;;  %v5623_v4 = vld [vmem:[%s10622_s10 + $0x748] sm:$0xff]  ;;  %v5640_v9 = vld [vmem:[%s10622_s10 + $0x7d0] sm:$0xff] }
 0x8ae   : > { %7089 = vmatprep.subr.bf16.mxu1 %v7088_v2  ;;  %v5575_v2 = vld [vmem:[%s10622_s10 + $0x5c8] sm:$0xff]  ;;  %v5641_v10 = vld [vmem:[%s10622_s10 + $0x7d8] sm:$0xff] }
 0x8af   : > { %v7148_v17 = vpack.c.bf16 %v5575_v2, %v5574_v16  ;;  %v5642_v16 = vld [vmem:[%s10622_s10 + $0x7e0] sm:$0xff]  ;;  %v5643_v2 = vld [vmem:[%s10622_s10 + $0x7e8] sm:$0xff] }
 0x8b0   : > { %7183 = vmatpush3.bf16.msra.mxu0 %v7182_v20  ;;  %v5577_v20 = vld [vmem:[%s10622_s10 + $0x5d8] sm:$0xff] }
 0x8b1   : > { %7091 = vmatpush3.bf16.msra.mxu1 %v7090_v6  ;;  %7185 = vmatprep.subr.bf16.mxu0 %v7184_v11  ;;  %v7150_v6 = vpack.c.bf16 %v5559_v19, %v5558_v18  ;;  %v7152_v11 = vpack.c.bf16 %v5577_v20, %v5576_v15  ;;  %v5626_v18 = vld [vmem:[%s10622_s10 + $0x760] sm:$0xff]  ;;  %v5627_v19 = vld [vmem:[%s10622_s10 + $0x768] sm:$0xff]  ;;  %v5644_v15 = vld [vmem:[%s10622_s10 + $0x7f0] sm:$0xff] }
 0x8b2   : > { %7093 = vmatprep.subr.bf16.mxu1 %v7092_v23  ;;  %v5579_v23 = vld [vmem:[%s10622_s10 + $0x5e8] sm:$0xff]  ;;  %v5645_v20 = vld [vmem:[%s10622_s10 + $0x7f8] sm:$0xff] }
 0x8b3   : > { %v7156_v25 = vpack.c.bf16 %v5579_v23, %v5578_v22  ;;  %v7226_v22 = vpack.c.bf16 %v5629_v32, %v5628_v21  ;;  %v4725_v23 = vrot.slane %v9913_v52, 7 }
 0x8b4   : > { %7187 = vmatpush3.bf16.msra.mxu0 %v7186_v29  ;;  %v5581_v29 = vld [vmem:[%s10622_s10 + $0x5f8] sm:$0xff] }
 0x8b5   : > { %7095 = vmatpush3.bf16.msra.mxu1 %v7094_v30  ;;  %7189 = vmatprep.subr.bf16.mxu0 %v7188_v31  ;;  %v7158_v30 = vpack.c.bf16 %v5563_v27, %v5562_v26  ;;  %v7160_v31 = vpack.c.bf16 %v5581_v29, %v5580_v28  ;;  %v4803_v26 = vld [vmem:[%s10623_s0 + $0x10] sm:$0xff]  ;;  %v7805_v27 = vmov 0.0|0.0  }
 0x8b6   : > { %7097 = vmatprep.subr.bf16.mxu1 %v7096_v36  ;;  %v5631_v36 = vld [vmem:[%s10622_s10 + $0x788] sm:$0xff] }
 0x8b7   : > { %v7196_v50 = vpack.c.bf16 %v5631_v36, %v5630_v35 }
 0x8b8   : > { %7191 = vmatpush3.bf16.msra.mxu0 %v7190_v42  ;;  %v5633_v42 = vld [vmem:[%s10622_s10 + $0x798] sm:$0xff] }
 0x8b9   : > { %7099 = vmatpush3.bf16.msra.mxu1 %v7098_v43  ;;  %7193 = vmatprep.subr.bf16.mxu0 %v7192_v44  ;;  %v7198_v43 = vpack.c.bf16 %v5615_v40, %v5614_v39  ;;  %v4509_v44 = vrot.slane %v9913_v52, 5  ;;  %v7200_v45 = vpack.c.bf16 %v5633_v42, %v5632_v41  ;;  %v4804_v52 = vld [vmem:[%s10623_s0 + $0x18] sm:$0xff]  ;;  %v4807_v39 = vld [vmem:[%s10623_s0 + $0x30] sm:$0xff] }
 0x8ba   : > { %7133 = vmatprep.subr.bf16.mxu1 %v7132_v7  ;;  %v5617_v7 = vld [vmem:[%s10622_s10 + $0x718] sm:$0xff]  ;;  %v7232_v29 = vpack.c.bf16 %v4804_v52, %v4803_v26 }
 0x8bb   : > { %v7202_v51 = vpack.c.bf16 %v5617_v7, %v5616_v46  ;;  %v4808_v40 = vld [vmem:[%s10623_s0 + $0x38] sm:$0xff] }
 0x8bc   : > { %7195 = vmatpush3.bf16.msra.mxu0 %v7194_v53  ;;  %4362 = vmatmul.mubr.f32.vlgmr.msra.gmra.mrb[48].mxu1 %v4293_v55  ;;  %v7204_v53 = vpack.c.bf16 %v5635_v49, %v5634_v48  ;;  %v5636_v55 = vld [vmem:[%s10622_s10 + $0x7b0] sm:$0xff]  ;;  %v7238_v42 = vpack.c.bf16 %v4808_v40, %v4807_v39 }
 0x8bd   : > { %7135 = vmatpush3.bf16.msra.mxu1 %v7134_v54  ;;  %4577 = vmatprep.mubr.f32.mxu1 %v4510_v59  ;;  %v5618_v54 = vld [vmem:[%s10622_s10 + $0x720] sm:$0xff]  ;;  %v5620_v59 = vld [vmem:[%s10622_s10 + $0x730] sm:$0xff] }
 0x8be   : > { %7137 = vmatprep.subr.bf16.mxu1 %v7136_v56  ;;  %v5637_v56 = vld [vmem:[%s10622_s10 + $0x7b8] sm:$0xff]  ;;  %v7206_v57 = vpack.c.bf16 %v5619_v38, %v5618_v54  ;;  %7228 = vmatprep.subr.bf16.mxu0 %v7805_v27 }
 0x8bf   : > { %4686 = vmatmul.mubr.f32.vlgmr.msra.gmra.mrb[28].mxu0 %v4617_v62  ;;  %v7208_v58 = vpack.c.bf16 %v5637_v56, %v5636_v55  ;;  %v5639_v62 = vld [vmem:[%s10622_s10 + $0x7c8] sm:$0xff] }
 0x8c0   : > { %6261 = vmatprep.mubr.msk.f32.mxu0 %vm7806_vm3, %v7804_v13 }
 0x8c1   : > { %7139 = vmatpush3.bf16.msra.mxu1 %v7138_v63  ;;  %v7210_v63 = vpack.c.bf16 %v5621_v60, %v5620_v59 }
 0x8c2   : > { %7141 = vmatprep.subr.bf16.mxu1 %v7140_v0  ;;  %v7212_v0 = vpack.c.bf16 %v5639_v62, %v5638_v61 }
 0x8c5   : > { %7143 = vmatpush3.bf16.msra.mxu1 %v7142_v12  ;;  %v7214_v12 = vpack.c.bf16 %v5623_v4, %v5622_v1 }
 0x8c6   : > { %7145 = vmatprep.subr.bf16.mxu1 %v7144_v3  ;;  %v7216_v3 = vpack.c.bf16 %v5641_v10, %v5640_v9 }
 0x8c9   : > { %7147 = vmatpush3.bf16.msra.mxu1 %v7146_v8  ;;  %v7218_v8 = vpack.c.bf16 %v5625_v14, %v5624_v5 }
 0x8ca   : > { %7149 = vmatprep.subr.bf16.mxu1 %v7148_v17  ;;  %v7220_v17 = vpack.c.bf16 %v5643_v2, %v5642_v16 }
 0x8cd   : > { %7151 = vmatpush3.bf16.msra.mxu1 %v7150_v6  ;;  %v7222_v6 = vpack.c.bf16 %v5627_v19, %v5626_v18 }
 0x8ce   : > { %7153 = vmatprep.subr.bf16.mxu1 %v7152_v11  ;;  %v7224_v11 = vpack.c.bf16 %v5645_v20, %v5644_v15 }
 0x8d1   : > { %7155 = vmatpush3.bf16.msra.mxu1 %v7154_v24  ;;  %v4801_v24 = vld [vmem:[%s10623_s0] sm:$0xff] }
 0x8d2   : > { %7157 = vmatprep.subr.bf16.mxu1 %v7156_v25  ;;  %v4802_v25 = vld [vmem:[%s10623_s0 + $0x8] sm:$0xff] }
 0x8d3   : > { %v7229_v28 = vpack.c.bf16 %v4802_v25, %v4801_v24 }
 0x8d5   : > { %7159 = vmatpush3.bf16.msra.mxu1 %v7158_v30  ;;  %7230 = vmatpush3.bf16.msra.mxu0 %v7229_v28 }
 0x8d6   : > { %7161 = vmatprep.subr.bf16.mxu1 %v7160_v31  ;;  %7231 = vmatprep.subr.bf16.mxu0 %v7805_v27  ;;  %v4805_v31 = vld [vmem:[%s10623_s0 + $0x20] sm:$0xff] }
 0x8d7   : > { %v7235_v35 = vpack.c.bf16 %v4806_v33, %v4805_v31 }
 0x8d9   : > { %7163 = vmatpush3.bf16.msra.mxu1 %v7162_v37  ;;  %7233 = vmatpush3.bf16.msra.mxu0 %v7232_v29 }
 0x8da   : > { %7197 = vmatprep.subr.bf16.mxu1 %v7196_v50  ;;  %7234 = vmatprep.subr.bf16.mxu0 %v7805_v27 }
 0x8dc   : > { %4578 = vmatmul.mubr.f32.vlgmr.msra.gmra.mrb[50].mxu1 %v4509_v44 }
 0x8dd   : > { %7199 = vmatpush3.bf16.msra.mxu1 %v7198_v43  ;;  %4793 = vmatprep.mubr.f32.mxu1 %v4726_v47  ;;  %v3938_v43 = vld [vmem:[#allocation14] sm:$0x1] }
 0x8de   : > { %7201 = vmatprep.subr.bf16.mxu1 %v7200_v45  ;;  %7236 = vmatpush3.bf16.msra.mxu0 %v7235_v35 }
 0x8df   : > { %7237 = vmatprep.subr.bf16.mxu0 %v7805_v27 }
 0x8e1   : > { %7203 = vmatpush3.bf16.msra.mxu1 %v7202_v51 }
 0x8e2   : > { %7205 = vmatprep.subr.bf16.mxu1 %v7204_v53  ;;  %7239 = vmatpush3.bf16.msra.mxu0 %v7238_v42 }
 0x8e5   : > { %7207 = vmatpush3.bf16.msra.mxu1 %v7206_v57 }
 0x8e6   : > { %7209 = vmatprep.subr.bf16.mxu1 %v7208_v58 }
 0x8e9   : > { %7211 = vmatpush3.bf16.msra.mxu1 %v7210_v63 }
 0x8ea   : > { %7213 = vmatprep.subr.bf16.mxu1 %v7212_v0 }
 0x8ed   : > { %7215 = vmatpush3.bf16.msra.mxu1 %v7214_v12 }
 0x8ee   : > { %7217 = vmatprep.subr.bf16.mxu1 %v7216_v3  ;;  %v4809_v3 = vld [vmem:[#allocation16] sm:$0x1] }
 0x8f1   : > { %7219 = vmatpush3.bf16.msra.mxu1 %v7218_v8 }
 0x8f2   : > { %7221 = vmatprep.subr.bf16.mxu1 %v7220_v17 }
 0x8f5   : > { %7223 = vmatpush3.bf16.msra.mxu1 %v7222_v6 }
 0x8f6   : > { %7225 = vmatprep.subr.bf16.mxu1 %v7224_v11 }
 0x8f9   : > { %7227 = vmatpush3.bf16.msra.mxu1 %v7226_v22 }
 0x8fc   : > { %4794 = vmatmul.mubr.f32.vlgmr.msra.gmra.mrb[52].mxu1 %v4725_v23 }
 0x94f   : > { %v5790_v30 = vpop.f32.mrb[44].mxu1 }
 0x950   : > { %v5791_v34 = vpop.f32.mrb[45].mxu1 }
 0x951   : > { %v5792_v36 = vadd.f32 %v5791_v34, %v5790_v30 }
 0x952   : > { %v5860_v37 = vpop.f32.mrb[24].mxu0 }
 0x953   : > { %v5861_v50 = vpop.f32.mrb[25].mxu0  ;;  %v4041_v46 = vadd.f32 %v5792_v36, %v3938_v43 }
 0x954   : > { %v5862_v41 = vadd.f32 %v5861_v50, %v5860_v37 }
 0x96f   : > { %v5825_v44 = vpop.f32.mrb[46].mxu1 }
 0x970   : > { %v5826_v45 = vpop.f32.mrb[47].mxu1 }
 0x971   : > { %v5827_v7 = vadd.f32 %v5826_v45, %v5825_v44 }
 0x972   : > { %v5930_v47 = vpop.f32.mrb[26].mxu0 }
 0x973   : > { %v4151_v48 = vadd.f32 %v5827_v7, %v4041_v46  ;;  %v5931_v49 = vpop.f32.mrb[27].mxu0 }
 0x974   : > { %v5932_v51 = vadd.f32 %v5931_v49, %v5930_v47 }
 0x975   : > { %v4259_v53 = vadd.f32 %v5862_v41, %v4151_v48 }
 0x98f   : > { %v5895_v54 = vpop.f32.mrb[48].mxu1 }
 0x990   : > { %v5896_v38 = vpop.f32.mrb[49].mxu1 }
 0x991   : > { %v5897_v55 = vadd.f32 %v5896_v38, %v5895_v54 }
 0x992   : > { %v6000_v56 = vpop.f32.mrb[28].mxu0 }
 0x993   : > { %v4367_v57 = vadd.f32 %v5897_v55, %v4259_v53  ;;  %v6001_v58 = vpop.f32.mrb[29].mxu0 }
 0x994   : > { %v6002_v59 = vadd.f32 %v6001_v58, %v6000_v56 }
 0x995   : > { %v4475_v13 = vadd.f32 %v5932_v51, %v4367_v57 }
 0x9af   : > { %v5965_v60 = vpop.f32.mrb[50].mxu1 }
 0x9b0   : > { %v5966_v61 = vpop.f32.mrb[51].mxu1 }
 0x9b1   : > { %v5967_v62 = vadd.f32 %v5966_v61, %v5965_v60 }
 0x9b3   : > { %v4583_v63 = vadd.f32 %v5967_v62, %v4475_v13 }
 0x9b5   : > { %v4691_v0 = vadd.f32 %v6002_v59, %v4583_v63 }
 0x9cf   : > { %v6035_v1 = vpop.f32.mrb[52].mxu1 }
 0x9d0   : > { %v6036_v4 = vpop.f32.mrb[53].mxu1 }
 0x9d1   : > { %v6037_v9 = vadd.f32 %v6036_v4, %v6035_v1 }
 0x9d3   : > { %v4799_v10 = vadd.f32 %v6037_v9, %v4691_v0 }
 0x9d5   : > { %v4800_v12 = vmax.f32 %v4799_v10, 0.0 }
 0x9d7   : > { %6262 = vmatmul.mubr.msk.f32.vlgmr.msra.gmra.mrb[30].mxu0 %vm603_vm0, %v4800_v12 }
 0xaaa   : > { %v4879_v5 = vpop.f32.mrb[30].mxu0 }
 0xaab   : > { %v4880_v14 = vadd.f32 %v4879_v5, %v4809_v3  ;;  %v6263_v16 = vpop.f32.mrb[31].mxu0 }
 0xaad   : > { %4884 = vst.msk [vmem:[%s590_s27] sm:$0x1] %vm4883_vm4, %v4880_v14 }
 0xaae   : > { %7720 = shalt.err (!%p7717_p9)
}
 0xaaf   : > { %s7721_s25 = scalar_lea.hbm %s10516_s3, 16  ;;  %s7725_s2 = scalar_lea.hbm %s10624_s21, 32 }
 0xab0   : > { %p7722_p4 = scmp.ne.s32.totalorder %s10516_s3, %s7721_s25  ;;  %p7726_p2 = scmp.lt.u32.totalorder %s10516_s3, %s10624_s21 }
 0xab1   : > { %p7727_p0 = scmp.lt.u32.totalorder %s7725_s2, %s7721_s25  ;;  %p7729_p10 = scmp.lt.u32.totalorder %s7721_s25, %s10516_s3 }
 0xab2   : > { %p7723_p3 = pnand %p7722_p4, %p10625_p1 }
 0xab3   : > { %p7728_p5 = por %p7727_p0, %p7726_p2 }
 0xab4   : > { %p7724_p6 = pneg %p7723_p3 }
 0xab5   : > { %p7730_p11 = por %p7729_p10, %p7728_p5 }
 0xab7   : > { %p7731_p12 = pnand %p7730_p11, %p7724_p6 }
 0xab9   : > { %7734 = shalt.err (!%p7731_p12)
}
 0xaba   : > { %7353 = dma.vmem_to_hbm [thread:$0]  (%p10625_p1), %s10518_s8, 16, %s10516_s3, %s4886_s5  }
 0xabb PF: > { %s4910_s1 = sand.u32 1, %s7777_s29   ;;  %p10626_p13 = scmp.ne.s32.totalorder %s10605_s18, 0 }
 0xabc   : > { %p10627_p8 = scmp.ge.s32.totalorder %s7789_s16, 2  ;;  %s4911_s26 = scalar_lea.sflag [#allocation4], %s4910_s1 }
 0xabe   : > { %p7385_p7 = pnand %p10627_p8, %p10626_p13 }
 0xac0   : > { %7772 = dma.done.wait (!%p7385_p7), %s4911_s26, 16  }
 0xac1   : > { %7774 = vsyncadd (!%p7385_p7), %s4911_s26, 4294967280  ;;  %p31_p9 = scmp.ge.s32.totalorder %s8097_s23, 4   ;;  %s10628_s29 = smov %s7781_s30 }
 0xac2   : > { %s10629_s30 = smov %s7785_s15  ;;  %s10630_s15 = smov %s8108_s17 }
 0xac3   : > { %s10631_s16 = smov %s8097_s23  ;;  %33 = sbr.rel (!%p31_p9) target bundleno = 20 (0x14), region = 180 }
 0xaca   :  { %4915 = vsyncpa [#allocation3], 1 }
 0xacb   :  { %4917 = vsyncpa [#allocation3 + $0x1], 1 }
 0xacc   :  { %4918 = vsyncpa [#allocation6], 1 }
 0xacd   :  { %4919 = vsyncpa [#allocation9], 1 }
 0xace   :  { %4920 = vsyncpa [#allocation12], 1 }
 0xacf   :  { %4921 = vsyncpa [#allocation15], 1 }
 0xad0   :  { %4922 = vsyncpa [#allocation4], 1 }
 0xad1   :  { %4924 = vsyncpa [#allocation4 + $0x1], 1 }

</bundles_post_ra>
